<compile_context>
chip_gen: v6e
topology: v6e:2x2x1
jax: 0.10.0
libtpu: 0.0.40
codegen_flags: <defaults>
</compile_context>

<pallas_src>
import numpy as np
import jax
import jax.numpy as jnp
from jax.experimental import pallas as pl
from jax.experimental.pallas import tpu as pltpu  # noqa: F401  (TPU backend)

NUM_QUBITS = 5
NUM_LAYERS = 2                                   # TwoLocal reps
DIM = 2 ** NUM_QUBITS                            # 32
NUM_ROT_LAYERS = NUM_LAYERS + 1                  # 3 rotation layers
NUM_PARAMS = NUM_ROT_LAYERS * 3 * NUM_QUBITS     # 45 == circuit.num_parameters
BDIM = 2 * DIM                                   # 64  (real-block dimension)
OUT_LANES = 4 * DIM                              # 128 (lane-dense slab width)

# CZ with 'linear' entanglement is diagonal(+-1) and parameter-independent:
# build it once with numpy (zero XLA ops at runtime).
_idx = np.arange(DIM)
_cz = np.ones(DIM, np.float32)
for _c in range(NUM_QUBITS - 1):
    _both = ((_idx >> _c) & 1) & ((_idx >> (_c + 1)) & 1)
    _cz = np.where(_both == 1, -_cz, _cz)
CZ_DIAG = jnp.asarray(_cz, dtype=jnp.float32)


# --------------- host-side (fused under jit): build the two kernel inputs --------------
def _two_local_gates(params):
    """(45,) -> (3, 5, 2, 2) complex64 closed-form gates rz(c) @ ry(b) @ rz(a).

    Qiskit TwoLocal param order per rotation layer: rz block (q0..q4), ry block,
    rz block.  # TODO(synk): validated only against the in-file reference, not Aer.
    """
    lp = params.reshape(NUM_ROT_LAYERS, 3, NUM_QUBITS).astype(jnp.float32)
    a, b, c = lp[:, 0], lp[:, 1], lp[:, 2]               # each (3, 5)
    cb, sb = jnp.cos(0.5 * b), jnp.sin(0.5 * b)
    e_msum = jnp.exp(-0.5j * (a + c))                    # e^{-i(a+c)/2}
    e_pdif = jnp.exp(0.5j * (a - c))                     # e^{+i(a-c)/2}
    g00 = cb * e_msum
    g01 = -sb * e_pdif
    g10 = sb * jnp.conj(e_pdif)
    g11 = cb * jnp.conj(e_msum)
    row0 = jnp.stack([g00, g01], axis=-1)
    row1 = jnp.stack([g10, g11], axis=-1)
    return jnp.stack([row0, row1], axis=-2).astype(jnp.complex64)   # (3,5,2,2)


def _block_t(u):
    """complex (32,32) U -> transposed real block (64,64): [[ReU^T, ImU^T], [-ImU^T, ReU^T]]."""
    ur = jnp.real(u).astype(jnp.float32).T
    ui = jnp.imag(u).astype(jnp.float32).T
    return jnp.concatenate(
        [jnp.concatenate([ur, ui], axis=1),
         jnp.concatenate([-ui, ur], axis=1)], axis=0)               # (64, 64)


def build_kernel_inputs(params):
    """(45,) -> (v0_row (1,128) f32, mt_pack (64,128) f32)."""
    g = _two_local_gates(params)

    # psi0 = CZ * (Rot0 |00000>) = CZ * tensor-product of layer-0 first columns.
    c0 = g[0, :, :, 0]                                              # (5, 2)
    psi0 = jnp.einsum('a,b,c,d,e->abcde',
                      c0[4], c0[3], c0[2], c0[1], c0[0]).reshape(DIM)
    v0 = CZ_DIAG.astype(jnp.complex64) * psi0

    # Rotation layers 1 and 2 as full 5-qubit unitaries (little-endian kron order).
    gl = g[1:]                                                       # (2,5,2,2)
    u = jnp.einsum('lae,lbf,lcg,ldh,lij->labcdiefghj',
                   gl[:, 4], gl[:, 3], gl[:, 2], gl[:, 1], gl[:, 0]
                   ).reshape(NUM_ROT_LAYERS - 1, DIM, DIM)
    u1 = u[0]
    u2 = u[1] * CZ_DIAG[None, :].astype(jnp.complex64)   # fuse 2nd CZ into columns

    mt_pack = jnp.concatenate([_block_t(u1), _block_t(u2)], axis=1)  # (64, 128)
    v0_row = jnp.concatenate(
        [jnp.real(v0), jnp.imag(v0), jnp.zeros((BDIM,), jnp.float32)]
    ).astype(jnp.float32).reshape(1, OUT_LANES)                      # (1, 128)
    return v0_row, mt_pack


# ---------------------------------- Pallas kernel ---------------------------------------
def _density_kernel(v0_ref, mt_ref, rho_ref):
    # v0_ref : (1, 128) f32  [Re psi0 | Im psi0 | 0-pad]   (first CZ already applied)
    # mt_ref : (64, 128) f32 [M1^T | M2'^T] transposed real-block layer matrices
    # rho_ref: (32, 128) f32 [Re rho | Im rho | pad]       -> one full-width store
    v = v0_ref[:, 0:BDIM]                                             # (1, 64) row
    v = jnp.dot(v, mt_ref[:, 0:BDIM], preferred_element_type=jnp.float32)
    v = jnp.dot(v, mt_ref[:, BDIM:2 * BDIM], preferred_element_type=jnp.float32)

    pr = v[:, 0:DIM]                       # (1, 32)  Re psi (row)
    pi = v[:, DIM:BDIM]                    # (1, 32)  Im psi (row)
    vt = jnp.transpose(v)                  # (64, 1)  single end-of-chain transpose
    pr_c = vt[0:DIM, :]                    # (32, 1)
    pi_c = vt[DIM:BDIM, :]                 # (32, 1)

    pad = jnp.zeros((1, BDIM), jnp.float32)
    row_a = jnp.concatenate([pr, -pi, pad], axis=-1)                  # (1, 128)
    row_b = jnp.concatenate([pi, pr, pad], axis=-1)                   # (1, 128)
    # rho[j,k] = psi[j] conj(psi[k]):
    #   Re rho = pr_c*pr + pi_c*pi ;  Im rho = pi_c*pr - pr_c*pi   (VPU outer product)
    rho_ref[...] = pr_c * row_a + pi_c * row_b


@jax.jit
def quantum_circuit_forward(params):
    """Equivalent of QuantumCircuitModel.forward(): params -> 32x32 density matrix."""
    v0_row, mt_pack = build_kernel_inputs(params)
    slab = pl.pallas_call(
        _density_kernel,
        out_shape=jax.ShapeDtypeStruct((DIM, OUT_LANES), jnp.float32),
    )(v0_row, mt_pack)
    # Padding lanes 64:128 are never read.
    return (slab[:, 0:DIM] + 1j * slab[:, DIM:BDIM]).astype(jnp.complex64)


# TODO(synk): probOfOutputs (basis-state projector expectations) not implemented;
#             it is a per-sample diag(rho) lookup, trivial in plain JAX.


# ------------------------------ pure-JAX reference --------------------------------------
def _rz(theta):
    t = jnp.asarray(theta, jnp.float32)
    em = jnp.exp(-0.5j * t)
    ep = jnp.exp(0.5j * t)
    zero = jnp.zeros((), jnp.complex64)
    return jnp.stack([jnp.stack([em, zero]), jnp.stack([zero, ep])])


def _ry(theta):
    t = jnp.asarray(theta, jnp.float32)
    c = jnp.cos(0.5 * t)
    s = jnp.sin(0.5 * t)
    return jnp.stack([jnp.stack([c, -s]), jnp.stack([s, c])]).astype(jnp.complex64)


def _embed_1q(g2, q):
    left = jnp.eye(2 ** (NUM_QUBITS - 1 - q), dtype=jnp.complex64)
    right = jnp.eye(2 ** q, dtype=jnp.complex64)
    return jnp.kron(left, jnp.kron(g2, right))


def _rotation_layer(layer_params):
    U = jnp.eye(DIM, dtype=jnp.complex64)
    for q in range(NUM_QUBITS):
        uq = (_rz(layer_params[2 * NUM_QUBITS + q])
              @ _ry(layer_params[NUM_QUBITS + q])
              @ _rz(layer_params[q]))
        U = _embed_1q(uq, q) @ U
    return U


def _reference_density(params):
    lp = params.reshape(NUM_ROT_LAYERS, 3 * NUM_QUBITS)
    cz = jnp.diag(CZ_DIAG.astype(jnp.complex64))
    total = jnp.eye(DIM, dtype=jnp.complex64)
    for r in range(NUM_ROT_LAYERS):
        total = _rotation_layer(lp[r]) @ total
        if r < NUM_ROT_LAYERS - 1:
            total = cz @ total
    psi = total[:, 0]
    return jnp.outer(psi, jnp.conj(psi))


if __name__ == "__main__":
    key = jax.random.PRNGKey(0)
    # nn.Parameter(torch.randn(circuit.num_parameters)) -> deterministic normal init
    params = jax.random.normal(key, (NUM_PARAMS,), dtype=jnp.float32)

    rho = quantum_circuit_forward(params)
    jax.block_until_ready(rho)

    rho_ref = _reference_density(params)

    assert rho.shape == (DIM, DIM)
    assert jnp.allclose(rho, rho_ref, atol=1e-5), "Pallas kernel mismatch vs reference"
    assert jnp.allclose(jnp.trace(rho).real, 1.0, atol=1e-4), "density matrix trace != 1"
    print("KERNEL_OK")
</pallas_src>

<mosaic_0001>
module attributes {stable_mosaic.version = 11 : i64} {
  func.func @_density_kernel(%arg0: memref<1x128xf32, #tpu.memory_space<vmem>>, %arg1: memref<64x128xf32, #tpu.memory_space<vmem>>, %arg2: memref<32x128xf32, #tpu.memory_space<vmem>>) attributes {dimension_semantics = [], scalar_prefetch = 0 : i64, scratch_operands = 0 : i64, tpu.core_type = #tpu.core_type<tc>} {
    %c0 = arith.constant 0 : index
    %c0_0 = arith.constant 0 : index
    %0 = vector.load %arg0[%c0, %c0_0] : memref<1x128xf32, #tpu.memory_space<vmem>>, vector<1x64xf32>
    %c0_1 = arith.constant 0 : index
    %c0_2 = arith.constant 0 : index
    %1 = vector.load %arg1[%c0_1, %c0_2] : memref<64x128xf32, #tpu.memory_space<vmem>>, vector<64x64xf32>
    %cst = arith.constant dense<0.000000e+00> : vector<1x64xf32>
    %2 = tpu.matmul %0, %1, %cst {dimension_numbers = #tpu.dot_dimension_numbers<[1], [0], [0], [1], [0, 0, 1, 1], [], []>} : vector<1x64xf32>, vector<64x64xf32>, vector<1x64xf32> -> vector<1x64xf32>
    %c0_3 = arith.constant 0 : index
    %c64 = arith.constant 64 : index
    %3 = vector.load %arg1[%c0_3, %c64] : memref<64x128xf32, #tpu.memory_space<vmem>>, vector<64x64xf32>
    %cst_4 = arith.constant dense<0.000000e+00> : vector<1x64xf32>
    %4 = tpu.matmul %2, %3, %cst_4 {dimension_numbers = #tpu.dot_dimension_numbers<[1], [0], [0], [1], [0, 0, 1, 1], [], []>} : vector<1x64xf32>, vector<64x64xf32>, vector<1x64xf32> -> vector<1x64xf32>
    %5 = vector.extract_strided_slice %4 {offsets = [0, 0], sizes = [1, 32], strides = [1, 1]} : vector<1x64xf32> to vector<1x32xf32>
    %6 = vector.extract_strided_slice %4 {offsets = [0, 32], sizes = [1, 32], strides = [1, 1]} : vector<1x64xf32> to vector<1x32xf32>
    %7 = tpu.transpose %4, [1, 0] : vector<1x64xf32> -> vector<64x1xf32>
    %8 = vector.extract_strided_slice %7 {offsets = [0, 0], sizes = [32, 1], strides = [1, 1]} : vector<64x1xf32> to vector<32x1xf32>
    %9 = vector.extract_strided_slice %7 {offsets = [32, 0], sizes = [32, 1], strides = [1, 1]} : vector<64x1xf32> to vector<32x1xf32>
    %cst_5 = arith.constant 0.000000e+00 : f32
    %10 = vector.broadcast %cst_5 : f32 to vector<1x64xf32>
    %cst_6 = arith.constant 0.000000e+00 : f32
    %11 = vector.broadcast %cst_6 : f32 to vector<1x32xf32>
    %12 = arith.subf %11, %6 : vector<1x32xf32>
    %13 = tpu.concatenate %5, %12, %10 in 1 : vector<1x32xf32>, vector<1x32xf32>, vector<1x64xf32> -> vector<1x128xf32>
    %14 = tpu.concatenate %6, %5, %10 in 1 : vector<1x32xf32>, vector<1x32xf32>, vector<1x64xf32> -> vector<1x128xf32>
    %15 = vector.broadcast %8 : vector<32x1xf32> to vector<32x128xf32>
    %16 = vector.broadcast %13 : vector<1x128xf32> to vector<32x128xf32>
    %17 = arith.mulf %15, %16 : vector<32x128xf32>
    %18 = vector.broadcast %9 : vector<32x1xf32> to vector<32x128xf32>
    %19 = vector.broadcast %14 : vector<1x128xf32> to vector<32x128xf32>
    %20 = arith.mulf %18, %19 : vector<32x128xf32>
    %21 = arith.addf %17, %20 : vector<32x128xf32>
    %c0_7 = arith.constant 0 : index
    %c0_8 = arith.constant 0 : index
    %22 = vector.load %arg2[%c0_7, %c0_8] : memref<32x128xf32, #tpu.memory_space<vmem>>, vector<32x128xf32>
    tpu.vector_store %arg2[%c0_7, %c0_8], %21 {strides = array<i32>} : memref<32x128xf32, #tpu.memory_space<vmem>>, vector<32x128xf32>,
    return
  }
}

</mosaic_0001>

<bundles_post_ra>
// kernel: squeeze.11
= control target key start
LH: loop header
LB: loop body
LE: loop exit
PB: predicated region body
PF: predicated region fallthrough
CT: control target
= control target key end

     0   :  { %vm1284_vm0 = vcmask 1041409   ;;  %vm1288_vm1 = vcmask 1042434   ;;  %vm1292_vm2 = vcmask 1043459   ;;  %vm1296_vm3 = vcmask 1044484   ;;  %s4068_s8 = smov 30   ;;  %s4069_s13 = smov 28   ;;  %s5697_s0 = inlined_call_operand.vmem [shape: f32[1,2,2,2,2,2,2,2,2,2,2], index: 0, kind: input, shape index: {}]   ;;  %s5698_s1 = inlined_call_operand.vmem [shape: f32[32,32], index: 1, kind: output, shape index: {}]  }
   0x1   :  { %v3942_v0 = vld [vmem:[%s5697_s0 + $0x7e] sm:$0x3]  ;;  %v3950_v1 = vld [vmem:[%s5697_s0 + $0x6e] sm:$0x3]  ;;  %vm1300_vm4 = vcmask 1045509   ;;  %vm1304_vm5 = vcmask 1046534  }
   0x2   :  { %v3958_v2 = vld [vmem:[%s5697_s0 + $0x5e] sm:$0x3]  ;;  %969 = vst [vmem:[#allocation0 + $0x1f8] sm:$0x3] %v3942_v0  ;;  %1009 = vst [vmem:[#allocation0 + $0x1b8] sm:$0x3] %v3950_v1 }
   0x3   :  { %1049 = vst [vmem:[#allocation0 + $0x178] sm:$0x3] %v3958_v2  ;;  %v3966_v3 = vld [vmem:[%s5697_s0 + $0x4e] sm:$0x3]  ;;  %v3974_v4 = vld [vmem:[%s5697_s0 + $0x3e] sm:$0x3] }
   0x4   :  { %v3982_v5 = vld [vmem:[%s5697_s0 + $0x2e] sm:$0x3]  ;;  %1089 = vst [vmem:[#allocation0 + $0x138] sm:$0x3] %v3966_v3  ;;  %1129 = vst [vmem:[#allocation0 + $0xf8] sm:$0x3] %v3974_v4 }
   0x5   :  { %1169 = vst [vmem:[#allocation0 + $0xb8] sm:$0x3] %v3982_v5  ;;  %v3990_v6 = vld [vmem:[%s5697_s0 + $0x1e] sm:$0x3]  ;;  %v3998_v7 = vld [vmem:[%s5697_s0 + $0xe] sm:$0x3] }
   0x6   :  { %1209 = vst [vmem:[#allocation0 + $0x78] sm:$0x3] %v3990_v6  ;;  %1249 = vst [vmem:[#allocation0 + $0x38] sm:$0x3] %v3998_v7  ;;  %v3814_v8 = vld [vmem:[%s5697_s0 + $0x17e] sm:$0x3] }
   0x7   :  { %v3822_v9 = vld [vmem:[%s5697_s0 + $0x16e] sm:$0x3]  ;;  %329 = vst [vmem:[#allocation0 + $0x5f8] sm:$0x3] %v3814_v8  ;;  %v3830_v10 = vld [vmem:[%s5697_s0 + $0x15e] sm:$0x3] }
   0x8   :  { %369 = vst [vmem:[#allocation0 + $0x5b8] sm:$0x3] %v3822_v9  ;;  %v3838_v11 = vld [vmem:[%s5697_s0 + $0x14e] sm:$0x3]  ;;  %v3846_v12 = vld [vmem:[%s5697_s0 + $0x13e] sm:$0x3] }
   0x9   :  { %409 = vst [vmem:[#allocation0 + $0x578] sm:$0x3] %v3830_v10  ;;  %449 = vst [vmem:[#allocation0 + $0x538] sm:$0x3] %v3838_v11  ;;  %v3854_v13 = vld [vmem:[%s5697_s0 + $0x12e] sm:$0x3] }
   0xa   :  { %489 = vst [vmem:[#allocation0 + $0x4f8] sm:$0x3] %v3846_v12  ;;  %v3862_v14 = vld [vmem:[%s5697_s0 + $0x11e] sm:$0x3]  ;;  %v3870_v15 = vld [vmem:[%s5697_s0 + $0x10e] sm:$0x3] }
   0xb   :  { %529 = vst [vmem:[#allocation0 + $0x4b8] sm:$0x3] %v3854_v13  ;;  %569 = vst [vmem:[#allocation0 + $0x478] sm:$0x3] %v3862_v14  ;;  %v3878_v16 = vld [vmem:[%s5697_s0 + $0xfe] sm:$0x3] }
   0xc   :  { %609 = vst [vmem:[#allocation0 + $0x438] sm:$0x3] %v3870_v15  ;;  %v3886_v17 = vld [vmem:[%s5697_s0 + $0xee] sm:$0x3]  ;;  %v3894_v18 = vld [vmem:[%s5697_s0 + $0xde] sm:$0x3] }
   0xd   :  { %649 = vst [vmem:[#allocation0 + $0x3f8] sm:$0x3] %v3878_v16  ;;  %689 = vst [vmem:[#allocation0 + $0x3b8] sm:$0x3] %v3886_v17  ;;  %v1418_v19 = vld [vmem:[#allocation0 + $0xb7] sm:$0x4]  }
   0xe   :  { %729 = vst [vmem:[#allocation0 + $0x378] sm:$0x3] %v3894_v18  ;;  %v1422_v20 = vld [vmem:[#allocation0 + $0xf6] sm:$0x8]   ;;  %v3902_v24 = vld [vmem:[%s5697_s0 + $0xce] sm:$0x3] }
   0xf   :  { %v1426_v21 = vld [vmem:[#allocation0 + $0x135] sm:$0x10]   ;;  %769 = vst [vmem:[#allocation0 + $0x338] sm:$0x3] %v3902_v24  ;;  %v3910_v26 = vld [vmem:[%s5697_s0 + $0xbe] sm:$0x3] }
  0x10   :  { %v1412_v22 = vld [vmem:[#allocation0 + $0x39] sm:$0x1]   ;;  %v3918_v27 = vld [vmem:[%s5697_s0 + $0xae] sm:$0x3]  ;;  %v3926_v28 = vld [vmem:[%s5697_s0 + $0x9e] sm:$0x3] }
  0x11   :  { %v1414_v23 = vld [vmem:[#allocation0 + $0x78] sm:$0x2]   ;;  %vm1308_vm6 = vcmask 1047559   ;;  %809 = vst [vmem:[#allocation0 + $0x2f8] sm:$0x3] %v3910_v26  ;;  %s4070_s19 = smov 26  }
  0x12   :  { %v1416_v25 = vsel %vm1284_vm0, %v1414_v23, %v1412_v22  ;;  %v1430_v30 = vld [vmem:[#allocation0 + $0x174] sm:$0x20]   ;;  %849 = vst [vmem:[#allocation0 + $0x2b8] sm:$0x3] %v3918_v27  ;;  %889 = vst [vmem:[#allocation0 + $0x278] sm:$0x3] %v3926_v28 }
  0x13   :  { %v1420_v29 = vsel %vm1288_vm1, %v1418_v19, %v1416_v25  ;;  %v3934_v31 = vld [vmem:[%s5697_s0 + $0x8e] sm:$0x3]  ;;  %v1434_v33 = vld [vmem:[#allocation0 + $0x1b3] sm:$0x40]   ;;  %v3750_v47 = vld [vmem:[%s5697_s0 + $0x1fe] sm:$0x3] }
  0x14   :  { %v1424_v32 = vsel %vm1292_vm2, %v1422_v20, %v1420_v29  ;;  %v1438_v34 = vld [vmem:[#allocation0 + $0x1f2] sm:$0x80]   ;;  %929 = vst [vmem:[#allocation0 + $0x238] sm:$0x3] %v3934_v31  ;;  %v3758_v48 = vld [vmem:[%s5697_s0 + $0x1ee] sm:$0x3] }
  0x15   :  { %v1491_v35 = vld [vmem:[#allocation0 + $0x4f6] sm:$0x8]   ;;  %v1428_v36 = vsel %vm1296_vm3, %v1426_v21, %v1424_v32  ;;  %v3766_v49 = vld [vmem:[%s5697_s0 + $0x1de] sm:$0x3]  ;;  %9 = vst [vmem:[#allocation0 + $0x7f8] sm:$0x3] %v3750_v47 }
  0x16   :  { %v1481_v37 = vld [vmem:[#allocation0 + $0x439] sm:$0x1]   ;;  %v1432_v40 = vsel %vm1300_vm4, %v1430_v30, %v1428_v36  ;;  %49 = vst [vmem:[#allocation0 + $0x7b8] sm:$0x3] %v3758_v48  ;;  %89 = vst [vmem:[#allocation0 + $0x778] sm:$0x3] %v3766_v49 }
  0x17   :  { %v1483_v38 = vld [vmem:[#allocation0 + $0x478] sm:$0x2]   ;;  %v1436_v45 = vsel %vm1304_vm5, %v1434_v33, %v1432_v40  ;;  %v3774_v52 = vld [vmem:[%s5697_s0 + $0x1ce] sm:$0x3]  ;;  %v3782_v53 = vld [vmem:[%s5697_s0 + $0x1be] sm:$0x3] }
  0x18   :  { %v1487_v39 = vld [vmem:[#allocation0 + $0x4b7] sm:$0x4]   ;;  %v1485_v41 = vsel %vm1284_vm0, %v1483_v38, %v1481_v37  ;;  %v1440_v50 = vsel %vm1308_vm6, %v1438_v34, %v1436_v45  ;;  %v3790_v54 = vld [vmem:[%s5697_s0 + $0x1ae] sm:$0x3]  ;;  %129 = vst [vmem:[#allocation0 + $0x738] sm:$0x3] %v3774_v52 }
  0x19   :  { %v1495_v42 = vld [vmem:[#allocation0 + $0x535] sm:$0x10]   ;;  %v1489_v46 = vsel %vm1288_vm1, %v1487_v39, %v1485_v41  ;;  %1441 = vrot.lane.b32.xlu0 %v1440_v50, %s4068_s8  ;;  %169 = vst [vmem:[#allocation0 + $0x6f8] sm:$0x3] %v3782_v53  ;;  %209 = vst [vmem:[#allocation0 + $0x6b8] sm:$0x3] %v3790_v54 }
  0x1a   :  { %v1499_v43 = vld [vmem:[#allocation0 + $0x574] sm:$0x20]   ;;  %v1493_v51 = vsel %vm1292_vm2, %v1491_v35, %v1489_v46  ;;  %v3798_v57 = vld [vmem:[%s5697_s0 + $0x19e] sm:$0x3]  ;;  %v3806_v58 = vld [vmem:[%s5697_s0 + $0x18e] sm:$0x3] }
  0x1b   :  { %v1503_v44 = vld [vmem:[#allocation0 + $0x5b3] sm:$0x40]   ;;  %v1497_v55 = vsel %vm1296_vm3, %v1495_v42, %v1493_v51  ;;  %249 = vst [vmem:[#allocation0 + $0x678] sm:$0x3] %v3798_v57  ;;  %289 = vst [vmem:[#allocation0 + $0x638] sm:$0x3] %v3806_v58 }
  0x1c   :  { %v1507_v56 = vld [vmem:[#allocation0 + $0x5f2] sm:$0x80]   ;;  %v1501_v59 = vsel %vm1300_vm4, %v1499_v43, %v1497_v55  ;;  %v1551_v3 = vld [vmem:[#allocation0 + $0x38] sm:$0x1]   ;;  %s4071_s22 = smov 24   ;;  %s4072_s26 = smov 22  }
  0x1d   :  { %v1448_v60 = vld [vmem:[#allocation0 + $0x278] sm:$0x2]   ;;  %v1505_v0 = vsel %vm1304_vm5, %v1503_v44, %v1501_v59  ;;  %v1553_v4 = vld [vmem:[#allocation0 + $0x77] sm:$0x2]   ;;  %s4073_s2 = smov 20   ;;  %s4074_s4 = smov 18  }
  0x1e   :  { %v1452_v61 = vld [vmem:[#allocation0 + $0x2b7] sm:$0x4]   ;;  %v1509_v5 = vsel %vm1308_vm6, %v1507_v56, %v1505_v0  ;;  %v1555_v7 = vsel %vm1284_vm0, %v1553_v4, %v1551_v3  ;;  %v1557_v8 = vld [vmem:[#allocation0 + $0xb6] sm:$0x4]   ;;  %s4075_s10 = smov 16   ;;  %s4076_s16 = smov 14  }
  0x1f   :  { %v1456_v62 = vld [vmem:[#allocation0 + $0x2f6] sm:$0x8]   ;;  %v1561_v9 = vld [vmem:[#allocation0 + $0xf5] sm:$0x8]   ;;  %1510 = vrot.lane.b32.xlu1 %v1509_v5, %s4068_s8  ;;  %v1559_v13 = vsel %vm1288_vm1, %v1557_v8, %v1555_v7  ;;  %s4078_s23 = smov 10   ;;  %s4079_s28 = smov 8  }
  0x20   :  { %v1460_v63 = vld [vmem:[#allocation0 + $0x335] sm:$0x10]   ;;  %v1565_v10 = vld [vmem:[#allocation0 + $0x134] sm:$0x10]   ;;  %v1563_v17 = vsel %vm1292_vm2, %v1561_v9, %v1559_v13  ;;  %s4080_s30 = smov 6   ;;  %s4081_s7 = smov 4  }
  0x21   :  { %v1446_v1 = vld [vmem:[#allocation0 + $0x239] sm:$0x1]   ;;  %v1569_v14 = vld [vmem:[#allocation0 + $0x173] sm:$0x20]   ;;  %v1567_v23 = vsel %vm1296_vm3, %v1565_v10, %v1563_v17  ;;  %s4082_s27 = smov 2   ;;  %vm1310_vm7 = vcmask 15360  }
  0x22   :  { %v1464_v2 = vld [vmem:[#allocation0 + $0x374] sm:$0x20]   ;;  %v1450_v6 = vsel %vm1284_vm0, %v1448_v60, %v1446_v1  ;;  %v1573_v15 = vld [vmem:[#allocation0 + $0x1b2] sm:$0x40]   ;;  %v1571_v28 = vsel %vm1300_vm4, %v1569_v14, %v1567_v23  ;;  %vm1443_vm8 = vcmask 261360   ;;  %vm1582_vm9 = vcmask 244960  }
  0x23   :  { %v1454_v11 = vsel %vm1288_vm1, %v1452_v61, %v1450_v6  ;;  %v1468_v12 = vld [vmem:[#allocation0 + $0x3b3] sm:$0x40]   ;;  %v1585_v18 = vld [vmem:[#allocation0 + $0x238] sm:$0x1]   ;;  %v1575_v35 = vsel %vm1304_vm5, %v1573_v15, %v1571_v28  ;;  %v3943_v15 = vld [vmem:[%s5697_s0 + $0x7c] sm:$0x3] }
  0x24   :  { %v1458_v16 = vsel %vm1292_vm2, %v1456_v62, %v1454_v11  ;;  %v1587_v19 = vld [vmem:[#allocation0 + $0x277] sm:$0x2]   ;;  %v1472_v22 = vld [vmem:[#allocation0 + $0x3f2] sm:$0x80]   ;;  %974 = vst [vmem:[#allocation0 + $0x1f0] sm:$0x3] %v3943_v15 }
  0x25   :  { %v1591_v20 = vld [vmem:[#allocation0 + $0x2b6] sm:$0x4]   ;;  %v1462_v21 = vsel %vm1296_vm3, %v1460_v63, %v1458_v16  ;;  %v1589_v24 = vsel %vm1284_vm0, %v1587_v19, %v1585_v18  ;;  %v1522_v26 = vld [vmem:[#allocation0 + $0x6b7] sm:$0x4]   ;;  %v3951_v19 = vld [vmem:[%s5697_s0 + $0x6c] sm:$0x3] }
  0x26   :  { %v1466_v25 = vsel %vm1300_vm4, %v1464_v2, %v1462_v21  ;;  %v1526_v27 = vld [vmem:[#allocation0 + $0x6f6] sm:$0x8]   ;;  %v1577_v29 = vld [vmem:[#allocation0 + $0x1f1] sm:$0x80]   ;;  %v1593_v30 = vsel %vm1288_vm1, %v1591_v20, %v1589_v24  ;;  %v3959_v20 = vld [vmem:[%s5697_s0 + $0x5c] sm:$0x3] }
  0x27   :  { %v1470_v31 = vsel %vm1304_vm5, %v1468_v12, %v1466_v25  ;;  %v1516_v32 = vld [vmem:[#allocation0 + $0x639] sm:$0x1]   ;;  %v1595_v36 = vld [vmem:[#allocation0 + $0x2f5] sm:$0x8]   ;;  %v1579_v51 = vsel %vm1308_vm6, %v1577_v29, %v1575_v35  ;;  %v3967_v21 = vld [vmem:[%s5697_s0 + $0x4c] sm:$0x3] }
  0x28   :  { %v1518_v33 = vld [vmem:[#allocation0 + $0x678] sm:$0x2]   ;;  %v1474_v37 = vsel %vm1308_vm6, %v1472_v22, %v1470_v31  ;;  %v1597_v41 = vsel %vm1292_vm2, %v1595_v36, %v1593_v30  ;;  %v1599_v42 = vld [vmem:[#allocation0 + $0x334] sm:$0x10]   ;;  %1014 = vst [vmem:[#allocation0 + $0x1b0] sm:$0x3] %v3951_v19 }
  0x29   :  { %v1534_v34 = vld [vmem:[#allocation0 + $0x774] sm:$0x20]   ;;  %v1520_v38 = vsel %vm1284_vm0, %v1518_v33, %v1516_v32  ;;  %v1603_v43 = vld [vmem:[#allocation0 + $0x373] sm:$0x20]   ;;  %1475 = vrot.lane.b32.xlu0 %v1474_v37, %s4068_s8  ;;  %v1601_v46 = vsel %vm1296_vm3, %v1599_v42, %v1597_v41  ;;  %1054 = vst [vmem:[#allocation0 + $0x170] sm:$0x3] %v3959_v20 }
  0x2a   :  { %v1530_v39 = vld [vmem:[#allocation0 + $0x735] sm:$0x10]   ;;  %v1524_v44 = vsel %vm1288_vm1, %v1522_v26, %v1520_v38  ;;  %v1607_v47 = vld [vmem:[#allocation0 + $0x3b2] sm:$0x40]   ;;  %v1605_v52 = vsel %vm1300_vm4, %v1603_v43, %v1601_v46  ;;  %1094 = vst [vmem:[#allocation0 + $0x130] sm:$0x3] %v3967_v21 }
  0x2b   :  { %v1538_v40 = vld [vmem:[#allocation0 + $0x7b3] sm:$0x40]   ;;  %v1620_v48 = vld [vmem:[#allocation0 + $0x438] sm:$0x1]   ;;  %v1528_v50 = vsel %vm1292_vm2, %v1526_v27, %v1524_v44  ;;  %v1609_v4 = vsel %vm1304_vm5, %v1607_v47, %v1605_v52  ;;  %v3975_v25 = vld [vmem:[%s5697_s0 + $0x3c] sm:$0x3] }
  0x2c   :  { %v1542_v45 = vld [vmem:[#allocation0 + $0x7f2] sm:$0x80]   ;;  %v1622_v49 = vld [vmem:[#allocation0 + $0x477] sm:$0x2]   ;;  %v1532_v57 = vsel %vm1296_vm3, %v1530_v39, %v1528_v50  ;;  %v3983_v26 = vld [vmem:[%s5697_s0 + $0x2c] sm:$0x3] }
  0x2d   :  { %v1624_v53 = vsel %vm1284_vm0, %v1622_v49, %v1620_v48  ;;  %v1626_v54 = vld [vmem:[#allocation0 + $0x4b6] sm:$0x4]   ;;  %v1536_v62 = vsel %vm1300_vm4, %v1534_v34, %v1532_v57  ;;  %1580 = vrot.lane.b32.xlu0 %v1579_v51, %s4069_s13  ;;  %v3991_v27 = vld [vmem:[%s5697_s0 + $0x1c] sm:$0x3]  ;;  %1134 = vst [vmem:[#allocation0 + $0xf0] sm:$0x3] %v3975_v25 }
  0x2e   :  { %v1630_v55 = vld [vmem:[#allocation0 + $0x4f5] sm:$0x8]   ;;  %v1628_v59 = vsel %vm1288_vm1, %v1626_v54, %v1624_v53  ;;  %v1540_v3 = vsel %vm1304_vm5, %v1538_v40, %v1536_v62  ;;  %1174 = vst [vmem:[#allocation0 + $0xb0] sm:$0x3] %v3983_v26  ;;  %1214 = vst [vmem:[#allocation0 + $0x70] sm:$0x3] %v3991_v27 }
  0x2f   :  { %v1634_v56 = vld [vmem:[#allocation0 + $0x534] sm:$0x10]   ;;  %v1632_v63 = vsel %vm1292_vm2, %v1630_v55, %v1628_v59  ;;  %v1544_v10 = vsel %vm1308_vm6, %v1542_v45, %v1540_v3  ;;  %v3999_v29 = vld [vmem:[%s5697_s0 + $0xc] sm:$0x3]  ;;  %v3879_v30 = vld [vmem:[%s5697_s0 + $0xfc] sm:$0x3] }
  0x30   :  { %v1611_v58 = vld [vmem:[#allocation0 + $0x3f1] sm:$0x80]   ;;  %v1636_v5 = vsel %vm1296_vm3, %v1634_v56, %v1632_v63  ;;  %1545 = vrot.lane.b32.xlu1 %v1544_v10, %s4068_s8  ;;  %v3887_v31 = vld [vmem:[%s5697_s0 + $0xec] sm:$0x3]  ;;  %1254 = vst [vmem:[#allocation0 + $0x30] sm:$0x3] %v3999_v29 }
  0x31   :  { %v1638_v60 = vld [vmem:[#allocation0 + $0x573] sm:$0x20]   ;;  %v1613_v22 = vsel %vm1308_vm6, %v1611_v58, %v1609_v4  ;;  %654 = vst [vmem:[#allocation0 + $0x3f0] sm:$0x3] %v3879_v30  ;;  %694 = vst [vmem:[#allocation0 + $0x3b0] sm:$0x3] %v3887_v31 }
  0x32   :  { %v1642_v61 = vld [vmem:[#allocation0 + $0x5b2] sm:$0x40]   ;;  %v1640_v11 = vsel %vm1300_vm4, %v1638_v60, %v1636_v5  ;;  %v3895_v33 = vld [vmem:[%s5697_s0 + $0xdc] sm:$0x3]  ;;  %v3903_v34 = vld [vmem:[%s5697_s0 + $0xcc] sm:$0x3] }
  0x33   :  { %v1655_v0 = vld [vmem:[#allocation0 + $0x638] sm:$0x1]   ;;  %v1644_v16 = vsel %vm1304_vm5, %v1642_v61, %v1640_v11  ;;  %v3911_v35 = vld [vmem:[%s5697_s0 + $0xbc] sm:$0x3]  ;;  %734 = vst [vmem:[#allocation0 + $0x370] sm:$0x3] %v3895_v33 }
  0x34   :  { %v1657_v1 = vld [vmem:[#allocation0 + $0x677] sm:$0x2]   ;;  %1614 = vrot.lane.b32.xlu1 %v1613_v22, %s4069_s13  ;;  %774 = vst [vmem:[#allocation0 + $0x330] sm:$0x3] %v3903_v34  ;;  %814 = vst [vmem:[#allocation0 + $0x2f0] sm:$0x3] %v3911_v35 }
  0x35   :  { %v1661_v2 = vld [vmem:[#allocation0 + $0x6b6] sm:$0x4]   ;;  %v1659_v7 = vsel %vm1284_vm0, %v1657_v1, %v1655_v0  ;;  %v3919_v36 = vld [vmem:[%s5697_s0 + $0xac] sm:$0x3]  ;;  %v3927_v37 = vld [vmem:[%s5697_s0 + $0x9c] sm:$0x3] }
  0x36   :  { %v1646_v6 = vld [vmem:[#allocation0 + $0x5f1] sm:$0x80]   ;;  %v1663_v12 = vsel %vm1288_vm1, %v1661_v2, %v1659_v7  ;;  %v3935_v38 = vld [vmem:[%s5697_s0 + $0x8c] sm:$0x3]  ;;  %854 = vst [vmem:[#allocation0 + $0x2b0] sm:$0x3] %v3919_v36 }
  0x37   :  { %v1665_v8 = vld [vmem:[#allocation0 + $0x6f5] sm:$0x8]   ;;  %v1648_v23 = vsel %vm1308_vm6, %v1646_v6, %v1644_v16  ;;  %894 = vst [vmem:[#allocation0 + $0x270] sm:$0x3] %v3927_v37  ;;  %934 = vst [vmem:[#allocation0 + $0x230] sm:$0x3] %v3935_v38 }
  0x38   :  { %v1669_v9 = vld [vmem:[#allocation0 + $0x734] sm:$0x10]   ;;  %v1667_v17 = vsel %vm1292_vm2, %v1665_v8, %v1663_v12  ;;  %1649 = vrot.lane.b32.xlu0 %v1648_v23, %s4069_s13  ;;  %v3815_v40 = vld [vmem:[%s5697_s0 + $0x17c] sm:$0x3]  ;;  %v3823_v41 = vld [vmem:[%s5697_s0 + $0x16c] sm:$0x3] }
  0x39   :  { %v1673_v13 = vld [vmem:[#allocation0 + $0x773] sm:$0x20]   ;;  %v1671_v24 = vsel %vm1296_vm3, %v1669_v9, %v1667_v17  ;;  %v3831_v42 = vld [vmem:[%s5697_s0 + $0x15c] sm:$0x3]  ;;  %334 = vst [vmem:[#allocation0 + $0x5f0] sm:$0x3] %v3815_v40 }
  0x3a   :  { %v1677_v14 = vld [vmem:[#allocation0 + $0x7b2] sm:$0x40]   ;;  %v1675_v28 = vsel %vm1300_vm4, %v1673_v13, %v1671_v24  ;;  %374 = vst [vmem:[#allocation0 + $0x5b0] sm:$0x3] %v3823_v41  ;;  %414 = vst [vmem:[#allocation0 + $0x570] sm:$0x3] %v3831_v42 }
  0x3b   :  { %v1681_v18 = vld [vmem:[#allocation0 + $0x7f1] sm:$0x80]   ;;  %v1679_v32 = vsel %vm1304_vm5, %v1677_v14, %v1675_v28  ;;  %v3839_v43 = vld [vmem:[%s5697_s0 + $0x14c] sm:$0x3]  ;;  %v3847_v44 = vld [vmem:[%s5697_s0 + $0x13c] sm:$0x3] }
  0x3c   :  { %v1683_v39 = vsel %vm1308_vm6, %v1681_v18, %v1679_v32  ;;  %v3855_v45 = vld [vmem:[%s5697_s0 + $0x12c] sm:$0x3]  ;;  %454 = vst [vmem:[#allocation0 + $0x530] sm:$0x3] %v3839_v43  ;;  %494 = vst [vmem:[#allocation0 + $0x4f0] sm:$0x3] %v3847_v44 }
  0x3d   :  { %534 = vst [vmem:[#allocation0 + $0x4b0] sm:$0x3] %v3855_v45  ;;  %v3863_v46 = vld [vmem:[%s5697_s0 + $0x11c] sm:$0x3]  ;;  %v3871_v47 = vld [vmem:[%s5697_s0 + $0x10c] sm:$0x3]  ;;  %1684 = vrot.lane.b32.xlu1 %v1683_v39, %s4069_s13 }
  0x3e   :  { %574 = vst [vmem:[#allocation0 + $0x470] sm:$0x3] %v3863_v46  ;;  %614 = vst [vmem:[#allocation0 + $0x430] sm:$0x3] %v3871_v47  ;;  %v1692_v48 = vld [vmem:[#allocation0 + $0x70] sm:$0x2]  }
  0x3f   :  { %v1696_v49 = vld [vmem:[#allocation0 + $0xaf] sm:$0x4]   ;;  %v3751_v14 = vld [vmem:[%s5697_s0 + $0x1fc] sm:$0x3]  ;;  %v3759_v19 = vld [vmem:[%s5697_s0 + $0x1ec] sm:$0x3] }
  0x40   :  { %v1690_v50 = vld [vmem:[#allocation0 + $0x31] sm:$0x1]   ;;  %14 = vst [vmem:[#allocation0 + $0x7f0] sm:$0x3] %v3751_v14  ;;  %v3767_v20 = vld [vmem:[%s5697_s0 + $0x1dc] sm:$0x3] }
  0x41   :  { %v1700_v51 = vld [vmem:[#allocation0 + $0xee] sm:$0x8]   ;;  %v1694_v53 = vsel %vm1284_vm0, %v1692_v48, %v1690_v50  ;;  %v3775_v21 = vld [vmem:[%s5697_s0 + $0x1cc] sm:$0x3]  ;;  %54 = vst [vmem:[#allocation0 + $0x7b0] sm:$0x3] %v3759_v19 }
  0x42   :  { %v1704_v52 = vld [vmem:[#allocation0 + $0x12d] sm:$0x10]   ;;  %v1698_v57 = vsel %vm1288_vm1, %v1696_v49, %v1694_v53  ;;  %94 = vst [vmem:[#allocation0 + $0x770] sm:$0x3] %v3767_v20  ;;  %134 = vst [vmem:[#allocation0 + $0x730] sm:$0x3] %v3775_v21 }
  0x43   :  { %v1708_v54 = vld [vmem:[#allocation0 + $0x16c] sm:$0x20]   ;;  %v1702_v62 = vsel %vm1292_vm2, %v1700_v51, %v1698_v57  ;;  %v3783_v26 = vld [vmem:[%s5697_s0 + $0x1bc] sm:$0x3]  ;;  %v3791_v27 = vld [vmem:[%s5697_s0 + $0x1ac] sm:$0x3] }
  0x44   :  { %v1712_v55 = vld [vmem:[#allocation0 + $0x1ab] sm:$0x40]   ;;  %v1706_v3 = vsel %vm1296_vm3, %v1704_v52, %v1702_v62  ;;  %v3799_v28 = vld [vmem:[%s5697_s0 + $0x19c] sm:$0x3]  ;;  %174 = vst [vmem:[#allocation0 + $0x6f0] sm:$0x3] %v3783_v26 }
  0x45   :  { %v1734_v56 = vld [vmem:[#allocation0 + $0x2ee] sm:$0x8]   ;;  %v1710_v9 = vsel %vm1300_vm4, %v1708_v54, %v1706_v3  ;;  %214 = vst [vmem:[#allocation0 + $0x6b0] sm:$0x3] %v3791_v27  ;;  %254 = vst [vmem:[#allocation0 + $0x670] sm:$0x3] %v3799_v28 }
  0x46   :  { %v1716_v58 = vld [vmem:[#allocation0 + $0x1ea] sm:$0x80]   ;;  %v1714_v15 = vsel %vm1304_vm5, %v1712_v55, %v1710_v9  ;;  %v3807_v31 = vld [vmem:[%s5697_s0 + $0x18c] sm:$0x3]  ;;  %v1829_v32 = vld [vmem:[#allocation0 + $0x30] sm:$0x1]  }
  0x47   :  { %v1724_v59 = vld [vmem:[#allocation0 + $0x231] sm:$0x1]   ;;  %v1718_v22 = vsel %vm1308_vm6, %v1716_v58, %v1714_v15  ;;  %v1831_v33 = vld [vmem:[#allocation0 + $0x6f] sm:$0x2]   ;;  %294 = vst [vmem:[#allocation0 + $0x630] sm:$0x3] %v3807_v31 }
  0x48   :  { %v1726_v60 = vld [vmem:[#allocation0 + $0x270] sm:$0x2]   ;;  %1719 = vrot.lane.b32.xlu0 %v1718_v22, %s4070_s19  ;;  %v1833_v36 = vsel %vm1284_vm0, %v1831_v33, %v1829_v32  ;;  %v1835_v37 = vld [vmem:[#allocation0 + $0xae] sm:$0x4]   ;;  %vm1721_vm10 = vcmask 228560   ;;  %vm1860_vm11 = vcmask 212160  }
  0x49   :  { %v1730_v61 = vld [vmem:[#allocation0 + $0x2af] sm:$0x4]   ;;  %v1728_v63 = vsel %vm1284_vm0, %v1726_v60, %v1724_v59  ;;  %v1839_v38 = vld [vmem:[#allocation0 + $0xed] sm:$0x8]   ;;  %v1837_v41 = vsel %vm1288_vm1, %v1835_v37, %v1833_v36  ;;  %vm1999_vm12 = vcmask 195760   ;;  %vm2138_vm13 = vcmask 179360  }
  0x4a   :  { %v1738_v0 = vld [vmem:[#allocation0 + $0x32d] sm:$0x10]   ;;  %v1732_v4 = vsel %vm1288_vm1, %v1730_v61, %v1728_v63  ;;  %v1843_v39 = vld [vmem:[#allocation0 + $0x12c] sm:$0x10]   ;;  %v1841_v44 = vsel %vm1292_vm2, %v1839_v38, %v1837_v41  ;;  %v3960_v41 = vld [vmem:[%s5697_s0 + $0x5a] sm:$0x3] }
  0x4b   :  { %v1742_v1 = vld [vmem:[#allocation0 + $0x36c] sm:$0x20]   ;;  %v1736_v10 = vsel %vm1292_vm2, %v1734_v56, %v1732_v4  ;;  %v1847_v42 = vld [vmem:[#allocation0 + $0x16b] sm:$0x20]   ;;  %v1845_v49 = vsel %vm1296_vm3, %v1843_v39, %v1841_v44  ;;  %v3944_v39 = vld [vmem:[%s5697_s0 + $0x7a] sm:$0x3] }
  0x4c   :  { %v1746_v2 = vld [vmem:[#allocation0 + $0x3ab] sm:$0x40]   ;;  %v1740_v16 = vsel %vm1296_vm3, %v1738_v0, %v1736_v10  ;;  %v1851_v45 = vld [vmem:[#allocation0 + $0x1aa] sm:$0x40]   ;;  %v1849_v54 = vsel %vm1300_vm4, %v1847_v42, %v1845_v49  ;;  %979 = vst [vmem:[#allocation0 + $0x1e8] sm:$0x3] %v3944_v39 }
  0x4d   :  { %v1750_v5 = vld [vmem:[#allocation0 + $0x3ea] sm:$0x80]   ;;  %v1744_v23 = vsel %vm1300_vm4, %v1742_v1, %v1740_v16  ;;  %v1863_v46 = vld [vmem:[#allocation0 + $0x230] sm:$0x1]   ;;  %v1853_v57 = vsel %vm1304_vm5, %v1851_v45, %v1849_v54  ;;  %1059 = vst [vmem:[#allocation0 + $0x168] sm:$0x3] %v3960_v41 }
  0x4e   :  { %v1765_v6 = vld [vmem:[#allocation0 + $0x4af] sm:$0x4]   ;;  %v1748_v29 = vsel %vm1304_vm5, %v1746_v2, %v1744_v23  ;;  %v1865_v47 = vld [vmem:[#allocation0 + $0x26f] sm:$0x2]   ;;  %v3968_v45 = vld [vmem:[%s5697_s0 + $0x4a] sm:$0x3] }
  0x4f   :  { %v1769_v7 = vld [vmem:[#allocation0 + $0x4ee] sm:$0x8]   ;;  %v1752_v34 = vsel %vm1308_vm6, %v1750_v5, %v1748_v29  ;;  %v1855_v50 = vld [vmem:[#allocation0 + $0x1e9] sm:$0x80]   ;;  %v1867_v51 = vsel %vm1284_vm0, %v1865_v47, %v1863_v46  ;;  %v3976_v46 = vld [vmem:[%s5697_s0 + $0x3a] sm:$0x3] }
  0x50   :  { %v1773_v8 = vld [vmem:[#allocation0 + $0x52d] sm:$0x10]   ;;  %1753 = vrot.lane.b32.xlu1 %v1752_v34, %s4070_s19  ;;  %v1869_v52 = vld [vmem:[#allocation0 + $0x2ae] sm:$0x4]   ;;  %v1857_v63 = vsel %vm1308_vm6, %v1855_v50, %v1853_v57  ;;  %v3984_v47 = vld [vmem:[%s5697_s0 + $0x2a] sm:$0x3] }
  0x51   :  { %v1759_v11 = vld [vmem:[#allocation0 + $0x431] sm:$0x1]   ;;  %v1873_v53 = vld [vmem:[#allocation0 + $0x2ed] sm:$0x8]   ;;  %v1871_v55 = vsel %vm1288_vm1, %v1869_v52, %v1867_v51  ;;  %1099 = vst [vmem:[#allocation0 + $0x128] sm:$0x3] %v3968_v45 }
  0x52   :  { %v1761_v12 = vld [vmem:[#allocation0 + $0x470] sm:$0x2]   ;;  %v1877_v56 = vld [vmem:[#allocation0 + $0x32c] sm:$0x10]   ;;  %v1875_v58 = vsel %vm1292_vm2, %v1873_v53, %v1871_v55  ;;  %1139 = vst [vmem:[#allocation0 + $0xe8] sm:$0x3] %v3976_v46 }
  0x53   :  { %v1777_v13 = vld [vmem:[#allocation0 + $0x56c] sm:$0x20]   ;;  %v1763_v17 = vsel %vm1284_vm0, %v1761_v12, %v1759_v11  ;;  %v1881_v59 = vld [vmem:[#allocation0 + $0x36b] sm:$0x20]   ;;  %v1879_v3 = vsel %vm1296_vm3, %v1877_v56, %v1875_v58  ;;  %1179 = vst [vmem:[#allocation0 + $0xa8] sm:$0x3] %v3984_v47 }
  0x54   :  { %v1781_v18 = vld [vmem:[#allocation0 + $0x5ab] sm:$0x40]   ;;  %v1767_v24 = vsel %vm1288_vm1, %v1765_v6, %v1763_v17  ;;  %v1898_v4 = vld [vmem:[#allocation0 + $0x430] sm:$0x1]   ;;  %v1883_v17 = vsel %vm1300_vm4, %v1881_v59, %v1879_v3  ;;  %v3992_v51 = vld [vmem:[%s5697_s0 + $0x1a] sm:$0x3] }
  0x55   :  { %v1785_v25 = vld [vmem:[#allocation0 + $0x5ea] sm:$0x80]   ;;  %v1771_v30 = vsel %vm1292_vm2, %v1769_v7, %v1767_v24  ;;  %v1885_v6 = vld [vmem:[#allocation0 + $0x3aa] sm:$0x40]   ;;  %v4000_v52 = vld [vmem:[%s5697_s0 + $0xa] sm:$0x3] }
  0x56   :  { %v1775_v35 = vsel %vm1296_vm3, %v1773_v8, %v1771_v30  ;;  %v1796_v60 = vld [vmem:[#allocation0 + $0x670] sm:$0x2]   ;;  %v1900_v7 = vld [vmem:[#allocation0 + $0x46f] sm:$0x2]   ;;  %v1887_v36 = vsel %vm1304_vm5, %v1885_v6, %v1883_v17  ;;  %v3880_v53 = vld [vmem:[%s5697_s0 + $0xfa] sm:$0x3] }
  0x57   :  { %v1779_v40 = vsel %vm1300_vm4, %v1777_v13, %v1775_v35  ;;  %v1800_v61 = vld [vmem:[#allocation0 + $0x6af] sm:$0x4]   ;;  %v1904_v8 = vld [vmem:[#allocation0 + $0x4ae] sm:$0x4]   ;;  %v1902_v13 = vsel %vm1284_vm0, %v1900_v7, %v1898_v4  ;;  %1219 = vst [vmem:[#allocation0 + $0x68] sm:$0x3] %v3992_v51 }
  0x58   :  { %v1783_v43 = vsel %vm1304_vm5, %v1781_v18, %v1779_v40  ;;  %v1808_v62 = vld [vmem:[#allocation0 + $0x72d] sm:$0x10]   ;;  %v1908_v9 = vld [vmem:[#allocation0 + $0x4ed] sm:$0x8]   ;;  %v1906_v18 = vsel %vm1288_vm1, %v1904_v8, %v1902_v13  ;;  %v3952_v40 = vld [vmem:[%s5697_s0 + $0x6a] sm:$0x3] }
  0x59   :  { %v1787_v48 = vsel %vm1308_vm6, %v1785_v25, %v1783_v43  ;;  %v1794_v0 = vld [vmem:[#allocation0 + $0x631] sm:$0x1]   ;;  %v1912_v14 = vld [vmem:[#allocation0 + $0x52c] sm:$0x10]   ;;  %v1910_v24 = vsel %vm1292_vm2, %v1908_v9, %v1906_v18  ;;  %1019 = vst [vmem:[#allocation0 + $0x1a8] sm:$0x3] %v3952_v40 }
  0x5a   :  { %1788 = vrot.lane.b32.xlu0 %v1787_v48, %s4070_s19  ;;  %v1804_v1 = vld [vmem:[#allocation0 + $0x6ee] sm:$0x8]   ;;  %v1798_v5 = vsel %vm1284_vm0, %v1796_v60, %v1794_v0  ;;  %v1916_v15 = vld [vmem:[#allocation0 + $0x56b] sm:$0x20]   ;;  %v1914_v30 = vsel %vm1296_vm3, %v1912_v14, %v1910_v24  ;;  %1259 = vst [vmem:[#allocation0 + $0x28] sm:$0x3] %v4000_v52 }
  0x5b   :  { %v1812_v2 = vld [vmem:[#allocation0 + $0x76c] sm:$0x20]   ;;  %v1802_v10 = vsel %vm1288_vm1, %v1800_v61, %v1798_v5  ;;  %v1920_v19 = vld [vmem:[#allocation0 + $0x5aa] sm:$0x40]   ;;  %v1918_v37 = vsel %vm1300_vm4, %v1916_v15, %v1914_v30  ;;  %659 = vst [vmem:[#allocation0 + $0x3e8] sm:$0x3] %v3880_v53 }
  0x5c   :  { %v1816_v11 = vld [vmem:[#allocation0 + $0x7ab] sm:$0x40]   ;;  %v1806_v16 = vsel %vm1292_vm2, %v1804_v1, %v1802_v10  ;;  %v1933_v20 = vld [vmem:[#allocation0 + $0x630] sm:$0x1]   ;;  %v1922_v43 = vsel %vm1304_vm5, %v1920_v19, %v1918_v37  ;;  %v3888_v55 = vld [vmem:[%s5697_s0 + $0xea] sm:$0x3] }
  0x5d   :  { %v1820_v12 = vld [vmem:[#allocation0 + $0x7ea] sm:$0x80]   ;;  %v1935_v21 = vld [vmem:[#allocation0 + $0x66f] sm:$0x2]   ;;  %v1810_v22 = vsel %vm1296_vm3, %v1808_v62, %v1806_v16  ;;  %v3896_v56 = vld [vmem:[%s5697_s0 + $0xda] sm:$0x3] }
  0x5e   :  { %1858 = vrot.lane.b32.xlu0 %v1857_v63, %s4071_s22  ;;  %v1889_v23 = vld [vmem:[#allocation0 + $0x3e9] sm:$0x80]   ;;  %v1937_v25 = vsel %vm1284_vm0, %v1935_v21, %v1933_v20  ;;  %v1814_v29 = vsel %vm1300_vm4, %v1812_v2, %v1810_v22  ;;  %v3904_v57 = vld [vmem:[%s5697_s0 + $0xca] sm:$0x3]  ;;  %699 = vst [vmem:[#allocation0 + $0x3a8] sm:$0x3] %v3888_v55 }
  0x5f   :  { %v1939_v26 = vld [vmem:[#allocation0 + $0x6ae] sm:$0x4]   ;;  %v1818_v35 = vsel %vm1304_vm5, %v1816_v11, %v1814_v29  ;;  %v1891_v54 = vsel %vm1308_vm6, %v1889_v23, %v1887_v36  ;;  %739 = vst [vmem:[#allocation0 + $0x368] sm:$0x3] %v3896_v56  ;;  %779 = vst [vmem:[#allocation0 + $0x328] sm:$0x3] %v3904_v57 }
  0x60   :  { %v1943_v27 = vld [vmem:[#allocation0 + $0x6ed] sm:$0x8]   ;;  %v1941_v32 = vsel %vm1288_vm1, %v1939_v26, %v1937_v25  ;;  %v1822_v42 = vsel %vm1308_vm6, %v1820_v12, %v1818_v35  ;;  %v3912_v59 = vld [vmem:[%s5697_s0 + $0xba] sm:$0x3]  ;;  %v3920_v60 = vld [vmem:[%s5697_s0 + $0xaa] sm:$0x3] }
  0x61   :  { %v1947_v28 = vld [vmem:[#allocation0 + $0x72c] sm:$0x10]   ;;  %v1945_v38 = vsel %vm1292_vm2, %v1943_v27, %v1941_v32  ;;  %1823 = vrot.lane.b32.xlu1 %v1822_v42, %s4070_s19  ;;  %v3928_v61 = vld [vmem:[%s5697_s0 + $0x9a] sm:$0x3]  ;;  %819 = vst [vmem:[#allocation0 + $0x2e8] sm:$0x3] %v3912_v59 }
  0x62   :  { %v1924_v31 = vld [vmem:[#allocation0 + $0x5e9] sm:$0x80]   ;;  %v1949_v44 = vsel %vm1296_vm3, %v1947_v28, %v1945_v38  ;;  %859 = vst [vmem:[#allocation0 + $0x2a8] sm:$0x3] %v3920_v60  ;;  %899 = vst [vmem:[#allocation0 + $0x268] sm:$0x3] %v3928_v61 }
  0x63   :  { %v1951_v33 = vld [vmem:[#allocation0 + $0x76b] sm:$0x20]   ;;  %v1926_v48 = vsel %vm1308_vm6, %v1924_v31, %v1922_v43  ;;  %v3936_v62 = vld [vmem:[%s5697_s0 + $0x8a] sm:$0x3]  ;;  %v3816_v63 = vld [vmem:[%s5697_s0 + $0x17a] sm:$0x3] }
  0x64   :  { %v1955_v34 = vld [vmem:[#allocation0 + $0x7aa] sm:$0x40]   ;;  %v1953_v49 = vsel %vm1300_vm4, %v1951_v33, %v1949_v44  ;;  %1927 = vrot.lane.b32.xlu0 %v1926_v48, %s4071_s22  ;;  %v3824_v0 = vld [vmem:[%s5697_s0 + $0x16a] sm:$0x3]  ;;  %939 = vst [vmem:[#allocation0 + $0x228] sm:$0x3] %v3936_v62 }
  0x65   :  { %v1959_v50 = vld [vmem:[#allocation0 + $0x7e9] sm:$0x80]   ;;  %v1957_v58 = vsel %vm1304_vm5, %v1955_v34, %v1953_v49  ;;  %1892 = vrot.lane.b32.xlu1 %v1891_v54, %s4071_s22  ;;  %339 = vst [vmem:[#allocation0 + $0x5e8] sm:$0x3] %v3816_v63  ;;  %379 = vst [vmem:[#allocation0 + $0x5a8] sm:$0x3] %v3824_v0 }
  0x66   :  { %v3832_v1 = vld [vmem:[%s5697_s0 + $0x15a] sm:$0x3]  ;;  %v3840_v2 = vld [vmem:[%s5697_s0 + $0x14a] sm:$0x3]  ;;  %v1961_v4 = vsel %vm1308_vm6, %v1959_v50, %v1957_v58  ;;  %v1974_v8 = vld [vmem:[#allocation0 + $0xa7] sm:$0x4]  }
  0x67   :  { %v3848_v3 = vld [vmem:[%s5697_s0 + $0x13a] sm:$0x3]  ;;  %419 = vst [vmem:[#allocation0 + $0x568] sm:$0x3] %v3832_v1  ;;  %459 = vst [vmem:[#allocation0 + $0x528] sm:$0x3] %v3840_v2 }
  0x68   :  { %499 = vst [vmem:[#allocation0 + $0x4e8] sm:$0x3] %v3848_v3  ;;  %v3856_v5 = vld [vmem:[%s5697_s0 + $0x12a] sm:$0x3]  ;;  %v3864_v6 = vld [vmem:[%s5697_s0 + $0x11a] sm:$0x3] }
  0x69   :  { %v3872_v7 = vld [vmem:[%s5697_s0 + $0x10a] sm:$0x3]  ;;  %539 = vst [vmem:[#allocation0 + $0x4a8] sm:$0x3] %v3856_v5  ;;  %579 = vst [vmem:[#allocation0 + $0x468] sm:$0x3] %v3864_v6  ;;  %1962 = vrot.lane.b32.xlu1 %v1961_v4, %s4071_s22 }
  0x6a   :  { %619 = vst [vmem:[#allocation0 + $0x428] sm:$0x3] %v3872_v7  ;;  %v1968_v9 = vld [vmem:[#allocation0 + $0x29] sm:$0x1]   ;;  %v3752_v41 = vld [vmem:[%s5697_s0 + $0x1fa] sm:$0x3] }
  0x6b   :  { %v1970_v10 = vld [vmem:[#allocation0 + $0x68] sm:$0x2]   ;;  %v3760_v42 = vld [vmem:[%s5697_s0 + $0x1ea] sm:$0x3]  ;;  %v3768_v43 = vld [vmem:[%s5697_s0 + $0x1da] sm:$0x3] }
  0x6c   :  { %v1978_v11 = vld [vmem:[#allocation0 + $0xe6] sm:$0x8]   ;;  %v1972_v12 = vsel %vm1284_vm0, %v1970_v10, %v1968_v9  ;;  %19 = vst [vmem:[#allocation0 + $0x7e8] sm:$0x3] %v3752_v41  ;;  %59 = vst [vmem:[#allocation0 + $0x7a8] sm:$0x3] %v3760_v42 }
  0x6d   :  { %v1982_v13 = vld [vmem:[#allocation0 + $0x125] sm:$0x10]   ;;  %v1976_v16 = vsel %vm1288_vm1, %v1974_v8, %v1972_v12  ;;  %99 = vst [vmem:[#allocation0 + $0x768] sm:$0x3] %v3768_v43  ;;  %v3776_v48 = vld [vmem:[%s5697_s0 + $0x1ca] sm:$0x3] }
  0x6e   :  { %v1986_v14 = vld [vmem:[#allocation0 + $0x164] sm:$0x20]   ;;  %v1980_v21 = vsel %vm1292_vm2, %v1978_v11, %v1976_v16  ;;  %v3784_v49 = vld [vmem:[%s5697_s0 + $0x1ba] sm:$0x3]  ;;  %v3792_v50 = vld [vmem:[%s5697_s0 + $0x1aa] sm:$0x3] }
  0x6f   :  { %v1990_v15 = vld [vmem:[#allocation0 + $0x1a3] sm:$0x40]   ;;  %v1984_v25 = vsel %vm1296_vm3, %v1982_v13, %v1980_v21  ;;  %139 = vst [vmem:[#allocation0 + $0x728] sm:$0x3] %v3776_v48  ;;  %179 = vst [vmem:[#allocation0 + $0x6e8] sm:$0x3] %v3784_v49 }
  0x70   :  { %v1994_v17 = vld [vmem:[#allocation0 + $0x1e2] sm:$0x80]   ;;  %v1988_v30 = vsel %vm1300_vm4, %v1986_v14, %v1984_v25  ;;  %219 = vst [vmem:[#allocation0 + $0x6a8] sm:$0x3] %v3792_v50  ;;  %v3800_v53 = vld [vmem:[%s5697_s0 + $0x19a] sm:$0x3] }
  0x71   :  { %v2004_v18 = vld [vmem:[#allocation0 + $0x268] sm:$0x2]   ;;  %v1992_v37 = vsel %vm1304_vm5, %v1990_v15, %v1988_v30  ;;  %v3808_v54 = vld [vmem:[%s5697_s0 + $0x18a] sm:$0x3]  ;;  %v2107_v55 = vld [vmem:[#allocation0 + $0x28] sm:$0x1]  }
  0x72   :  { %v2008_v19 = vld [vmem:[#allocation0 + $0x2a7] sm:$0x4]   ;;  %v1996_v44 = vsel %vm1308_vm6, %v1994_v17, %v1992_v37  ;;  %259 = vst [vmem:[#allocation0 + $0x668] sm:$0x3] %v3800_v53  ;;  %299 = vst [vmem:[#allocation0 + $0x628] sm:$0x3] %v3808_v54 }
  0x73   :  { %v2016_v20 = vld [vmem:[#allocation0 + $0x325] sm:$0x10]   ;;  %1997 = vrot.lane.b32.xlu0 %v1996_v44, %s4072_s26  ;;  %v2109_v58 = vld [vmem:[#allocation0 + $0x67] sm:$0x2]   ;;  %s4077_s19 = smov 12   ;;  %vm2277_vm14 = vcmask 162960  }
  0x74   :  { %v2002_v22 = vld [vmem:[#allocation0 + $0x229] sm:$0x1]   ;;  %v2113_v59 = vld [vmem:[#allocation0 + $0xa6] sm:$0x4]   ;;  %v2111_v63 = vsel %vm1284_vm0, %v2109_v58, %v2107_v55  ;;  %vm2416_vm15 = vcmask 146560  }
  0x75   :  { %v2012_v23 = vld [vmem:[#allocation0 + $0x2e6] sm:$0x8]   ;;  %v2006_v26 = vsel %vm1284_vm0, %v2004_v18, %v2002_v22  ;;  %v2117_v60 = vld [vmem:[#allocation0 + $0xe5] sm:$0x8]   ;;  %v2115_v2 = vsel %vm1288_vm1, %v2113_v59, %v2111_v63 }
  0x76   :  { %v2020_v24 = vld [vmem:[#allocation0 + $0x364] sm:$0x20]   ;;  %v2010_v31 = vsel %vm1288_vm1, %v2008_v19, %v2006_v26  ;;  %v2121_v0 = vld [vmem:[#allocation0 + $0x124] sm:$0x10]   ;;  %v2119_v7 = vsel %vm1292_vm2, %v2117_v60, %v2115_v2 }
  0x77   :  { %v2024_v27 = vld [vmem:[#allocation0 + $0x3a3] sm:$0x40]   ;;  %v2014_v38 = vsel %vm1292_vm2, %v2012_v23, %v2010_v31  ;;  %v2125_v3 = vld [vmem:[#allocation0 + $0x163] sm:$0x20]   ;;  %v2123_v11 = vsel %vm1296_vm3, %v2121_v0, %v2119_v7 }
  0x78   :  { %v2047_v28 = vld [vmem:[#allocation0 + $0x4e6] sm:$0x8]   ;;  %v2018_v45 = vsel %vm1296_vm3, %v2016_v20, %v2014_v38  ;;  %v2129_v4 = vld [vmem:[#allocation0 + $0x1a2] sm:$0x40]   ;;  %v2127_v15 = vsel %vm1300_vm4, %v2125_v3, %v2123_v11  ;;  %v3961_v3 = vld [vmem:[%s5697_s0 + $0x58] sm:$0x3] }
  0x79   :  { %v2051_v29 = vld [vmem:[#allocation0 + $0x525] sm:$0x10]   ;;  %v2022_v51 = vsel %vm1300_vm4, %v2020_v24, %v2018_v45  ;;  %v2141_v5 = vld [vmem:[#allocation0 + $0x228] sm:$0x1]   ;;  %v2131_v19 = vsel %vm1304_vm5, %v2129_v4, %v2127_v15  ;;  %1064 = vst [vmem:[#allocation0 + $0x160] sm:$0x3] %v3961_v3 }
  0x7a   :  { %v2028_v32 = vld [vmem:[#allocation0 + $0x3e2] sm:$0x80]   ;;  %v2026_v56 = vsel %vm1304_vm5, %v2024_v27, %v2022_v51  ;;  %v2143_v8 = vld [vmem:[#allocation0 + $0x267] sm:$0x2]  }
  0x7b   :  { %v2037_v33 = vld [vmem:[#allocation0 + $0x429] sm:$0x1]   ;;  %v2030_v61 = vsel %vm1308_vm6, %v2028_v32, %v2026_v56  ;;  %v2147_v9 = vld [vmem:[#allocation0 + $0x2a6] sm:$0x4]   ;;  %v2145_v13 = vsel %vm1284_vm0, %v2143_v8, %v2141_v5  ;;  %v3977_v5 = vld [vmem:[%s5697_s0 + $0x38] sm:$0x3] }
  0x7c   :  { %v2039_v34 = vld [vmem:[#allocation0 + $0x468] sm:$0x2]   ;;  %2031 = vrot.lane.b32.xlu1 %v2030_v61, %s4072_s26  ;;  %v2151_v10 = vld [vmem:[#allocation0 + $0x2e5] sm:$0x8]   ;;  %v2149_v16 = vsel %vm1288_vm1, %v2147_v9, %v2145_v13  ;;  %1144 = vst [vmem:[#allocation0 + $0xe0] sm:$0x3] %v3977_v5 }
  0x7d   :  { %v2043_v35 = vld [vmem:[#allocation0 + $0x4a7] sm:$0x4]   ;;  %v2041_v39 = vsel %vm1284_vm0, %v2039_v34, %v2037_v33  ;;  %v2133_v12 = vld [vmem:[#allocation0 + $0x1e1] sm:$0x80]   ;;  %v2153_v20 = vsel %vm1292_vm2, %v2151_v10, %v2149_v16  ;;  %v3993_v10 = vld [vmem:[%s5697_s0 + $0x18] sm:$0x3] }
  0x7e   :  { %v2055_v36 = vld [vmem:[#allocation0 + $0x564] sm:$0x20]   ;;  %v2045_v46 = vsel %vm1288_vm1, %v2043_v35, %v2041_v39  ;;  %v2155_v14 = vld [vmem:[#allocation0 + $0x324] sm:$0x10]   ;;  %v2135_v26 = vsel %vm1308_vm6, %v2133_v12, %v2131_v19  ;;  %1224 = vst [vmem:[#allocation0 + $0x60] sm:$0x3] %v3993_v10 }
  0x7f   :  { %v2059_v40 = vld [vmem:[#allocation0 + $0x5a3] sm:$0x40]   ;;  %v2049_v52 = vsel %vm1292_vm2, %v2047_v28, %v2045_v46  ;;  %v2159_v21 = vld [vmem:[#allocation0 + $0x363] sm:$0x20]   ;;  %v2157_v27 = vsel %vm1296_vm3, %v2155_v14, %v2153_v20  ;;  %v3881_v14 = vld [vmem:[%s5697_s0 + $0xf8] sm:$0x3] }
  0x80   :  { %v2063_v47 = vld [vmem:[#allocation0 + $0x5e2] sm:$0x80]   ;;  %v2053_v57 = vsel %vm1296_vm3, %v2051_v29, %v2049_v52  ;;  %v2163_v30 = vld [vmem:[#allocation0 + $0x3a2] sm:$0x40]   ;;  %v3897_v16 = vld [vmem:[%s5697_s0 + $0xd8] sm:$0x3] }
  0x81   :  { %v2057_v62 = vsel %vm1300_vm4, %v2055_v36, %v2053_v57  ;;  %v2078_v17 = vld [vmem:[#allocation0 + $0x6a7] sm:$0x4]   ;;  %v2176_v31 = vld [vmem:[#allocation0 + $0x428] sm:$0x1]   ;;  %664 = vst [vmem:[#allocation0 + $0x3e0] sm:$0x3] %v3881_v14 }
  0x82   :  { %v2061_v1 = vsel %vm1304_vm5, %v2059_v40, %v2057_v62  ;;  %v2082_v18 = vld [vmem:[#allocation0 + $0x6e6] sm:$0x8]   ;;  %v2178_v32 = vld [vmem:[#allocation0 + $0x467] sm:$0x2]   ;;  %v2161_v40 = vsel %vm1300_vm4, %v2159_v21, %v2157_v27  ;;  %v3945_v62 = vld [vmem:[%s5697_s0 + $0x78] sm:$0x3] }
  0x83   :  { %v2065_v6 = vsel %vm1308_vm6, %v2063_v47, %v2061_v1  ;;  %v2072_v22 = vld [vmem:[#allocation0 + $0x629] sm:$0x1]   ;;  %v2182_v33 = vld [vmem:[#allocation0 + $0x4a6] sm:$0x4]   ;;  %v2180_v36 = vsel %vm1284_vm0, %v2178_v32, %v2176_v31  ;;  %v2165_v58 = vsel %vm1304_vm5, %v2163_v30, %v2161_v40  ;;  %984 = vst [vmem:[#allocation0 + $0x1e0] sm:$0x3] %v3945_v62 }
  0x84   :  { %2066 = vrot.lane.b32.xlu0 %v2065_v6, %s4072_s26  ;;  %v2074_v23 = vld [vmem:[#allocation0 + $0x668] sm:$0x2]   ;;  %v2186_v37 = vld [vmem:[#allocation0 + $0x4e5] sm:$0x8]   ;;  %v2184_v41 = vsel %vm1288_vm1, %v2182_v33, %v2180_v36  ;;  %744 = vst [vmem:[#allocation0 + $0x360] sm:$0x3] %v3897_v16 }
  0x85   :  { %v2086_v24 = vld [vmem:[#allocation0 + $0x725] sm:$0x10]   ;;  %v2076_v28 = vsel %vm1284_vm0, %v2074_v23, %v2072_v22  ;;  %v2190_v38 = vld [vmem:[#allocation0 + $0x524] sm:$0x10]   ;;  %v2188_v47 = vsel %vm1292_vm2, %v2186_v37, %v2184_v41  ;;  %v3913_v19 = vld [vmem:[%s5697_s0 + $0xb8] sm:$0x3] }
  0x86   :  { %v2090_v25 = vld [vmem:[#allocation0 + $0x764] sm:$0x20]   ;;  %v2080_v34 = vsel %vm1288_vm1, %v2078_v17, %v2076_v28  ;;  %v2194_v42 = vld [vmem:[#allocation0 + $0x563] sm:$0x20]   ;;  %v2192_v52 = vsel %vm1296_vm3, %v2190_v38, %v2188_v47  ;;  %824 = vst [vmem:[#allocation0 + $0x2e0] sm:$0x3] %v3913_v19 }
  0x87   :  { %v2094_v29 = vld [vmem:[#allocation0 + $0x7a3] sm:$0x40]   ;;  %v2084_v39 = vsel %vm1292_vm2, %v2082_v18, %v2080_v34  ;;  %v2198_v43 = vld [vmem:[#allocation0 + $0x5a2] sm:$0x40]   ;;  %v2196_v59 = vsel %vm1300_vm4, %v2194_v42, %v2192_v52  ;;  %v3929_v21 = vld [vmem:[%s5697_s0 + $0x98] sm:$0x3] }
  0x88   :  { %2136 = vrot.lane.b32.xlu0 %v2135_v26, %s4073_s2  ;;  %v2098_v35 = vld [vmem:[#allocation0 + $0x7e2] sm:$0x80]   ;;  %v2211_v44 = vld [vmem:[#allocation0 + $0x628] sm:$0x1]   ;;  %v2088_v45 = vsel %vm1296_vm3, %v2086_v24, %v2084_v39  ;;  %v2200_v1 = vsel %vm1304_vm5, %v2198_v43, %v2196_v59  ;;  %v3817_v23 = vld [vmem:[%s5697_s0 + $0x178] sm:$0x3] }
  0x89   :  { %v2167_v46 = vld [vmem:[#allocation0 + $0x3e1] sm:$0x80]   ;;  %v2092_v51 = vsel %vm1300_vm4, %v2090_v25, %v2088_v45  ;;  %904 = vst [vmem:[#allocation0 + $0x260] sm:$0x3] %v3929_v21  ;;  %344 = vst [vmem:[#allocation0 + $0x5e0] sm:$0x3] %v3817_v23 }
  0x8a   :  { %v2213_v48 = vld [vmem:[#allocation0 + $0x667] sm:$0x2]   ;;  %v2096_v57 = vsel %vm1304_vm5, %v2094_v29, %v2092_v51  ;;  %v2169_v12 = vsel %vm1308_vm6, %v2167_v46, %v2165_v58  ;;  %v3833_v25 = vld [vmem:[%s5697_s0 + $0x158] sm:$0x3]  ;;  %v2256_v32 = vld [vmem:[#allocation0 + $0xde] sm:$0x8]  }
  0x8b   :  { %v2217_v49 = vld [vmem:[#allocation0 + $0x6a6] sm:$0x4]   ;;  %v2215_v54 = vsel %vm1284_vm0, %v2213_v48, %v2211_v44  ;;  %v2100_v0 = vsel %vm1308_vm6, %v2098_v35, %v2096_v57  ;;  %424 = vst [vmem:[#allocation0 + $0x560] sm:$0x3] %v3833_v25  ;;  %v3849_v28 = vld [vmem:[%s5697_s0 + $0x138] sm:$0x3] }
  0x8c   :  { %v2221_v50 = vld [vmem:[#allocation0 + $0x6e5] sm:$0x8]   ;;  %v2219_v60 = vsel %vm1288_vm1, %v2217_v49, %v2215_v54  ;;  %2101 = vrot.lane.b32.xlu1 %v2100_v0, %s4072_s26  ;;  %v3865_v30 = vld [vmem:[%s5697_s0 + $0x118] sm:$0x3]  ;;  %504 = vst [vmem:[#allocation0 + $0x4e0] sm:$0x3] %v3849_v28 }
  0x8d   :  { %v2202_v53 = vld [vmem:[#allocation0 + $0x5e1] sm:$0x80]   ;;  %v2223_v2 = vsel %vm1292_vm2, %v2221_v50, %v2219_v60  ;;  %584 = vst [vmem:[#allocation0 + $0x460] sm:$0x3] %v3865_v30  ;;  %v2248_v34 = vld [vmem:[#allocation0 + $0x60] sm:$0x2]  }
  0x8e   :  { %v2225_v55 = vld [vmem:[#allocation0 + $0x724] sm:$0x10]   ;;  %v2204_v6 = vsel %vm1308_vm6, %v2202_v53, %v2200_v1  ;;  %v2264_v40 = vld [vmem:[#allocation0 + $0x15c] sm:$0x20]   ;;  %v3769_v5 = vld [vmem:[%s5697_s0 + $0x1d8] sm:$0x3] }
  0x8f   :  { %v2229_v56 = vld [vmem:[#allocation0 + $0x763] sm:$0x20]   ;;  %v2227_v7 = vsel %vm1296_vm3, %v2225_v55, %v2223_v2  ;;  %2205 = vrot.lane.b32.xlu0 %v2204_v6, %s4073_s2  ;;  %v2272_v41 = vld [vmem:[#allocation0 + $0x1da] sm:$0x80]   ;;  %104 = vst [vmem:[#allocation0 + $0x760] sm:$0x3] %v3769_v5 }
  0x90   :  { %v2233_v61 = vld [vmem:[#allocation0 + $0x7a2] sm:$0x40]   ;;  %v2231_v13 = vsel %vm1300_vm4, %v2229_v56, %v2227_v7  ;;  %2170 = vrot.lane.b32.xlu1 %v2169_v12, %s4073_s2  ;;  %v2282_v45 = vld [vmem:[#allocation0 + $0x260] sm:$0x2]   ;;  %v3785_v7 = vld [vmem:[%s5697_s0 + $0x1b8] sm:$0x3] }
  0x91   :  { %v3953_v63 = vld [vmem:[%s5697_s0 + $0x68] sm:$0x3]  ;;  %v2235_v17 = vsel %vm1304_vm5, %v2233_v61, %v2231_v13  ;;  %v2290_v46 = vld [vmem:[#allocation0 + $0x2de] sm:$0x8]   ;;  %184 = vst [vmem:[#allocation0 + $0x6e0] sm:$0x3] %v3785_v7 }
  0x92   :  { %1024 = vst [vmem:[#allocation0 + $0x1a0] sm:$0x3] %v3953_v63  ;;  %v3969_v4 = vld [vmem:[%s5697_s0 + $0x48] sm:$0x3]  ;;  %v2298_v50 = vld [vmem:[#allocation0 + $0x35c] sm:$0x20]  }
  0x93   :  { %v2237_v8 = vld [vmem:[#allocation0 + $0x7e1] sm:$0x80]   ;;  %1104 = vst [vmem:[#allocation0 + $0x120] sm:$0x3] %v3969_v4  ;;  %v2306_v54 = vld [vmem:[#allocation0 + $0x3da] sm:$0x80]  }
  0x94   :  { %v3985_v9 = vld [vmem:[%s5697_s0 + $0x28] sm:$0x3]  ;;  %v2239_v27 = vsel %vm1308_vm6, %v2237_v8, %v2235_v17  ;;  %v2317_v55 = vld [vmem:[#allocation0 + $0x460] sm:$0x2]   ;;  %v3753_v63 = vld [vmem:[%s5697_s0 + $0x1f8] sm:$0x3] }
  0x95   :  { %v4001_v11 = vld [vmem:[%s5697_s0 + $0x8] sm:$0x3]  ;;  %1184 = vst [vmem:[#allocation0 + $0xa0] sm:$0x3] %v3985_v9  ;;  %2240 = vrot.lane.b32.xlu1 %v2239_v27, %s4073_s2  ;;  %v2325_v57 = vld [vmem:[#allocation0 + $0x4de] sm:$0x8]  }
  0x96   :  { %1264 = vst [vmem:[#allocation0 + $0x20] sm:$0x3] %v4001_v11  ;;  %v3889_v15 = vld [vmem:[%s5697_s0 + $0xe8] sm:$0x3]  ;;  %v2333_v62 = vld [vmem:[#allocation0 + $0x55c] sm:$0x20]  }
  0x97   :  { %704 = vst [vmem:[#allocation0 + $0x3a0] sm:$0x3] %v3889_v15  ;;  %v3905_v18 = vld [vmem:[%s5697_s0 + $0xc8] sm:$0x3]  ;;  %24 = vst [vmem:[#allocation0 + $0x7e0] sm:$0x3] %v3753_v63 }
  0x98   :  { %v3921_v20 = vld [vmem:[%s5697_s0 + $0xa8] sm:$0x3]  ;;  %784 = vst [vmem:[#allocation0 + $0x320] sm:$0x3] %v3905_v18  ;;  %v3801_v11 = vld [vmem:[%s5697_s0 + $0x198] sm:$0x3] }
  0x99   :  { %864 = vst [vmem:[#allocation0 + $0x2a0] sm:$0x3] %v3921_v20  ;;  %v3937_v22 = vld [vmem:[%s5697_s0 + $0x88] sm:$0x3]  ;;  %v2268_v38 = vld [vmem:[#allocation0 + $0x19b] sm:$0x40]  }
  0x9a   :  { %944 = vst [vmem:[#allocation0 + $0x220] sm:$0x3] %v3937_v22  ;;  %v3825_v24 = vld [vmem:[%s5697_s0 + $0x168] sm:$0x3]  ;;  %v2260_v37 = vld [vmem:[#allocation0 + $0x11d] sm:$0x10]  }
  0x9b   :  { %v3841_v26 = vld [vmem:[%s5697_s0 + $0x148] sm:$0x3]  ;;  %384 = vst [vmem:[#allocation0 + $0x5a0] sm:$0x3] %v3825_v24  ;;  %264 = vst [vmem:[#allocation0 + $0x660] sm:$0x3] %v3801_v11 }
  0x9c   :  { %464 = vst [vmem:[#allocation0 + $0x520] sm:$0x3] %v3841_v26  ;;  %v3857_v29 = vld [vmem:[%s5697_s0 + $0x128] sm:$0x3]  ;;  %v2252_v35 = vld [vmem:[#allocation0 + $0x9f] sm:$0x4]  }
  0x9d   :  { %544 = vst [vmem:[#allocation0 + $0x4a0] sm:$0x3] %v3857_v29  ;;  %v3873_v31 = vld [vmem:[%s5697_s0 + $0x108] sm:$0x3]  ;;  %v2246_v33 = vld [vmem:[#allocation0 + $0x21] sm:$0x1]  }
  0x9e   :  { %624 = vst [vmem:[#allocation0 + $0x420] sm:$0x3] %v3873_v31  ;;  %v2250_v36 = vsel %vm1284_vm0, %v2248_v34, %v2246_v33  ;;  %v2302_v51 = vld [vmem:[#allocation0 + $0x39b] sm:$0x40]   ;;  %v3761_v0 = vld [vmem:[%s5697_s0 + $0x1e8] sm:$0x3] }
  0x9f   :  { %v2254_v39 = vsel %vm1288_vm1, %v2252_v35, %v2250_v36  ;;  %v2294_v49 = vld [vmem:[#allocation0 + $0x31d] sm:$0x10]   ;;  %64 = vst [vmem:[#allocation0 + $0x7a0] sm:$0x3] %v3761_v0  ;;  %v3777_v6 = vld [vmem:[%s5697_s0 + $0x1c8] sm:$0x3] }
  0xa0   :  { %v2286_v42 = vld [vmem:[#allocation0 + $0x29f] sm:$0x4]   ;;  %v2258_v43 = vsel %vm1292_vm2, %v2256_v32, %v2254_v39  ;;  %144 = vst [vmem:[#allocation0 + $0x720] sm:$0x3] %v3777_v6  ;;  %v3793_v10 = vld [vmem:[%s5697_s0 + $0x1a8] sm:$0x3] }
  0xa1   :  { %v2280_v44 = vld [vmem:[#allocation0 + $0x221] sm:$0x1]   ;;  %v2262_v47 = vsel %vm1296_vm3, %v2260_v37, %v2258_v43  ;;  %v3809_v12 = vld [vmem:[%s5697_s0 + $0x188] sm:$0x3]  ;;  %224 = vst [vmem:[#allocation0 + $0x6a0] sm:$0x3] %v3793_v10 }
  0xa2   :  { %v2284_v48 = vsel %vm1284_vm0, %v2282_v45, %v2280_v44  ;;  %v2266_v52 = vsel %vm1300_vm4, %v2264_v40, %v2262_v47  ;;  %v2337_v4 = vld [vmem:[#allocation0 + $0x59b] sm:$0x40]   ;;  %304 = vst [vmem:[#allocation0 + $0x620] sm:$0x3] %v3809_v12  ;;  %v2385_v15 = vld [vmem:[#allocation0 + $0x20] sm:$0x1]  }
  0xa3   :  { %v2288_v53 = vsel %vm1288_vm1, %v2286_v42, %v2284_v48  ;;  %v2329_v58 = vld [vmem:[#allocation0 + $0x51d] sm:$0x10]   ;;  %v2270_v59 = vsel %vm1304_vm5, %v2268_v38, %v2266_v52  ;;  %v2387_v16 = vld [vmem:[#allocation0 + $0x5f] sm:$0x2]  }
  0xa4   :  { %v2321_v56 = vld [vmem:[#allocation0 + $0x49f] sm:$0x4]   ;;  %v2292_v60 = vsel %vm1292_vm2, %v2290_v46, %v2288_v53  ;;  %v2274_v1 = vsel %vm1308_vm6, %v2272_v41, %v2270_v59  ;;  %v2391_v17 = vld [vmem:[#allocation0 + $0x9e] sm:$0x4]   ;;  %v2389_v21 = vsel %vm1284_vm0, %v2387_v16, %v2385_v15 }
  0xa5   :  { %v2315_v61 = vld [vmem:[#allocation0 + $0x421] sm:$0x1]   ;;  %v2296_v2 = vsel %vm1296_vm3, %v2294_v49, %v2292_v60  ;;  %2275 = vrot.lane.b32.xlu0 %v2274_v1, %s4074_s4  ;;  %v2395_v22 = vld [vmem:[#allocation0 + $0xdd] sm:$0x8]   ;;  %v2393_v25 = vsel %vm1288_vm1, %v2391_v17, %v2389_v21 }
  0xa6   :  { %v2319_v3 = vsel %vm1284_vm0, %v2317_v55, %v2315_v61  ;;  %v2300_v8 = vsel %vm1300_vm4, %v2298_v50, %v2296_v2  ;;  %v2341_v20 = vld [vmem:[#allocation0 + $0x5da] sm:$0x80]   ;;  %v2399_v23 = vld [vmem:[#allocation0 + $0x11c] sm:$0x10]   ;;  %v2397_v29 = vsel %vm1292_vm2, %v2395_v22, %v2393_v25  ;;  %v3946_v22 = vld [vmem:[%s5697_s0 + $0x76] sm:$0x3] }
  0xa7   :  { %v2323_v9 = vsel %vm1288_vm1, %v2321_v56, %v2319_v3  ;;  %v2304_v13 = vsel %vm1304_vm5, %v2302_v51, %v2300_v8  ;;  %v2403_v26 = vld [vmem:[#allocation0 + $0x15b] sm:$0x20]   ;;  %v2401_v34 = vsel %vm1296_vm3, %v2399_v23, %v2397_v29  ;;  %v2360_v41 = vld [vmem:[#allocation0 + $0x6de] sm:$0x8]   ;;  %989 = vst [vmem:[#allocation0 + $0x1d8] sm:$0x3] %v3946_v22 }
  0xa8   :  { %v2327_v14 = vsel %vm1292_vm2, %v2325_v57, %v2323_v9  ;;  %v2308_v18 = vsel %vm1308_vm6, %v2306_v54, %v2304_v13  ;;  %v2407_v27 = vld [vmem:[#allocation0 + $0x19a] sm:$0x40]   ;;  %v2405_v39 = vsel %vm1300_vm4, %v2403_v26, %v2401_v34  ;;  %v2364_v42 = vld [vmem:[#allocation0 + $0x71d] sm:$0x10]   ;;  %v3954_v26 = vld [vmem:[%s5697_s0 + $0x66] sm:$0x3] }
  0xa9   :  { %v2331_v19 = vsel %vm1296_vm3, %v2329_v58, %v2327_v14  ;;  %2309 = vrot.lane.b32.xlu1 %v2308_v18, %s4074_s4  ;;  %v2419_v30 = vld [vmem:[#allocation0 + $0x220] sm:$0x1]   ;;  %v2409_v43 = vsel %vm1304_vm5, %v2407_v27, %v2405_v39  ;;  %v2350_v46 = vld [vmem:[#allocation0 + $0x621] sm:$0x1]   ;;  %v3962_v27 = vld [vmem:[%s5697_s0 + $0x56] sm:$0x3] }
  0xaa   :  { %v2335_v24 = vsel %vm1300_vm4, %v2333_v62, %v2331_v19  ;;  %v2421_v31 = vld [vmem:[#allocation0 + $0x25f] sm:$0x2]   ;;  %v2352_v47 = vld [vmem:[#allocation0 + $0x660] sm:$0x2]   ;;  %1029 = vst [vmem:[#allocation0 + $0x198] sm:$0x3] %v3954_v26 }
  0xab   :  { %v2339_v28 = vsel %vm1304_vm5, %v2337_v4, %v2335_v24  ;;  %v2425_v32 = vld [vmem:[#allocation0 + $0x29e] sm:$0x4]   ;;  %v2423_v36 = vsel %vm1284_vm0, %v2421_v31, %v2419_v30  ;;  %v2356_v48 = vld [vmem:[#allocation0 + $0x69f] sm:$0x4]   ;;  %v2354_v51 = vsel %vm1284_vm0, %v2352_v47, %v2350_v46  ;;  %1069 = vst [vmem:[#allocation0 + $0x158] sm:$0x3] %v3962_v27 }
  0xac   :  { %v2343_v33 = vsel %vm1308_vm6, %v2341_v20, %v2339_v28  ;;  %v2411_v35 = vld [vmem:[#allocation0 + $0x1d9] sm:$0x80]   ;;  %v2427_v40 = vsel %vm1288_vm1, %v2425_v32, %v2423_v36  ;;  %v2368_v52 = vld [vmem:[#allocation0 + $0x75c] sm:$0x20]   ;;  %v2358_v56 = vsel %vm1288_vm1, %v2356_v48, %v2354_v51  ;;  %v3970_v28 = vld [vmem:[%s5697_s0 + $0x46] sm:$0x3]  ;;  %v4790_v51 = vpop.permute.xlu1 %1510  }
  0xad   :  { %v2429_v37 = vld [vmem:[#allocation0 + $0x2dd] sm:$0x8]   ;;  %2344 = vrot.lane.b32.xlu0 %v2343_v33, %s4074_s4  ;;  %v2413_v49 = vsel %vm1308_vm6, %v2411_v35, %v2409_v43  ;;  %v2372_v53 = vld [vmem:[#allocation0 + $0x79b] sm:$0x40]   ;;  %v2362_v62 = vsel %vm1292_vm2, %v2360_v41, %v2358_v56  ;;  %1109 = vst [vmem:[#allocation0 + $0x118] sm:$0x3] %v3970_v28  ;;  %v4747_v35 = vpop.permute.xlu0 %1441  }
  0xae   :  { %v2433_v38 = vld [vmem:[#allocation0 + $0x31c] sm:$0x10]   ;;  %v2431_v44 = vsel %vm1292_vm2, %v2429_v37, %v2427_v40  ;;  %v2376_v57 = vld [vmem:[#allocation0 + $0x7da] sm:$0x80]   ;;  %v2366_v4 = vsel %vm1296_vm3, %v2364_v42, %v2362_v62  ;;  %v3978_v32 = vld [vmem:[%s5697_s0 + $0x36] sm:$0x3] }
  0xaf   :  { %v2437_v45 = vld [vmem:[#allocation0 + $0x35b] sm:$0x20]   ;;  %v2435_v50 = vsel %vm1296_vm3, %v2433_v38, %v2431_v44  ;;  %v2370_v10 = vsel %vm1300_vm4, %v2368_v52, %v2366_v4  ;;  %v3986_v33 = vld [vmem:[%s5697_s0 + $0x26] sm:$0x3]  ;;  %v3994_v34 = vld [vmem:[%s5697_s0 + $0x16] sm:$0x3] }
  0xb0   :  { %v2454_v54 = vld [vmem:[#allocation0 + $0x420] sm:$0x1]   ;;  %v2439_v63 = vsel %vm1300_vm4, %v2437_v45, %v2435_v50  ;;  %v2374_v16 = vsel %vm1304_vm5, %v2372_v53, %v2370_v10  ;;  %1149 = vst [vmem:[#allocation0 + $0xd8] sm:$0x3] %v3978_v32  ;;  %1189 = vst [vmem:[#allocation0 + $0x98] sm:$0x3] %v3986_v33 }
  0xb1   :  { %v2456_v55 = vld [vmem:[#allocation0 + $0x45f] sm:$0x2]   ;;  %2414 = vrot.lane.b32.xlu0 %v2413_v49, %s4075_s10  ;;  %v2378_v23 = vsel %vm1308_vm6, %v2376_v57, %v2374_v16  ;;  %1229 = vst [vmem:[#allocation0 + $0x58] sm:$0x3] %v3994_v34  ;;  %v4002_v38 = vld [vmem:[%s5697_s0 + $0x6] sm:$0x3] }
  0xb2   :  { %v2458_v58 = vsel %vm1284_vm0, %v2456_v55, %v2454_v54  ;;  %v2460_v59 = vld [vmem:[#allocation0 + $0x49e] sm:$0x4]   ;;  %2379 = vrot.lane.b32.xlu1 %v2378_v23, %s4074_s4  ;;  %v3882_v39 = vld [vmem:[%s5697_s0 + $0xf6] sm:$0x3]  ;;  %v3890_v40 = vld [vmem:[%s5697_s0 + $0xe6] sm:$0x3] }
  0xb3   :  { %v2464_v60 = vld [vmem:[#allocation0 + $0x4dd] sm:$0x8]   ;;  %v2462_v1 = vsel %vm1288_vm1, %v2460_v59, %v2458_v58  ;;  %1269 = vst [vmem:[#allocation0 + $0x18] sm:$0x3] %v4002_v38  ;;  %669 = vst [vmem:[#allocation0 + $0x3d8] sm:$0x3] %v3882_v39 }
  0xb4   :  { %v2468_v61 = vld [vmem:[#allocation0 + $0x51c] sm:$0x10]   ;;  %v2466_v6 = vsel %vm1292_vm2, %v2464_v60, %v2462_v1  ;;  %709 = vst [vmem:[#allocation0 + $0x398] sm:$0x3] %v3890_v40  ;;  %v3898_v42 = vld [vmem:[%s5697_s0 + $0xd6] sm:$0x3] }
  0xb5   :  { %v2441_v0 = vld [vmem:[#allocation0 + $0x39a] sm:$0x40]   ;;  %v2470_v11 = vsel %vm1296_vm3, %v2468_v61, %v2466_v6  ;;  %v3906_v43 = vld [vmem:[%s5697_s0 + $0xc6] sm:$0x3]  ;;  %v3914_v44 = vld [vmem:[%s5697_s0 + $0xb6] sm:$0x3] }
  0xb6   :  { %v2472_v2 = vld [vmem:[#allocation0 + $0x55b] sm:$0x20]   ;;  %v2443_v17 = vsel %vm1304_vm5, %v2441_v0, %v2439_v63  ;;  %749 = vst [vmem:[#allocation0 + $0x358] sm:$0x3] %v3898_v42  ;;  %789 = vst [vmem:[#allocation0 + $0x318] sm:$0x3] %v3906_v43  ;;  %v4848_v42 = vpop.permute.xlu1 %1545  }
  0xb7   :  { %v2476_v3 = vld [vmem:[#allocation0 + $0x59a] sm:$0x40]   ;;  %v2474_v18 = vsel %vm1300_vm4, %v2472_v2, %v2470_v11  ;;  %829 = vst [vmem:[#allocation0 + $0x2d8] sm:$0x3] %v3914_v44  ;;  %v3922_v45 = vld [vmem:[%s5697_s0 + $0xa6] sm:$0x3] }
  0xb8   :  { %v2445_v5 = vld [vmem:[#allocation0 + $0x3d9] sm:$0x80]   ;;  %v2478_v24 = vsel %vm1304_vm5, %v2476_v3, %v2474_v18  ;;  %v3930_v46 = vld [vmem:[%s5697_s0 + $0x96] sm:$0x3]  ;;  %v3938_v47 = vld [vmem:[%s5697_s0 + $0x86] sm:$0x3]  ;;  %v4810_v3 = vpop.permute.xlu0 %1475  }
  0xb9   :  { %v2489_v7 = vld [vmem:[#allocation0 + $0x620] sm:$0x1]   ;;  %v2447_v36 = vsel %vm1308_vm6, %v2445_v5, %v2443_v17  ;;  %869 = vst [vmem:[#allocation0 + $0x298] sm:$0x3] %v3922_v45  ;;  %909 = vst [vmem:[#allocation0 + $0x258] sm:$0x3] %v3930_v46 }
  0xba   :  { %v2491_v8 = vld [vmem:[#allocation0 + $0x65f] sm:$0x2]   ;;  %2448 = vrot.lane.b32.xlu1 %v2447_v36, %s4075_s10  ;;  %949 = vst [vmem:[#allocation0 + $0x218] sm:$0x3] %v3938_v47  ;;  %v3818_v48 = vld [vmem:[%s5697_s0 + $0x176] sm:$0x3] }
  0xbb   :  { %v2495_v9 = vld [vmem:[#allocation0 + $0x69e] sm:$0x4]   ;;  %v2493_v13 = vsel %vm1284_vm0, %v2491_v8, %v2489_v7  ;;  %v3826_v49 = vld [vmem:[%s5697_s0 + $0x166] sm:$0x3]  ;;  %v3834_v50 = vld [vmem:[%s5697_s0 + $0x156] sm:$0x3] }
  0xbc   :  { %v2480_v12 = vld [vmem:[#allocation0 + $0x5d9] sm:$0x80]   ;;  %v2497_v19 = vsel %vm1288_vm1, %v2495_v9, %v2493_v13  ;;  %349 = vst [vmem:[#allocation0 + $0x5d8] sm:$0x3] %v3818_v48  ;;  %389 = vst [vmem:[#allocation0 + $0x598] sm:$0x3] %v3826_v49  ;;  %v4822_v26 = vpop.permute.xlu0 %1580  }
  0xbd   :  { %v2499_v14 = vld [vmem:[#allocation0 + $0x6dd] sm:$0x8]   ;;  %v2482_v29 = vsel %vm1308_vm6, %v2480_v12, %v2478_v24  ;;  %429 = vst [vmem:[#allocation0 + $0x558] sm:$0x3] %v3834_v50  ;;  %v3842_v53 = vld [vmem:[%s5697_s0 + $0x146] sm:$0x3] }
  0xbe   :  { %v2503_v15 = vld [vmem:[#allocation0 + $0x71c] sm:$0x10]   ;;  %v2501_v25 = vsel %vm1292_vm2, %v2499_v14, %v2497_v19  ;;  %2483 = vrot.lane.b32.xlu0 %v2482_v29, %s4075_s10  ;;  %v3850_v54 = vld [vmem:[%s5697_s0 + $0x136] sm:$0x3]  ;;  %v3858_v55 = vld [vmem:[%s5697_s0 + $0x126] sm:$0x3] }
  0xbf   :  { %v2507_v20 = vld [vmem:[#allocation0 + $0x75b] sm:$0x20]   ;;  %v2505_v30 = vsel %vm1296_vm3, %v2503_v15, %v2501_v25  ;;  %469 = vst [vmem:[#allocation0 + $0x518] sm:$0x3] %v3842_v53  ;;  %509 = vst [vmem:[#allocation0 + $0x4d8] sm:$0x3] %v3850_v54 }
  0xc0   :  { %v2511_v21 = vld [vmem:[#allocation0 + $0x79a] sm:$0x40]   ;;  %v2509_v37 = vsel %vm1300_vm4, %v2507_v20, %v2505_v30  ;;  %549 = vst [vmem:[#allocation0 + $0x498] sm:$0x3] %v3858_v55  ;;  %v3866_v56 = vld [vmem:[%s5697_s0 + $0x116] sm:$0x3]  ;;  %v4859_v55 = vpop.permute.xlu0 %1649  }
  0xc1   :  { %v2515_v31 = vld [vmem:[#allocation0 + $0x7d9] sm:$0x80]   ;;  %v2513_v41 = vsel %vm1304_vm5, %v2511_v21, %v2509_v37  ;;  %v3874_v57 = vld [vmem:[%s5697_s0 + $0x106] sm:$0x3]  ;;  %589 = vst [vmem:[#allocation0 + $0x458] sm:$0x3] %v3866_v56 }
  0xc2   :  { %v2517_v52 = vsel %vm1308_vm6, %v2515_v31, %v2513_v41  ;;  %629 = vst [vmem:[#allocation0 + $0x418] sm:$0x3] %v3874_v57  ;;  %v2526_v58 = vld [vmem:[#allocation0 + $0x58] sm:$0x2]   ;;  %v3754_v25 = vld [vmem:[%s5697_s0 + $0x1f6] sm:$0x3] }
  0xc3   :  { %2518 = vrot.lane.b32.xlu1 %v2517_v52, %s4075_s10  ;;  %v2530_v59 = vld [vmem:[#allocation0 + $0x97] sm:$0x4]   ;;  %29 = vst [vmem:[#allocation0 + $0x7d8] sm:$0x3] %v3754_v25  ;;  %v3762_v31 = vld [vmem:[%s5697_s0 + $0x1e6] sm:$0x3] }
  0xc4   :  { %v2524_v60 = vld [vmem:[#allocation0 + $0x19] sm:$0x1]   ;;  %v3770_v32 = vld [vmem:[%s5697_s0 + $0x1d6] sm:$0x3]  ;;  %v3778_v33 = vld [vmem:[%s5697_s0 + $0x1c6] sm:$0x3] }
  0xc5   :  { %v2534_v61 = vld [vmem:[#allocation0 + $0xd6] sm:$0x8]   ;;  %v2528_v63 = vsel %vm1284_vm0, %v2526_v58, %v2524_v60  ;;  %69 = vst [vmem:[#allocation0 + $0x798] sm:$0x3] %v3762_v31  ;;  %109 = vst [vmem:[#allocation0 + $0x758] sm:$0x3] %v3770_v32 }
  0xc6   :  { %v2538_v62 = vld [vmem:[#allocation0 + $0x115] sm:$0x10]   ;;  %v2532_v4 = vsel %vm1288_vm1, %v2530_v59, %v2528_v63  ;;  %149 = vst [vmem:[#allocation0 + $0x718] sm:$0x3] %v3778_v33  ;;  %v3786_v39 = vld [vmem:[%s5697_s0 + $0x1b6] sm:$0x3] }
  0xc7   :  { %v2542_v0 = vld [vmem:[#allocation0 + $0x154] sm:$0x20]   ;;  %v2536_v9 = vsel %vm1292_vm2, %v2534_v61, %v2532_v4  ;;  %v3794_v40 = vld [vmem:[%s5697_s0 + $0x1a6] sm:$0x3]  ;;  %v3802_v41 = vld [vmem:[%s5697_s0 + $0x196] sm:$0x3] }
  0xc8   :  { %v2546_v1 = vld [vmem:[#allocation0 + $0x193] sm:$0x40]   ;;  %v2540_v14 = vsel %vm1296_vm3, %v2538_v62, %v2536_v9  ;;  %189 = vst [vmem:[#allocation0 + $0x6d8] sm:$0x3] %v3786_v39  ;;  %229 = vst [vmem:[#allocation0 + $0x698] sm:$0x3] %v3794_v40 }
  0xc9   :  { %v2568_v2 = vld [vmem:[#allocation0 + $0x2d6] sm:$0x8]   ;;  %v2544_v20 = vsel %vm1300_vm4, %v2542_v0, %v2540_v14  ;;  %269 = vst [vmem:[#allocation0 + $0x658] sm:$0x3] %v3802_v41  ;;  %v3810_v45 = vld [vmem:[%s5697_s0 + $0x186] sm:$0x3]  ;;  %v4866_v0 = vpop.permute.xlu1 %1614  }
  0xca   :  { %v2550_v5 = vld [vmem:[#allocation0 + $0x1d2] sm:$0x80]   ;;  %v2548_v27 = vsel %vm1304_vm5, %v2546_v1, %v2544_v20  ;;  %v2663_v46 = vld [vmem:[#allocation0 + $0x18] sm:$0x1]   ;;  %309 = vst [vmem:[#allocation0 + $0x618] sm:$0x3] %v3810_v45 }
  0xcb   :  { %v2558_v6 = vld [vmem:[#allocation0 + $0x219] sm:$0x1]   ;;  %v2552_v34 = vsel %vm1308_vm6, %v2550_v5, %v2548_v27  ;;  %v2665_v47 = vld [vmem:[#allocation0 + $0x57] sm:$0x2]  }
  0xcc   :  { %v2560_v7 = vld [vmem:[#allocation0 + $0x258] sm:$0x2]   ;;  %2553 = vrot.lane.b32.xlu0 %v2552_v34, %s4076_s16  ;;  %v2667_v50 = vsel %vm1284_vm0, %v2665_v47, %v2663_v46  ;;  %v2669_v52 = vld [vmem:[#allocation0 + $0x96] sm:$0x4]  }
  0xcd   :  { %v2564_v8 = vld [vmem:[#allocation0 + $0x297] sm:$0x4]   ;;  %v2562_v10 = vsel %vm1284_vm0, %v2560_v7, %v2558_v6  ;;  %v2673_v53 = vld [vmem:[#allocation0 + $0xd5] sm:$0x8]   ;;  %v2671_v57 = vsel %vm1288_vm1, %v2669_v52, %v2667_v50 }
  0xce   :  { %v2572_v11 = vld [vmem:[#allocation0 + $0x315] sm:$0x10]   ;;  %v2566_v15 = vsel %vm1288_vm1, %v2564_v8, %v2562_v10  ;;  %v2677_v54 = vld [vmem:[#allocation0 + $0x114] sm:$0x10]   ;;  %v2675_v60 = vsel %vm1292_vm2, %v2673_v53, %v2671_v57 }
  0xcf   :  { %v2576_v12 = vld [vmem:[#allocation0 + $0x354] sm:$0x20]   ;;  %v2570_v21 = vsel %vm1292_vm2, %v2568_v2, %v2566_v15  ;;  %v2681_v58 = vld [vmem:[#allocation0 + $0x153] sm:$0x20]   ;;  %v2679_v2 = vsel %vm1296_vm3, %v2677_v54, %v2675_v60 }
  0xd0   :  { %v2580_v13 = vld [vmem:[#allocation0 + $0x393] sm:$0x40]   ;;  %v2574_v28 = vsel %vm1296_vm3, %v2572_v11, %v2570_v21  ;;  %v2685_v61 = vld [vmem:[#allocation0 + $0x192] sm:$0x40]   ;;  %v2683_v8 = vsel %vm1300_vm4, %v2681_v58, %v2679_v2  ;;  %v3963_v2 = vld [vmem:[%s5697_s0 + $0x54] sm:$0x3] }
  0xd1   :  { %v2584_v16 = vld [vmem:[#allocation0 + $0x3d2] sm:$0x80]   ;;  %v2578_v36 = vsel %vm1300_vm4, %v2576_v12, %v2574_v28  ;;  %v2697_v62 = vld [vmem:[#allocation0 + $0x218] sm:$0x1]   ;;  %v2687_v11 = vsel %vm1304_vm5, %v2685_v61, %v2683_v8  ;;  %1074 = vst [vmem:[#allocation0 + $0x150] sm:$0x3] %v3963_v2 }
  0xd2   :  { %v2599_v17 = vld [vmem:[#allocation0 + $0x497] sm:$0x4]   ;;  %v2582_v43 = vsel %vm1304_vm5, %v2580_v13, %v2578_v36  ;;  %v2699_v63 = vld [vmem:[#allocation0 + $0x257] sm:$0x2]   ;;  %v3979_v8 = vld [vmem:[%s5697_s0 + $0x34] sm:$0x3] }
  0xd3   :  { %v2603_v18 = vld [vmem:[#allocation0 + $0x4d6] sm:$0x8]   ;;  %v2586_v48 = vsel %vm1308_vm6, %v2584_v16, %v2582_v43  ;;  %v2689_v4 = vld [vmem:[#allocation0 + $0x1d1] sm:$0x80]   ;;  %v2701_v5 = vsel %vm1284_vm0, %v2699_v63, %v2697_v62  ;;  %v3947_v63 = vld [vmem:[%s5697_s0 + $0x74] sm:$0x3] }
  0xd4   :  { %v2607_v19 = vld [vmem:[#allocation0 + $0x515] sm:$0x10]   ;;  %2587 = vrot.lane.b32.xlu1 %v2586_v48, %s4076_s16  ;;  %v2703_v6 = vld [vmem:[#allocation0 + $0x296] sm:$0x4]   ;;  %994 = vst [vmem:[#allocation0 + $0x1d0] sm:$0x3] %v3947_v63 }
  0xd5   :  { %v2593_v22 = vld [vmem:[#allocation0 + $0x419] sm:$0x1]   ;;  %v2707_v7 = vld [vmem:[#allocation0 + $0x2d5] sm:$0x8]   ;;  %v2705_v9 = vsel %vm1288_vm1, %v2703_v6, %v2701_v5  ;;  %1154 = vst [vmem:[#allocation0 + $0xd0] sm:$0x3] %v3979_v8 }
  0xd6   :  { %v2595_v23 = vld [vmem:[#allocation0 + $0x458] sm:$0x2]   ;;  %v2711_v10 = vld [vmem:[#allocation0 + $0x314] sm:$0x10]   ;;  %v2709_v12 = vsel %vm1292_vm2, %v2707_v7, %v2705_v9  ;;  %v3971_v7 = vld [vmem:[%s5697_s0 + $0x44] sm:$0x3] }
  0xd7   :  { %v2611_v24 = vld [vmem:[#allocation0 + $0x554] sm:$0x20]   ;;  %v2597_v29 = vsel %vm1284_vm0, %v2595_v23, %v2593_v22  ;;  %v2715_v13 = vld [vmem:[#allocation0 + $0x353] sm:$0x20]   ;;  %v2713_v22 = vsel %vm1296_vm3, %v2711_v10, %v2709_v12  ;;  %v3987_v9 = vld [vmem:[%s5697_s0 + $0x24] sm:$0x3] }
  0xd8   :  { %v2615_v30 = vld [vmem:[#allocation0 + $0x593] sm:$0x40]   ;;  %v2601_v37 = vsel %vm1288_vm1, %v2599_v17, %v2597_v29  ;;  %v2691_v17 = vsel %vm1308_vm6, %v2689_v4, %v2687_v11  ;;  %v2732_v23 = vld [vmem:[#allocation0 + $0x418] sm:$0x1]   ;;  %1114 = vst [vmem:[#allocation0 + $0x110] sm:$0x3] %v3971_v7 }
  0xd9   :  { %v2619_v38 = vld [vmem:[#allocation0 + $0x5d2] sm:$0x80]   ;;  %v2605_v44 = vsel %vm1292_vm2, %v2603_v18, %v2601_v37  ;;  %v4877_v18 = vpop.permute.xlu1 %1684   ;;  %v2719_v25 = vld [vmem:[#allocation0 + $0x392] sm:$0x40]   ;;  %1194 = vst [vmem:[#allocation0 + $0x90] sm:$0x3] %v3987_v9 }
  0xda   :  { %v2609_v49 = vsel %vm1296_vm3, %v2607_v19, %v2605_v44  ;;  %v2630_v14 = vld [vmem:[#allocation0 + $0x658] sm:$0x2]   ;;  %v2734_v27 = vld [vmem:[#allocation0 + $0x457] sm:$0x2]  }
  0xdb   :  { %v2613_v56 = vsel %vm1300_vm4, %v2611_v24, %v2609_v49  ;;  %v2634_v15 = vld [vmem:[#allocation0 + $0x697] sm:$0x4]   ;;  %v2738_v28 = vld [vmem:[#allocation0 + $0x496] sm:$0x4]   ;;  %v2736_v33 = vsel %vm1284_vm0, %v2734_v27, %v2732_v23  ;;  %v3915_v23 = vld [vmem:[%s5697_s0 + $0xb4] sm:$0x3] }
  0xdc   :  { %v2617_v59 = vsel %vm1304_vm5, %v2615_v30, %v2613_v56  ;;  %v2642_v16 = vld [vmem:[#allocation0 + $0x715] sm:$0x10]   ;;  %v2742_v29 = vld [vmem:[#allocation0 + $0x4d5] sm:$0x8]   ;;  %v2740_v39 = vsel %vm1288_vm1, %v2738_v28, %v2736_v33  ;;  %834 = vst [vmem:[#allocation0 + $0x2d0] sm:$0x3] %v3915_v23 }
  0xdd   :  { %v2621_v1 = vsel %vm1308_vm6, %v2619_v38, %v2617_v59  ;;  %v2628_v19 = vld [vmem:[#allocation0 + $0x619] sm:$0x1]   ;;  %v2746_v34 = vld [vmem:[#allocation0 + $0x514] sm:$0x10]   ;;  %v2717_v38 = vsel %vm1300_vm4, %v2715_v13, %v2713_v22  ;;  %v2744_v46 = vsel %vm1292_vm2, %v2742_v29, %v2740_v39  ;;  %v3995_v13 = vld [vmem:[%s5697_s0 + $0x14] sm:$0x3] }
  0xde   :  { %2622 = vrot.lane.b32.xlu0 %v2621_v1, %s4076_s16  ;;  %v2638_v20 = vld [vmem:[#allocation0 + $0x6d6] sm:$0x8]   ;;  %v2632_v24 = vsel %vm1284_vm0, %v2630_v14, %v2628_v19  ;;  %v2750_v36 = vld [vmem:[#allocation0 + $0x553] sm:$0x20]   ;;  %v2748_v53 = vsel %vm1296_vm3, %v2746_v34, %v2744_v46  ;;  %v2721_v60 = vsel %vm1304_vm5, %v2719_v25, %v2717_v38  ;;  %v3955_v1 = vld [vmem:[%s5697_s0 + $0x64] sm:$0x3] }
  0xdf   :  { %v2646_v21 = vld [vmem:[#allocation0 + $0x754] sm:$0x20]   ;;  %v2636_v30 = vsel %vm1288_vm1, %v2634_v15, %v2632_v24  ;;  %v2754_v40 = vld [vmem:[#allocation0 + $0x592] sm:$0x40]   ;;  %v2752_v61 = vsel %vm1300_vm4, %v2750_v36, %v2748_v53  ;;  %1034 = vst [vmem:[#allocation0 + $0x190] sm:$0x3] %v3955_v1 }
  0xe0   :  { %v2650_v31 = vld [vmem:[#allocation0 + $0x793] sm:$0x40]   ;;  %v2640_v37 = vsel %vm1292_vm2, %v2638_v20, %v2636_v30  ;;  %v2767_v41 = vld [vmem:[#allocation0 + $0x618] sm:$0x1]   ;;  %v2756_v5 = vsel %vm1304_vm5, %v2754_v40, %v2752_v61  ;;  %v4003_v14 = vld [vmem:[%s5697_s0 + $0x4] sm:$0x3]  ;;  %v4962_v30 = vpop.permute.xlu1 %1753  }
  0xe1   :  { %v2654_v32 = vld [vmem:[#allocation0 + $0x7d2] sm:$0x80]   ;;  %v2769_v43 = vld [vmem:[#allocation0 + $0x657] sm:$0x2]   ;;  %v2644_v44 = vsel %vm1296_vm3, %v2642_v16, %v2640_v37  ;;  %v3883_v15 = vld [vmem:[%s5697_s0 + $0xf4] sm:$0x3] }
  0xe2   :  { %2692 = vrot.lane.b32.xlu0 %v2691_v17, %s4077_s19  ;;  %v2723_v45 = vld [vmem:[#allocation0 + $0x3d1] sm:$0x80]   ;;  %v2771_v47 = vsel %vm1284_vm0, %v2769_v43, %v2767_v41  ;;  %v2648_v52 = vsel %vm1300_vm4, %v2646_v21, %v2644_v44  ;;  %1234 = vst [vmem:[#allocation0 + $0x50] sm:$0x3] %v3995_v13  ;;  %1274 = vst [vmem:[#allocation0 + $0x10] sm:$0x3] %v4003_v14  ;;  %v4941_v21 = vpop.permute.xlu0 %1719  }
  0xe3   :  { %v2773_v48 = vld [vmem:[#allocation0 + $0x696] sm:$0x4]   ;;  %v2652_v59 = vsel %vm1304_vm5, %v2650_v31, %v2648_v52  ;;  %v2725_v16 = vsel %vm1308_vm6, %v2723_v45, %v2721_v60  ;;  %674 = vst [vmem:[#allocation0 + $0x3d0] sm:$0x3] %v3883_v15  ;;  %v3891_v17 = vld [vmem:[%s5697_s0 + $0xe4] sm:$0x3] }
  0xe4   :  { %v2777_v49 = vld [vmem:[#allocation0 + $0x6d5] sm:$0x8]   ;;  %v2775_v56 = vsel %vm1288_vm1, %v2773_v48, %v2771_v47  ;;  %v2656_v4 = vsel %vm1308_vm6, %v2654_v32, %v2652_v59  ;;  %v3899_v19 = vld [vmem:[%s5697_s0 + $0xd4] sm:$0x3]  ;;  %v3907_v20 = vld [vmem:[%s5697_s0 + $0xc4] sm:$0x3] }
  0xe5   :  { %v2781_v50 = vld [vmem:[#allocation0 + $0x714] sm:$0x10]   ;;  %v2779_v62 = vsel %vm1292_vm2, %v2777_v49, %v2775_v56  ;;  %2657 = vrot.lane.b32.xlu1 %v2656_v4, %s4076_s16  ;;  %714 = vst [vmem:[#allocation0 + $0x390] sm:$0x3] %v3891_v17  ;;  %754 = vst [vmem:[#allocation0 + $0x350] sm:$0x3] %v3899_v19 }
  0xe6   :  { %v2758_v54 = vld [vmem:[#allocation0 + $0x5d1] sm:$0x80]   ;;  %v2783_v6 = vsel %vm1296_vm3, %v2781_v50, %v2779_v62  ;;  %794 = vst [vmem:[#allocation0 + $0x310] sm:$0x3] %v3907_v20  ;;  %v3923_v24 = vld [vmem:[%s5697_s0 + $0xa4] sm:$0x3]  ;;  %v4984_v39 = vpop.permute.xlu0 %1788  }
  0xe7   :  { %v2785_v57 = vld [vmem:[#allocation0 + $0x753] sm:$0x20]   ;;  %v2760_v10 = vsel %vm1308_vm6, %v2758_v54, %v2756_v5  ;;  %v3931_v25 = vld [vmem:[%s5697_s0 + $0x94] sm:$0x3]  ;;  %874 = vst [vmem:[#allocation0 + $0x290] sm:$0x3] %v3923_v24 }
  0xe8   :  { %v2789_v58 = vld [vmem:[#allocation0 + $0x792] sm:$0x40]   ;;  %v2787_v11 = vsel %vm1300_vm4, %v2785_v57, %v2783_v6  ;;  %2761 = vrot.lane.b32.xlu0 %v2760_v10, %s4077_s19  ;;  %914 = vst [vmem:[#allocation0 + $0x250] sm:$0x3] %v3931_v25  ;;  %v3939_v27 = vld [vmem:[%s5697_s0 + $0x84] sm:$0x3] }
  0xe9   :  { %v2793_v12 = vld [vmem:[#allocation0 + $0x7d1] sm:$0x80]   ;;  %v2791_v22 = vsel %vm1304_vm5, %v2789_v58, %v2787_v11  ;;  %v3819_v28 = vld [vmem:[%s5697_s0 + $0x174] sm:$0x3]  ;;  %v3827_v29 = vld [vmem:[%s5697_s0 + $0x164] sm:$0x3]  ;;  %2726 = vrot.lane.b32.xlu1 %v2725_v16, %s4077_s19 }
  0xea   :  { %954 = vst [vmem:[#allocation0 + $0x210] sm:$0x3] %v3939_v27  ;;  %354 = vst [vmem:[#allocation0 + $0x5d0] sm:$0x3] %v3819_v28  ;;  %v3835_v31 = vld [vmem:[%s5697_s0 + $0x154] sm:$0x3]  ;;  %v2795_v34 = vsel %vm1308_vm6, %v2793_v12, %v2791_v22  ;;  %v4989_v56 = vpop.permute.xlu0 %1858  }
  0xeb   :  { %394 = vst [vmem:[#allocation0 + $0x590] sm:$0x3] %v3827_v29  ;;  %v3843_v32 = vld [vmem:[%s5697_s0 + $0x144] sm:$0x3]  ;;  %v3851_v33 = vld [vmem:[%s5697_s0 + $0x134] sm:$0x3] }
  0xec   :  { %434 = vst [vmem:[#allocation0 + $0x550] sm:$0x3] %v3835_v31  ;;  %474 = vst [vmem:[#allocation0 + $0x510] sm:$0x3] %v3843_v32  ;;  %v3859_v36 = vld [vmem:[%s5697_s0 + $0x124] sm:$0x3] }
  0xed   :  { %514 = vst [vmem:[#allocation0 + $0x4d0] sm:$0x3] %v3851_v33  ;;  %v3867_v37 = vld [vmem:[%s5697_s0 + $0x114] sm:$0x3]  ;;  %v3875_v38 = vld [vmem:[%s5697_s0 + $0x104] sm:$0x3]  ;;  %2796 = vrot.lane.b32.xlu1 %v2795_v34, %s4077_s19 }
  0xee   :  { %554 = vst [vmem:[#allocation0 + $0x490] sm:$0x3] %v3859_v36  ;;  %594 = vst [vmem:[#allocation0 + $0x450] sm:$0x3] %v3867_v37  ;;  %v2808_v40 = vld [vmem:[#allocation0 + $0x8f] sm:$0x4]  }
  0xef   :  { %634 = vst [vmem:[#allocation0 + $0x410] sm:$0x3] %v3875_v38  ;;  %v2802_v41 = vld [vmem:[#allocation0 + $0x11] sm:$0x1]   ;;  %v3755_v15 = vld [vmem:[%s5697_s0 + $0x1f4] sm:$0x3] }
  0xf0   :  { %v2804_v43 = vld [vmem:[#allocation0 + $0x50] sm:$0x2]   ;;  %v3763_v16 = vld [vmem:[%s5697_s0 + $0x1e4] sm:$0x3]  ;;  %v3771_v17 = vld [vmem:[%s5697_s0 + $0x1d4] sm:$0x3] }
  0xf1   :  { %v2812_v44 = vld [vmem:[#allocation0 + $0xce] sm:$0x8]   ;;  %v2806_v45 = vsel %vm1284_vm0, %v2804_v43, %v2802_v41  ;;  %34 = vst [vmem:[#allocation0 + $0x7d0] sm:$0x3] %v3755_v15  ;;  %74 = vst [vmem:[#allocation0 + $0x790] sm:$0x3] %v3763_v16  ;;  %v5031_v41 = vpop.permute.xlu1 %1823  }
  0xf2   :  { %v2816_v46 = vld [vmem:[#allocation0 + $0x10d] sm:$0x10]   ;;  %v2810_v49 = vsel %vm1288_vm1, %v2808_v40, %v2806_v45  ;;  %114 = vst [vmem:[#allocation0 + $0x750] sm:$0x3] %v3771_v17  ;;  %v3779_v24 = vld [vmem:[%s5697_s0 + $0x1c4] sm:$0x3] }
  0xf3   :  { %v2820_v47 = vld [vmem:[#allocation0 + $0x14c] sm:$0x20]   ;;  %v2814_v57 = vsel %vm1292_vm2, %v2812_v44, %v2810_v49  ;;  %v3787_v25 = vld [vmem:[%s5697_s0 + $0x1b4] sm:$0x3]  ;;  %v3795_v27 = vld [vmem:[%s5697_s0 + $0x1a4] sm:$0x3] }
  0xf4   :  { %v2824_v48 = vld [vmem:[#allocation0 + $0x18b] sm:$0x40]   ;;  %v2818_v61 = vsel %vm1296_vm3, %v2816_v46, %v2814_v57  ;;  %154 = vst [vmem:[#allocation0 + $0x710] sm:$0x3] %v3779_v24  ;;  %194 = vst [vmem:[#allocation0 + $0x6d0] sm:$0x3] %v3787_v25 }
  0xf5   :  { %v2828_v50 = vld [vmem:[#allocation0 + $0x1ca] sm:$0x80]   ;;  %v2822_v4 = vsel %vm1300_vm4, %v2820_v47, %v2818_v61  ;;  %234 = vst [vmem:[#allocation0 + $0x690] sm:$0x3] %v3795_v27  ;;  %v3803_v31 = vld [vmem:[%s5697_s0 + $0x194] sm:$0x3]  ;;  %v5036_v47 = vpop.permute.xlu0 %1927  }
  0xf6   :  { %v2838_v52 = vld [vmem:[#allocation0 + $0x250] sm:$0x2]   ;;  %v2826_v11 = vsel %vm1304_vm5, %v2824_v48, %v2822_v4  ;;  %v3811_v32 = vld [vmem:[%s5697_s0 + $0x184] sm:$0x3]  ;;  %v2941_v33 = vld [vmem:[#allocation0 + $0x10] sm:$0x1]  }
  0xf7   :  { %v2842_v53 = vld [vmem:[#allocation0 + $0x28f] sm:$0x4]   ;;  %v2830_v19 = vsel %vm1308_vm6, %v2828_v50, %v2826_v11  ;;  %274 = vst [vmem:[#allocation0 + $0x650] sm:$0x3] %v3803_v31  ;;  %314 = vst [vmem:[#allocation0 + $0x610] sm:$0x3] %v3811_v32 }
  0xf8   :  { %v2850_v54 = vld [vmem:[#allocation0 + $0x30d] sm:$0x10]   ;;  %2831 = vrot.lane.b32.xlu0 %v2830_v19, %s4078_s23  ;;  %v2943_v37 = vld [vmem:[#allocation0 + $0x4f] sm:$0x2]  }
  0xf9   :  { %v2836_v58 = vld [vmem:[#allocation0 + $0x211] sm:$0x1]   ;;  %v2947_v38 = vld [vmem:[#allocation0 + $0x8e] sm:$0x4]   ;;  %v2945_v45 = vsel %vm1284_vm0, %v2943_v37, %v2941_v33 }
  0xfa   :  { %v2846_v59 = vld [vmem:[#allocation0 + $0x2ce] sm:$0x8]   ;;  %v2840_v62 = vsel %vm1284_vm0, %v2838_v52, %v2836_v58  ;;  %v2951_v40 = vld [vmem:[#allocation0 + $0xcd] sm:$0x8]   ;;  %v2949_v49 = vsel %vm1288_vm1, %v2947_v38, %v2945_v45 }
  0xfb   :  { %v2854_v60 = vld [vmem:[#allocation0 + $0x34c] sm:$0x20]   ;;  %v2844_v5 = vsel %vm1288_vm1, %v2842_v53, %v2840_v62  ;;  %v2955_v46 = vld [vmem:[#allocation0 + $0x10c] sm:$0x10]   ;;  %v2953_v57 = vsel %vm1292_vm2, %v2951_v40, %v2949_v49 }
  0xfc   :  { %v2858_v63 = vld [vmem:[#allocation0 + $0x38b] sm:$0x40]   ;;  %v2848_v12 = vsel %vm1292_vm2, %v2846_v59, %v2844_v5  ;;  %v2959_v50 = vld [vmem:[#allocation0 + $0x14b] sm:$0x20]   ;;  %v2957_v61 = vsel %vm1296_vm3, %v2955_v46, %v2953_v57 }
  0xfd   :  { %v2881_v1 = vld [vmem:[#allocation0 + $0x4ce] sm:$0x8]   ;;  %v2852_v20 = vsel %vm1296_vm3, %v2850_v54, %v2848_v12  ;;  %v2963_v52 = vld [vmem:[#allocation0 + $0x18a] sm:$0x40]   ;;  %v2961_v4 = vsel %vm1300_vm4, %v2959_v50, %v2957_v61 }
  0xfe   :  { %v2885_v2 = vld [vmem:[#allocation0 + $0x50d] sm:$0x10]   ;;  %v2856_v28 = vsel %vm1300_vm4, %v2854_v60, %v2852_v20  ;;  %v2975_v53 = vld [vmem:[#allocation0 + $0x210] sm:$0x1]  }
  0xff   :  { %v2862_v6 = vld [vmem:[#allocation0 + $0x3ca] sm:$0x80]   ;;  %v2860_v34 = vsel %vm1304_vm5, %v2858_v63, %v2856_v28  ;;  %v2977_v58 = vld [vmem:[#allocation0 + $0x24f] sm:$0x2]  }
 0x100   :  { %v2871_v7 = vld [vmem:[#allocation0 + $0x411] sm:$0x1]   ;;  %v2864_v43 = vsel %vm1308_vm6, %v2862_v6, %v2860_v34  ;;  %v2981_v59 = vld [vmem:[#allocation0 + $0x28e] sm:$0x4]   ;;  %v2979_v63 = vsel %vm1284_vm0, %v2977_v58, %v2975_v53 }
 0x101   :  { %v2873_v8 = vld [vmem:[#allocation0 + $0x450] sm:$0x2]   ;;  %2865 = vrot.lane.b32.xlu1 %v2864_v43, %s4078_s23  ;;  %v2985_v60 = vld [vmem:[#allocation0 + $0x2cd] sm:$0x8]   ;;  %v2983_v5 = vsel %vm1288_vm1, %v2981_v59, %v2979_v63 }
 0x102   :  { %v2877_v9 = vld [vmem:[#allocation0 + $0x48f] sm:$0x4]   ;;  %v2875_v13 = vsel %vm1284_vm0, %v2873_v8, %v2871_v7  ;;  %v2967_v62 = vld [vmem:[#allocation0 + $0x1c9] sm:$0x80]   ;;  %v2965_v8 = vsel %vm1304_vm5, %v2963_v52, %v2961_v4  ;;  %v3956_v4 = vld [vmem:[%s5697_s0 + $0x62] sm:$0x3] }
 0x103   :  { %v2889_v10 = vld [vmem:[#allocation0 + $0x54c] sm:$0x20]   ;;  %v2879_v22 = vsel %vm1288_vm1, %v2877_v9, %v2875_v13  ;;  %v2987_v9 = vsel %vm1292_vm2, %v2985_v60, %v2983_v5  ;;  %v2969_v15 = vsel %vm1308_vm6, %v2967_v62, %v2965_v8  ;;  %v2997_v20 = vld [vmem:[#allocation0 + $0x38a] sm:$0x40]   ;;  %1039 = vst [vmem:[#allocation0 + $0x188] sm:$0x3] %v3956_v4 }
 0x104   :  { %v2893_v14 = vld [vmem:[#allocation0 + $0x58b] sm:$0x40]   ;;  %v2883_v29 = vsel %vm1292_vm2, %v2881_v1, %v2879_v22  ;;  %v2989_v1 = vld [vmem:[#allocation0 + $0x30c] sm:$0x10]   ;;  %v3964_v8 = vld [vmem:[%s5697_s0 + $0x52] sm:$0x3] }
 0x105   :  { %v2897_v23 = vld [vmem:[#allocation0 + $0x5ca] sm:$0x80]   ;;  %v2887_v36 = vsel %vm1296_vm3, %v2885_v2, %v2883_v29  ;;  %v5046_v2 = vpop.permute.xlu1 %1892   ;;  %v2991_v16 = vsel %vm1296_vm3, %v2989_v1, %v2987_v9  ;;  %v3010_v22 = vld [vmem:[#allocation0 + $0x410] sm:$0x1]   ;;  %v3948_v1 = vld [vmem:[%s5697_s0 + $0x72] sm:$0x3] }
 0x106   :  { %v2891_v44 = vsel %vm1300_vm4, %v2889_v10, %v2887_v36  ;;  %v2912_v6 = vld [vmem:[#allocation0 + $0x68f] sm:$0x4]   ;;  %v2993_v10 = vld [vmem:[#allocation0 + $0x34b] sm:$0x20]   ;;  %999 = vst [vmem:[#allocation0 + $0x1c8] sm:$0x3] %v3948_v1 }
 0x107   :  { %v2895_v48 = vsel %vm1304_vm5, %v2893_v14, %v2891_v44  ;;  %v2916_v7 = vld [vmem:[#allocation0 + $0x6ce] sm:$0x8]   ;;  %v3016_v24 = vld [vmem:[#allocation0 + $0x48e] sm:$0x4]   ;;  %v2995_v34 = vsel %vm1300_vm4, %v2993_v10, %v2991_v16  ;;  %v3972_v9 = vld [vmem:[%s5697_s0 + $0x42] sm:$0x3] }
 0x108   :  { %v2899_v54 = vsel %vm1308_vm6, %v2897_v23, %v2895_v48  ;;  %v2906_v11 = vld [vmem:[#allocation0 + $0x611] sm:$0x1]   ;;  %v3012_v23 = vld [vmem:[#allocation0 + $0x44f] sm:$0x2]   ;;  %v2999_v60 = vsel %vm1304_vm5, %v2997_v20, %v2995_v34  ;;  %v3980_v10 = vld [vmem:[%s5697_s0 + $0x32] sm:$0x3] }
 0x109   :  { %2900 = vrot.lane.b32.xlu0 %v2899_v54, %s4078_s23  ;;  %v2908_v12 = vld [vmem:[#allocation0 + $0x650] sm:$0x2]   ;;  %v5056_v25 = vpop.permute.xlu1 %1962   ;;  %v3014_v29 = vsel %vm1284_vm0, %v3012_v23, %v3010_v22  ;;  %v3020_v31 = vld [vmem:[#allocation0 + $0x4cd] sm:$0x8]   ;;  %1079 = vst [vmem:[#allocation0 + $0x148] sm:$0x3] %v3964_v8 }
 0x10a   :  { %v2920_v13 = vld [vmem:[#allocation0 + $0x70d] sm:$0x10]   ;;  %v2910_v17 = vsel %vm1284_vm0, %v2908_v12, %v2906_v11  ;;  %v3024_v32 = vld [vmem:[#allocation0 + $0x50c] sm:$0x10]   ;;  %v3018_v36 = vsel %vm1288_vm1, %v3016_v24, %v3014_v29  ;;  %1119 = vst [vmem:[#allocation0 + $0x108] sm:$0x3] %v3972_v9  ;;  %v5114_v24 = vpop.permute.xlu0 %1997  }
 0x10b   :  { %v2924_v14 = vld [vmem:[#allocation0 + $0x74c] sm:$0x20]   ;;  %v2914_v27 = vsel %vm1288_vm1, %v2912_v6, %v2910_v17  ;;  %v3028_v37 = vld [vmem:[#allocation0 + $0x54b] sm:$0x20]   ;;  %v3022_v45 = vsel %vm1292_vm2, %v3020_v31, %v3018_v36  ;;  %1159 = vst [vmem:[#allocation0 + $0xc8] sm:$0x3] %v3980_v10 }
 0x10c   :  { %v2928_v19 = vld [vmem:[#allocation0 + $0x78b] sm:$0x40]   ;;  %v2918_v33 = vsel %vm1292_vm2, %v2916_v7, %v2914_v27  ;;  %v3032_v38 = vld [vmem:[#allocation0 + $0x58a] sm:$0x40]   ;;  %v3026_v52 = vsel %vm1296_vm3, %v3024_v32, %v3022_v45  ;;  %v4004_v16 = vld [vmem:[%s5697_s0 + $0x2] sm:$0x3] }
 0x10d   :  { %2970 = vrot.lane.b32.xlu0 %v2969_v15, %s4079_s28  ;;  %v2932_v28 = vld [vmem:[#allocation0 + $0x7ca] sm:$0x80]   ;;  %v3045_v40 = vld [vmem:[#allocation0 + $0x610] sm:$0x1]   ;;  %v2922_v43 = vsel %vm1296_vm3, %v2920_v13, %v2918_v33  ;;  %v3030_v61 = vsel %vm1300_vm4, %v3028_v37, %v3026_v52  ;;  %v3996_v15 = vld [vmem:[%s5697_s0 + $0x12] sm:$0x3] }
 0x10e   :  { %v3001_v44 = vld [vmem:[#allocation0 + $0x3c9] sm:$0x80]   ;;  %v2926_v50 = vsel %vm1300_vm4, %v2924_v14, %v2922_v43  ;;  %v3034_v6 = vsel %vm1304_vm5, %v3032_v38, %v3030_v61  ;;  %v3988_v14 = vld [vmem:[%s5697_s0 + $0x22] sm:$0x3]  ;;  %1239 = vst [vmem:[#allocation0 + $0x48] sm:$0x3] %v3996_v15 }
 0x10f   :  { %v3047_v46 = vld [vmem:[#allocation0 + $0x64f] sm:$0x2]   ;;  %v2930_v59 = vsel %vm1304_vm5, %v2928_v19, %v2926_v50  ;;  %v3003_v17 = vsel %vm1308_vm6, %v3001_v44, %v2999_v60  ;;  %1199 = vst [vmem:[#allocation0 + $0x88] sm:$0x3] %v3988_v14  ;;  %1278 = vst [vmem:[#allocation0 + $0x8] sm:$0x3] %v4004_v16 }
 0x110   :  { %v3051_v48 = vld [vmem:[#allocation0 + $0x68e] sm:$0x4]   ;;  %v3049_v54 = vsel %vm1284_vm0, %v3047_v46, %v3045_v40  ;;  %v2934_v5 = vsel %vm1308_vm6, %v2932_v28, %v2930_v59  ;;  %v3884_v20 = vld [vmem:[%s5697_s0 + $0xf2] sm:$0x3]  ;;  %v3892_v22 = vld [vmem:[%s5697_s0 + $0xe2] sm:$0x3]  ;;  %v5145_v40 = vpop.permute.xlu1 %2031  }
 0x111   :  { %v3055_v49 = vld [vmem:[#allocation0 + $0x6cd] sm:$0x8]   ;;  %v3053_v62 = vsel %vm1288_vm1, %v3051_v48, %v3049_v54  ;;  %2935 = vrot.lane.b32.xlu1 %v2934_v5, %s4078_s23  ;;  %v3900_v23 = vld [vmem:[%s5697_s0 + $0xd2] sm:$0x3]  ;;  %679 = vst [vmem:[#allocation0 + $0x3c8] sm:$0x3] %v3884_v20 }
 0x112   :  { %v3036_v53 = vld [vmem:[#allocation0 + $0x5c9] sm:$0x80]   ;;  %v3057_v7 = vsel %vm1292_vm2, %v3055_v49, %v3053_v62  ;;  %719 = vst [vmem:[#allocation0 + $0x388] sm:$0x3] %v3892_v22  ;;  %759 = vst [vmem:[#allocation0 + $0x348] sm:$0x3] %v3900_v23  ;;  %v5160_v49 = vpop.permute.xlu0 %2066  }
 0x113   :  { %v3059_v57 = vld [vmem:[#allocation0 + $0x70c] sm:$0x10]   ;;  %v3038_v11 = vsel %vm1308_vm6, %v3036_v53, %v3034_v6  ;;  %v3908_v28 = vld [vmem:[%s5697_s0 + $0xc2] sm:$0x3]  ;;  %v3916_v29 = vld [vmem:[%s5697_s0 + $0xb2] sm:$0x3] }
 0x114   :  { %v3063_v58 = vld [vmem:[#allocation0 + $0x74b] sm:$0x20]   ;;  %v3061_v12 = vsel %vm1296_vm3, %v3059_v57, %v3057_v7  ;;  %3039 = vrot.lane.b32.xlu0 %v3038_v11, %s4079_s28  ;;  %v3924_v31 = vld [vmem:[%s5697_s0 + $0xa2] sm:$0x3]  ;;  %799 = vst [vmem:[#allocation0 + $0x308] sm:$0x3] %v3908_v28 }
 0x115   :  { %v3067_v63 = vld [vmem:[#allocation0 + $0x78a] sm:$0x40]   ;;  %v3065_v19 = vsel %vm1300_vm4, %v3063_v58, %v3061_v12  ;;  %839 = vst [vmem:[#allocation0 + $0x2c8] sm:$0x3] %v3916_v29  ;;  %879 = vst [vmem:[#allocation0 + $0x288] sm:$0x3] %v3924_v31  ;;  %3004 = vrot.lane.b32.xlu1 %v3003_v17, %s4079_s28 }
 0x116   :  { %v3071_v13 = vld [vmem:[#allocation0 + $0x7c9] sm:$0x80]   ;;  %v3069_v27 = vsel %vm1304_vm5, %v3067_v63, %v3065_v19  ;;  %v3932_v32 = vld [vmem:[%s5697_s0 + $0x92] sm:$0x3]  ;;  %v3940_v33 = vld [vmem:[%s5697_s0 + $0x82] sm:$0x3]  ;;  %v5165_v1 = vpop.permute.xlu0 %2136  }
 0x117   :  { %v3820_v34 = vld [vmem:[%s5697_s0 + $0x172] sm:$0x3]  ;;  %919 = vst [vmem:[#allocation0 + $0x248] sm:$0x3] %v3932_v32  ;;  %959 = vst [vmem:[#allocation0 + $0x208] sm:$0x3] %v3940_v33  ;;  %v3073_v43 = vsel %vm1308_vm6, %v3071_v13, %v3069_v27 }
 0x118   :  { %359 = vst [vmem:[#allocation0 + $0x5c8] sm:$0x3] %v3820_v34  ;;  %v3828_v36 = vld [vmem:[%s5697_s0 + $0x162] sm:$0x3]  ;;  %v3836_v37 = vld [vmem:[%s5697_s0 + $0x152] sm:$0x3] }
 0x119   :  { %v3844_v38 = vld [vmem:[%s5697_s0 + $0x142] sm:$0x3]  ;;  %399 = vst [vmem:[#allocation0 + $0x588] sm:$0x3] %v3828_v36  ;;  %439 = vst [vmem:[#allocation0 + $0x548] sm:$0x3] %v3836_v37  ;;  %3074 = vrot.lane.b32.xlu1 %v3073_v43, %s4079_s28 }
 0x11a   :  { %479 = vst [vmem:[#allocation0 + $0x508] sm:$0x3] %v3844_v38  ;;  %v3852_v44 = vld [vmem:[%s5697_s0 + $0x132] sm:$0x3]  ;;  %v3860_v45 = vld [vmem:[%s5697_s0 + $0x122] sm:$0x3] }
 0x11b   :  { %v3868_v46 = vld [vmem:[%s5697_s0 + $0x112] sm:$0x3]  ;;  %519 = vst [vmem:[#allocation0 + $0x4c8] sm:$0x3] %v3852_v44  ;;  %559 = vst [vmem:[#allocation0 + $0x488] sm:$0x3] %v3860_v45 }
 0x11c   :  { %599 = vst [vmem:[#allocation0 + $0x448] sm:$0x3] %v3868_v46  ;;  %v3876_v48 = vld [vmem:[%s5697_s0 + $0x102] sm:$0x3]  ;;  %v3090_v50 = vld [vmem:[#allocation0 + $0xc6] sm:$0x8]  }
 0x11d   :  { %639 = vst [vmem:[#allocation0 + $0x408] sm:$0x3] %v3876_v48  ;;  %v3080_v52 = vld [vmem:[#allocation0 + $0x9] sm:$0x1]   ;;  %v3756_v29 = vld [vmem:[%s5697_s0 + $0x1f2] sm:$0x3] }
 0x11e   :  { %v3082_v53 = vld [vmem:[#allocation0 + $0x48] sm:$0x2]   ;;  %v3764_v31 = vld [vmem:[%s5697_s0 + $0x1e2] sm:$0x3]  ;;  %39 = vst [vmem:[#allocation0 + $0x7c8] sm:$0x3] %v3756_v29 }
 0x11f   :  { %v3086_v54 = vld [vmem:[#allocation0 + $0x87] sm:$0x4]   ;;  %v3084_v57 = vsel %vm1284_vm0, %v3082_v53, %v3080_v52  ;;  %79 = vst [vmem:[#allocation0 + $0x788] sm:$0x3] %v3764_v31  ;;  %v3772_v37 = vld [vmem:[%s5697_s0 + $0x1d2] sm:$0x3] }
 0x120   :  { %v3094_v58 = vld [vmem:[#allocation0 + $0x105] sm:$0x10]   ;;  %v3088_v60 = vsel %vm1288_vm1, %v3086_v54, %v3084_v57  ;;  %v3780_v38 = vld [vmem:[%s5697_s0 + $0x1c2] sm:$0x3]  ;;  %v3788_v43 = vld [vmem:[%s5697_s0 + $0x1b2] sm:$0x3] }
 0x121   :  { %v3102_v59 = vld [vmem:[#allocation0 + $0x183] sm:$0x40]   ;;  %v3092_v4 = vsel %vm1292_vm2, %v3090_v50, %v3088_v60  ;;  %119 = vst [vmem:[#allocation0 + $0x748] sm:$0x3] %v3772_v37  ;;  %159 = vst [vmem:[#allocation0 + $0x708] sm:$0x3] %v3780_v38 }
 0x122   :  { %v3098_v61 = vld [vmem:[#allocation0 + $0x144] sm:$0x20]   ;;  %v3096_v8 = vsel %vm1296_vm3, %v3094_v58, %v3092_v4  ;;  %199 = vst [vmem:[#allocation0 + $0x6c8] sm:$0x3] %v3788_v43  ;;  %v3796_v46 = vld [vmem:[%s5697_s0 + $0x1a2] sm:$0x3] }
 0x123   :  { %v3106_v62 = vld [vmem:[#allocation0 + $0x1c2] sm:$0x80]   ;;  %v3100_v13 = vsel %vm1300_vm4, %v3098_v61, %v3096_v8  ;;  %v3804_v48 = vld [vmem:[%s5697_s0 + $0x192] sm:$0x3]  ;;  %v3812_v50 = vld [vmem:[%s5697_s0 + $0x182] sm:$0x3] }
 0x124   :  { %v3120_v63 = vld [vmem:[#allocation0 + $0x287] sm:$0x4]   ;;  %v3104_v22 = vsel %vm1304_vm5, %v3102_v59, %v3100_v13  ;;  %239 = vst [vmem:[#allocation0 + $0x688] sm:$0x3] %v3796_v46  ;;  %279 = vst [vmem:[#allocation0 + $0x648] sm:$0x3] %v3804_v48  ;;  %v5206_v59 = vpop.permute.xlu1 %2101  }
 0x125   :  { %v3114_v5 = vld [vmem:[#allocation0 + $0x209] sm:$0x1]   ;;  %v3108_v32 = vsel %vm1308_vm6, %v3106_v62, %v3104_v22  ;;  %319 = vst [vmem:[#allocation0 + $0x608] sm:$0x3] %v3812_v50  ;;  %v3219_v54 = vld [vmem:[#allocation0 + $0x8] sm:$0x1]  }
 0x126   :  { %v3116_v6 = vld [vmem:[#allocation0 + $0x248] sm:$0x2]   ;;  %3109 = vrot.lane.b32.xlu0 %v3108_v32, %s4080_s30  ;;  %v3221_v57 = vld [vmem:[#allocation0 + $0x47] sm:$0x2]  }
 0x127   :  { %v3124_v7 = vld [vmem:[#allocation0 + $0x2c6] sm:$0x8]   ;;  %v3118_v9 = vsel %vm1284_vm0, %v3116_v6, %v3114_v5  ;;  %v3225_v58 = vld [vmem:[#allocation0 + $0x86] sm:$0x4]   ;;  %v5211_v6 = vpop.permute.xlu0 %2205  }
 0x128   :  { %v3128_v10 = vld [vmem:[#allocation0 + $0x305] sm:$0x10]   ;;  %v3122_v14 = vsel %vm1288_vm1, %v3120_v63, %v3118_v9  ;;  %v3223_v63 = vsel %vm1284_vm0, %v3221_v57, %v3219_v54  ;;  %v3229_v4 = vld [vmem:[#allocation0 + $0xc5] sm:$0x8]  }
 0x129   :  { %v3132_v11 = vld [vmem:[#allocation0 + $0x344] sm:$0x20]   ;;  %v3126_v23 = vsel %vm1292_vm2, %v3124_v7, %v3122_v14  ;;  %v3233_v5 = vld [vmem:[#allocation0 + $0x104] sm:$0x10]   ;;  %v3227_v8 = vsel %vm1288_vm1, %v3225_v58, %v3223_v63 }
 0x12a   :  { %v3136_v12 = vld [vmem:[#allocation0 + $0x383] sm:$0x40]   ;;  %v3130_v33 = vsel %vm1296_vm3, %v3128_v10, %v3126_v23  ;;  %v3237_v9 = vld [vmem:[#allocation0 + $0x143] sm:$0x20]  }
 0x12b   :  { %v3140_v15 = vld [vmem:[#allocation0 + $0x3c2] sm:$0x80]   ;;  %v3134_v44 = vsel %vm1300_vm4, %v3132_v11, %v3130_v33  ;;  %v3241_v10 = vld [vmem:[#allocation0 + $0x182] sm:$0x40]  }
 0x12c   :  { %v3151_v16 = vld [vmem:[#allocation0 + $0x448] sm:$0x2]   ;;  %v3138_v52 = vsel %vm1304_vm5, %v3136_v12, %v3134_v44  ;;  %v3231_v12 = vsel %vm1292_vm2, %v3229_v4, %v3227_v8  ;;  %v3253_v13 = vld [vmem:[#allocation0 + $0x208] sm:$0x1]  }
 0x12d   :  { %v3155_v17 = vld [vmem:[#allocation0 + $0x487] sm:$0x4]   ;;  %v3142_v60 = vsel %vm1308_vm6, %v3140_v15, %v3138_v52  ;;  %v3255_v14 = vld [vmem:[#allocation0 + $0x247] sm:$0x2]  }
 0x12e   :  { %v3159_v19 = vld [vmem:[#allocation0 + $0x4c6] sm:$0x8]   ;;  %3143 = vrot.lane.b32.xlu1 %v3142_v60, %s4080_s30  ;;  %v3259_v15 = vld [vmem:[#allocation0 + $0x286] sm:$0x4]  }
 0x12f   :  { %v3163_v20 = vld [vmem:[#allocation0 + $0x505] sm:$0x10]   ;;  %v3263_v22 = vld [vmem:[#allocation0 + $0x2c5] sm:$0x8]  }
 0x130   :  { %v3149_v27 = vld [vmem:[#allocation0 + $0x409] sm:$0x1]   ;;  %v3267_v23 = vld [vmem:[#allocation0 + $0x304] sm:$0x10]  }
 0x131   :  { %v3167_v28 = vld [vmem:[#allocation0 + $0x544] sm:$0x20]   ;;  %v3153_v34 = vsel %vm1284_vm0, %v3151_v16, %v3149_v27  ;;  %v5221_v27 = vpop.permute.xlu1 %2170   ;;  %v3288_v52 = vld [vmem:[#allocation0 + $0x408] sm:$0x1]  }
 0x132   :  { %v3171_v36 = vld [vmem:[#allocation0 + $0x583] sm:$0x40]   ;;  %v3157_v45 = vsel %vm1288_vm1, %v3155_v17, %v3153_v34  ;;  %v3235_v17 = vsel %vm1296_vm3, %v3233_v5, %v3231_v12  ;;  %v3302_v63 = vld [vmem:[#allocation0 + $0x504] sm:$0x10]  }
 0x133   :  { %v3161_v53 = vsel %vm1292_vm2, %v3159_v19, %v3157_v45  ;;  %v3175_v62 = vld [vmem:[#allocation0 + $0x5c2] sm:$0x80]   ;;  %v3245_v19 = vld [vmem:[#allocation0 + $0x1c1] sm:$0x80]  }
 0x134   :  { %v3165_v61 = vsel %vm1296_vm3, %v3163_v20, %v3161_v53  ;;  %v3257_v20 = vsel %vm1284_vm0, %v3255_v14, %v3253_v13  ;;  %v3194_v31 = vld [vmem:[#allocation0 + $0x6c6] sm:$0x8]   ;;  %v3290_v53 = vld [vmem:[#allocation0 + $0x447] sm:$0x2]  }
 0x135   :  { %v3169_v7 = vsel %vm1300_vm4, %v3167_v28, %v3165_v61  ;;  %v3239_v28 = vsel %vm1300_vm4, %v3237_v9, %v3235_v17  ;;  %v3261_v29 = vsel %vm1288_vm1, %v3259_v15, %v3257_v20  ;;  %v3198_v32 = vld [vmem:[#allocation0 + $0x705] sm:$0x10]   ;;  %v5231_v54 = vpop.permute.xlu1 %2240   ;;  %v3292_v60 = vsel %vm1284_vm0, %v3290_v53, %v3288_v52  ;;  %v3294_v61 = vld [vmem:[#allocation0 + $0x486] sm:$0x4]  }
 0x136   :  { %v3173_v11 = vsel %vm1304_vm5, %v3171_v36, %v3169_v7  ;;  %v3243_v33 = vsel %vm1304_vm5, %v3241_v10, %v3239_v28  ;;  %v3265_v34 = vsel %vm1292_vm2, %v3263_v22, %v3261_v29  ;;  %v3271_v36 = vld [vmem:[#allocation0 + $0x343] sm:$0x20]   ;;  %v3184_v37 = vld [vmem:[#allocation0 + $0x609] sm:$0x1]   ;;  %v3296_v8 = vsel %vm1288_vm1, %v3294_v61, %v3292_v60  ;;  %v3997_v60 = vld [vmem:[%s5697_s0 + $0x10] sm:$0x3] }
 0x137   :  { %v3177_v16 = vsel %vm1308_vm6, %v3175_v62, %v3173_v11  ;;  %v3186_v38 = vld [vmem:[#allocation0 + $0x648] sm:$0x2]   ;;  %v3247_v44 = vsel %vm1308_vm6, %v3245_v19, %v3243_v33  ;;  %v3269_v45 = vsel %vm1296_vm3, %v3267_v23, %v3265_v34  ;;  %v3298_v62 = vld [vmem:[#allocation0 + $0x4c5] sm:$0x8]   ;;  %1244 = vst [vmem:[#allocation0 + $0x40] sm:$0x3] %v3997_v60 }
 0x138   :  { %3178 = vrot.lane.b32.xlu0 %v3177_v16, %s4080_s30  ;;  %v3190_v43 = vld [vmem:[#allocation0 + $0x687] sm:$0x4]   ;;  %v3188_v46 = vsel %vm1284_vm0, %v3186_v38, %v3184_v37  ;;  %v3273_v5 = vsel %vm1300_vm4, %v3271_v36, %v3269_v45  ;;  %v3275_v7 = vld [vmem:[#allocation0 + $0x382] sm:$0x40]   ;;  %v3300_v13 = vsel %vm1292_vm2, %v3298_v62, %v3296_v8  ;;  %v3949_v37 = vld [vmem:[%s5697_s0 + $0x70] sm:$0x3] }
 0x139   :  { %v3202_v48 = vld [vmem:[#allocation0 + $0x744] sm:$0x20]   ;;  %v3192_v57 = vsel %vm1288_vm1, %v3190_v43, %v3188_v46  ;;  %v3306_v9 = vld [vmem:[#allocation0 + $0x543] sm:$0x20]   ;;  %v3304_v19 = vsel %vm1296_vm3, %v3302_v63, %v3300_v13  ;;  %1004 = vst [vmem:[#allocation0 + $0x1c0] sm:$0x3] %v3949_v37 }
 0x13a   :  { %v3206_v50 = vld [vmem:[#allocation0 + $0x783] sm:$0x40]   ;;  %v3196_v4 = vsel %vm1292_vm2, %v3194_v31, %v3192_v57  ;;  %v3310_v10 = vld [vmem:[#allocation0 + $0x582] sm:$0x40]   ;;  %v3277_v31 = vsel %vm1304_vm5, %v3275_v7, %v3273_v5  ;;  %v3957_v45 = vld [vmem:[%s5697_s0 + $0x60] sm:$0x3]  ;;  %v5287_v7 = vpop.permute.xlu0 %2275  }
 0x13b   :  { %v3210_v58 = vld [vmem:[#allocation0 + $0x7c2] sm:$0x80]   ;;  %v3200_v11 = vsel %vm1296_vm3, %v3198_v32, %v3196_v4  ;;  %v3279_v12 = vld [vmem:[#allocation0 + $0x3c1] sm:$0x80]   ;;  %v3308_v32 = vsel %vm1300_vm4, %v3306_v9, %v3304_v19  ;;  %v3965_v46 = vld [vmem:[%s5697_s0 + $0x50] sm:$0x3] }
 0x13c   :  { %3248 = vrot.lane.b32.xlu0 %v3247_v44, %s4081_s7  ;;  %v3323_v14 = vld [vmem:[#allocation0 + $0x608] sm:$0x1]   ;;  %v3204_v17 = vsel %vm1300_vm4, %v3202_v48, %v3200_v11  ;;  %v3312_v43 = vsel %vm1304_vm5, %v3310_v10, %v3308_v32  ;;  %v3973_v48 = vld [vmem:[%s5697_s0 + $0x40] sm:$0x3]  ;;  %1044 = vst [vmem:[#allocation0 + $0x180] sm:$0x3] %v3957_v45  ;;  %v3281_v61 = vsel %vm1308_vm6, %v3279_v12, %v3277_v31 }
 0x13d   :  { %v3325_v15 = vld [vmem:[#allocation0 + $0x647] sm:$0x2]   ;;  %v3208_v29 = vsel %vm1304_vm5, %v3206_v50, %v3204_v17  ;;  %1084 = vst [vmem:[#allocation0 + $0x140] sm:$0x3] %v3965_v46  ;;  %1124 = vst [vmem:[#allocation0 + $0x100] sm:$0x3] %v3973_v48  ;;  %v5315_v17 = vpop.permute.xlu1 %2309  }
 0x13e   :  { %v3329_v16 = vld [vmem:[#allocation0 + $0x686] sm:$0x4]   ;;  %v3327_v22 = vsel %vm1284_vm0, %v3325_v15, %v3323_v14  ;;  %v3212_v38 = vsel %vm1308_vm6, %v3210_v58, %v3208_v29  ;;  %v3981_v57 = vld [vmem:[%s5697_s0 + $0x30] sm:$0x3]  ;;  %v3989_v58 = vld [vmem:[%s5697_s0 + $0x20] sm:$0x3]  ;;  %v5330_v29 = vpop.permute.xlu0 %2344  }
 0x13f   :  { %v3314_v20 = vld [vmem:[#allocation0 + $0x5c1] sm:$0x80]   ;;  %v3331_v33 = vsel %vm1288_vm1, %v3329_v16, %v3327_v22  ;;  %3213 = vrot.lane.b32.xlu1 %v3212_v38, %s4080_s30  ;;  %1164 = vst [vmem:[#allocation0 + $0xc0] sm:$0x3] %v3981_v57  ;;  %1204 = vst [vmem:[#allocation0 + $0x80] sm:$0x3] %v3989_v58 }
 0x140   :  { %v3333_v23 = vld [vmem:[#allocation0 + $0x6c5] sm:$0x8]   ;;  %v3316_v50 = vsel %vm1308_vm6, %v3314_v20, %v3312_v43  ;;  %v1279_v63 = vld [vmem:[%s5697_s0] sm:$0x3]  ;;  %v3885_v4 = vld [vmem:[%s5697_s0 + $0xf0] sm:$0x3] }
 0x141   :  { %v3337_v28 = vld [vmem:[#allocation0 + $0x704] sm:$0x10]   ;;  %v3335_v44 = vsel %vm1292_vm2, %v3333_v23, %v3331_v33  ;;  %3317 = vrot.lane.b32.xlu0 %v3316_v50, %s4081_s7  ;;  %v3893_v5 = vld [vmem:[%s5697_s0 + $0xe0] sm:$0x3]  ;;  %1280 = vst [vmem:[#allocation0] sm:$0x3] %v1279_v63 }
 0x142   :  { %v3341_v34 = vld [vmem:[#allocation0 + $0x743] sm:$0x20]   ;;  %v3339_v52 = vsel %vm1296_vm3, %v3337_v28, %v3335_v44  ;;  %684 = vst [vmem:[#allocation0 + $0x3c0] sm:$0x3] %v3885_v4  ;;  %724 = vst [vmem:[#allocation0 + $0x380] sm:$0x3] %v3893_v5  ;;  %v5335_v57 = vpop.permute.xlu0 %2414  }
 0x143   :  { %v3345_v36 = vld [vmem:[#allocation0 + $0x782] sm:$0x40]   ;;  %v3343_v62 = vsel %vm1300_vm4, %v3341_v34, %v3339_v52  ;;  %v3901_v9 = vld [vmem:[%s5697_s0 + $0xd0] sm:$0x3]  ;;  %v3909_v10 = vld [vmem:[%s5697_s0 + $0xc0] sm:$0x3]  ;;  %3282 = vrot.lane.b32.xlu1 %v3281_v61, %s4081_s7 }
 0x144   :  { %v3349_v53 = vld [vmem:[#allocation0 + $0x7c1] sm:$0x80]   ;;  %v3347_v8 = vsel %vm1304_vm5, %v3345_v36, %v3343_v62  ;;  %v3917_v11 = vld [vmem:[%s5697_s0 + $0xb0] sm:$0x3]  ;;  %764 = vst [vmem:[#allocation0 + $0x340] sm:$0x3] %v3901_v9 }
 0x145   :  { %804 = vst [vmem:[#allocation0 + $0x300] sm:$0x3] %v3909_v10  ;;  %844 = vst [vmem:[#allocation0 + $0x2c0] sm:$0x3] %v3917_v11  ;;  %v3925_v12 = vld [vmem:[%s5697_s0 + $0xa0] sm:$0x3]  ;;  %v3351_v19 = vsel %vm1308_vm6, %v3349_v53, %v3347_v8 }
 0x146   :  { %v3933_v13 = vld [vmem:[%s5697_s0 + $0x90] sm:$0x3]  ;;  %v3941_v14 = vld [vmem:[%s5697_s0 + $0x80] sm:$0x3]  ;;  %884 = vst [vmem:[#allocation0 + $0x280] sm:$0x3] %v3925_v12 }
 0x147   :  { %924 = vst [vmem:[#allocation0 + $0x240] sm:$0x3] %v3933_v13  ;;  %964 = vst [vmem:[#allocation0 + $0x200] sm:$0x3] %v3941_v14  ;;  %v3821_v15 = vld [vmem:[%s5697_s0 + $0x170] sm:$0x3]  ;;  %3352 = vrot.lane.b32.xlu1 %v3351_v19, %s4081_s7 }
 0x148   :  { %v3829_v16 = vld [vmem:[%s5697_s0 + $0x160] sm:$0x3]  ;;  %364 = vst [vmem:[#allocation0 + $0x5c0] sm:$0x3] %v3821_v15  ;;  %v3837_v20 = vld [vmem:[%s5697_s0 + $0x150] sm:$0x3] }
 0x149   :  { %404 = vst [vmem:[#allocation0 + $0x580] sm:$0x3] %v3829_v16  ;;  %v3845_v22 = vld [vmem:[%s5697_s0 + $0x140] sm:$0x3]  ;;  %v3853_v23 = vld [vmem:[%s5697_s0 + $0x130] sm:$0x3] }
 0x14a   :  { %444 = vst [vmem:[#allocation0 + $0x540] sm:$0x3] %v3837_v20  ;;  %484 = vst [vmem:[#allocation0 + $0x500] sm:$0x3] %v3845_v22  ;;  %v3861_v28 = vld [vmem:[%s5697_s0 + $0x120] sm:$0x3] }
 0x14b   :  { %524 = vst [vmem:[#allocation0 + $0x4c0] sm:$0x3] %v3853_v23  ;;  %564 = vst [vmem:[#allocation0 + $0x480] sm:$0x3] %v3861_v28  ;;  %v3360_v31 = vld [vmem:[#allocation0 + $0x40] sm:$0x2]  }
 0x14c   :  { %v3364_v32 = vld [vmem:[#allocation0 + $0x7f] sm:$0x4]   ;;  %v1281_v62 = vld [vmem:[#allocation0] sm:$0x1]   ;;  %v3869_v19 = vld [vmem:[%s5697_s0 + $0x110] sm:$0x3] }
 0x14d   :  { %v3372_v33 = vld [vmem:[#allocation0 + $0xfd] sm:$0x10]   ;;  %v1283_v63 = vld [vmem:[#allocation0 + $0x3f] sm:$0x2]   ;;  %604 = vst [vmem:[#allocation0 + $0x440] sm:$0x3] %v3869_v19 }
 0x14e   :  { %v3358_v34 = vld [vmem:[#allocation0 + $0x1] sm:$0x1]   ;;  %v1287_v4 = vld [vmem:[#allocation0 + $0x7e] sm:$0x4]   ;;  %v1285_v10 = vsel %vm1284_vm0, %v1283_v63, %v1281_v62 }
 0x14f   :  { %v3368_v36 = vld [vmem:[#allocation0 + $0xbe] sm:$0x8]   ;;  %v3362_v38 = vsel %vm1284_vm0, %v3360_v31, %v3358_v34  ;;  %v1291_v11 = vld [vmem:[#allocation0 + $0xbd] sm:$0x8]   ;;  %v1289_v15 = vsel %vm1288_vm1, %v1287_v4, %v1285_v10  ;;  %v3789_v4 = vld [vmem:[%s5697_s0 + $0x1b0] sm:$0x3] }
 0x150   :  { %v3376_v37 = vld [vmem:[#allocation0 + $0x13c] sm:$0x20]   ;;  %v3366_v46 = vsel %vm1288_vm1, %v3364_v32, %v3362_v38  ;;  %v1295_v12 = vld [vmem:[#allocation0 + $0xfc] sm:$0x10]   ;;  %v1293_v31 = vsel %vm1292_vm2, %v1291_v11, %v1289_v15  ;;  %204 = vst [vmem:[#allocation0 + $0x6c0] sm:$0x3] %v3789_v4 }
 0x151   :  { %v3380_v43 = vld [vmem:[#allocation0 + $0x17b] sm:$0x40]   ;;  %v3370_v58 = vsel %vm1292_vm2, %v3368_v36, %v3366_v46  ;;  %v1299_v16 = vld [vmem:[#allocation0 + $0x13b] sm:$0x20]   ;;  %v1297_v36 = vsel %vm1296_vm3, %v1295_v12, %v1293_v31 }
 0x152   :  { %v3402_v44 = vld [vmem:[#allocation0 + $0x2be] sm:$0x8]   ;;  %v3374_v5 = vsel %vm1296_vm3, %v3372_v33, %v3370_v58  ;;  %v1303_v32 = vld [vmem:[#allocation0 + $0x17a] sm:$0x40]  }
 0x153   :  { %v3406_v45 = vld [vmem:[#allocation0 + $0x2fd] sm:$0x10]   ;;  %v3378_v13 = vsel %vm1300_vm4, %v3376_v37, %v3374_v5  ;;  %v1307_v37 = vld [vmem:[#allocation0 + $0x1b9] sm:$0x80]  }
 0x154   :  { %v3384_v48 = vld [vmem:[#allocation0 + $0x1ba] sm:$0x80]   ;;  %v3382_v22 = vsel %vm1304_vm5, %v3380_v43, %v3378_v13  ;;  %v1301_v43 = vsel %vm1300_vm4, %v1299_v16, %v1297_v36  ;;  %v1313_v11 = vld [vmem:[#allocation0 + $0x200] sm:$0x1]  }
 0x155   :  { %v3392_v50 = vld [vmem:[#allocation0 + $0x201] sm:$0x1]   ;;  %v3386_v33 = vsel %vm1308_vm6, %v3384_v48, %v3382_v22  ;;  %v1305_v46 = vsel %vm1304_vm5, %v1303_v32, %v1301_v43  ;;  %v5364_v48 = vpop.permute.xlu0 %2483   ;;  %v1364_v15 = vld [vmem:[#allocation0 + $0x53b] sm:$0x20]  }
 0x156   :  { %v3394_v52 = vld [vmem:[#allocation0 + $0x240] sm:$0x2]   ;;  %3387 = vrot.lane.b32.xlu0 %v3386_v33, %s4082_s27  ;;  %v1372_v32 = vld [vmem:[#allocation0 + $0x5b9] sm:$0x80]  }
 0x157   :  { %v3398_v53 = vld [vmem:[#allocation0 + $0x27f] sm:$0x4]   ;;  %v3396_v60 = vsel %vm1284_vm0, %v3394_v52, %v3392_v50  ;;  %v1309_v50 = vsel %vm1308_vm6, %v1307_v37, %v1305_v46  ;;  %v1352_v52 = vld [vmem:[#allocation0 + $0x47e] sm:$0x4]  }
 0x158   :  { %v3414_v61 = vld [vmem:[#allocation0 + $0x37b] sm:$0x40]   ;;  %v3400_v8 = vsel %vm1288_vm1, %v3398_v53, %v3396_v60  ;;  %v3757_v53 = vld [vmem:[%s5697_s0 + $0x1f0] sm:$0x3]  ;;  %1311 = vst.msk [vmem:[%s5698_s1] sm:$0xff] %vm1310_vm7, %v1309_v50  }
 0x159   :  { %v3410_v9 = vld [vmem:[#allocation0 + $0x33c] sm:$0x20]   ;;  %v3404_v14 = vsel %vm1292_vm2, %v3402_v44, %v3400_v8  ;;  %v5360_v44 = vpop.permute.xlu1 %2379   ;;  %v3773_v60 = vld [vmem:[%s5697_s0 + $0x1d0] sm:$0x3]  ;;  %44 = vst [vmem:[#allocation0 + $0x7c0] sm:$0x3] %v3757_v53 }
 0x15a   :  { %v3877_v20 = vld [vmem:[%s5697_s0 + $0x100] sm:$0x3]  ;;  %v3408_v23 = vsel %vm1296_vm3, %v3406_v45, %v3404_v14  ;;  %124 = vst [vmem:[#allocation0 + $0x740] sm:$0x3] %v3773_v60  ;;  %1444 = vst.msk [vmem:[%s5698_s1] sm:$0xff] %vm1443_vm8, %v4747_v35  }
 0x15b   :  { %v3418_v28 = vld [vmem:[#allocation0 + $0x3ba] sm:$0x80]   ;;  %644 = vst [vmem:[#allocation0 + $0x400] sm:$0x3] %v3877_v20  ;;  %v3412_v34 = vsel %vm1300_vm4, %v3410_v9, %v3408_v23  ;;  %v1360_v35 = vld [vmem:[#allocation0 + $0x4fc] sm:$0x10]  }
 0x15c   :  { %v3416_v38 = vsel %vm1304_vm5, %v3414_v61, %v3412_v34  ;;  %v3765_v58 = vld [vmem:[%s5697_s0 + $0x1e0] sm:$0x3]  ;;  %v3805_v9 = vld [vmem:[%s5697_s0 + $0x190] sm:$0x3]  ;;  %1583 = vst.msk [vmem:[%s5698_s1] sm:$0xff] %vm1582_vm9, %v4822_v26  }
 0x15d   :  { %v3420_v45 = vsel %vm1308_vm6, %v3418_v28, %v3416_v38  ;;  %v1356_v61 = vld [vmem:[#allocation0 + $0x4bd] sm:$0x8]   ;;  %v3433_v62 = vld [vmem:[#allocation0 + $0x47f] sm:$0x4]   ;;  %84 = vst [vmem:[#allocation0 + $0x780] sm:$0x3] %v3765_v58  ;;  %v5401_v12 = vpop.permute.xlu1 %2448  }
 0x15e   :  { %3421 = vrot.lane.b32.xlu1 %v3420_v45, %s4082_s27  ;;  %v3781_v63 = vld [vmem:[%s5697_s0 + $0x1c0] sm:$0x3]  ;;  %284 = vst [vmem:[#allocation0 + $0x640] sm:$0x3] %v3805_v9  ;;  %1722 = vst.msk [vmem:[%s5698_s1] sm:$0xff] %vm1721_vm10, %v4941_v21  }
 0x15f   :  { %v3797_v5 = vld [vmem:[%s5697_s0 + $0x1a0] sm:$0x3]  ;;  %164 = vst [vmem:[#allocation0 + $0x700] sm:$0x3] %v3781_v63  ;;  %1861 = vst.msk [vmem:[%s5698_s1] sm:$0xff] %vm1860_vm11, %v4989_v56  }
 0x160   :  { %v3437_v8 = vld [vmem:[#allocation0 + $0x4be] sm:$0x8]   ;;  %244 = vst [vmem:[#allocation0 + $0x680] sm:$0x3] %v3797_v5  ;;  %v1348_v14 = vld [vmem:[#allocation0 + $0x43f] sm:$0x2]  }
 0x161   :  { %v3813_v10 = vld [vmem:[%s5697_s0 + $0x180] sm:$0x3]  ;;  %v5410_v53 = vpop.permute.xlu1 %2518   ;;  %2000 = vst.msk [vmem:[%s5698_s1] sm:$0xff] %vm1999_vm12, %v5114_v24  }
 0x162   :  { %v1346_v13 = vld [vmem:[#allocation0 + $0x400] sm:$0x1]   ;;  %v3427_v16 = vld [vmem:[#allocation0 + $0x401] sm:$0x1]   ;;  %324 = vst [vmem:[#allocation0 + $0x600] sm:$0x3] %v3813_v10 }
 0x163   :  { %v1350_v19 = vsel %vm1284_vm0, %v1348_v14, %v1346_v13  ;;  %v1368_v20 = vld [vmem:[#allocation0 + $0x57a] sm:$0x40]   ;;  %v3429_v22 = vld [vmem:[#allocation0 + $0x440] sm:$0x2]   ;;  %2139 = vst.msk [vmem:[%s5698_s1] sm:$0xff] %vm2138_vm13, %v5165_v1  }
 0x164   :  { %v1315_v23 = vld [vmem:[#allocation0 + $0x23f] sm:$0x2]   ;;  %v1354_v31 = vsel %vm1288_vm1, %v1352_v52, %v1350_v19  ;;  %v3431_v33 = vsel %vm1284_vm0, %v3429_v22, %v3427_v16  ;;  %v3441_v34 = vld [vmem:[#allocation0 + $0x4fd] sm:$0x10]   ;;  %2278 = vst.msk [vmem:[%s5698_s1] sm:$0xff] %vm2277_vm14, %v5287_v7  }
 0x165   :  { %v1319_v28 = vld [vmem:[#allocation0 + $0x27e] sm:$0x4]   ;;  %v1317_v36 = vsel %vm1284_vm0, %v1315_v23, %v1313_v11  ;;  %v1358_v43 = vsel %vm1292_vm2, %v1356_v61, %v1354_v31  ;;  %v3435_v45 = vsel %vm1288_vm1, %v3433_v62, %v3431_v33  ;;  %v3445_v46 = vld [vmem:[#allocation0 + $0x53c] sm:$0x20]   ;;  %2417 = vst.msk [vmem:[%s5698_s1] sm:$0xff] %vm2416_vm15, %v5335_v57  }
 0x166   :  { %v1323_v37 = vld [vmem:[#allocation0 + $0x2bd] sm:$0x8]   ;;  %v1321_v50 = vsel %vm1288_vm1, %v1319_v28, %v1317_v36  ;;  %v1362_v58 = vsel %vm1296_vm3, %v1360_v35, %v1358_v43  ;;  %v3439_v60 = vsel %vm1292_vm2, %v3437_v8, %v3435_v45  ;;  %v3449_v61 = vld [vmem:[#allocation0 + $0x57b] sm:$0x40]  }
 0x167   :  { %v1327_v38 = vld [vmem:[#allocation0 + $0x2fc] sm:$0x10]   ;;  %v1325_v62 = vsel %vm1292_vm2, %v1323_v37, %v1321_v50  ;;  %v1366_v26 = vsel %vm1300_vm4, %v1364_v15, %v1362_v58  ;;  %v3443_v4 = vsel %vm1296_vm3, %v3441_v34, %v3439_v60  ;;  %v3453_v5 = vld [vmem:[#allocation0 + $0x5ba] sm:$0x80]  }
 0x168   :  { %v1331_v52 = vld [vmem:[#allocation0 + $0x33b] sm:$0x20]   ;;  %v1329_v35 = vsel %vm1296_vm3, %v1327_v38, %v1325_v62  ;;  %v1370_v21 = vsel %vm1304_vm5, %v1368_v20, %v1366_v26  ;;  %v3447_v9 = vsel %vm1300_vm4, %v3445_v46, %v3443_v4  ;;  %v3468_v10 = vld [vmem:[#allocation0 + $0x67f] sm:$0x4]  }
 0x169   :  { %v1335_v63 = vld [vmem:[#allocation0 + $0x37a] sm:$0x40]   ;;  %v3472_v11 = vld [vmem:[#allocation0 + $0x6be] sm:$0x8]   ;;  %v1333_v14 = vsel %vm1300_vm4, %v1331_v52, %v1329_v35  ;;  %v1374_v15 = vsel %vm1308_vm6, %v1372_v32, %v1370_v21  ;;  %v3451_v16 = vsel %vm1304_vm5, %v3449_v61, %v3447_v9 }
 0x16a   :  { %v1339_v8 = vld [vmem:[#allocation0 + $0x3b9] sm:$0x80]   ;;  %v3476_v13 = vld [vmem:[#allocation0 + $0x6fd] sm:$0x10]   ;;  %v1337_v22 = vsel %vm1304_vm5, %v1335_v63, %v1333_v14  ;;  %4006 = vst.msk [vmem:[%s5698_s1 + $0x10] sm:$0xff] %vm1310_vm7, %v1374_v15   ;;  %v3455_v28 = vsel %vm1308_vm6, %v3453_v5, %v3451_v16 }
 0x16b   :  { %v3462_v19 = vld [vmem:[#allocation0 + $0x601] sm:$0x1]   ;;  %v1379_v23 = vld [vmem:[#allocation0 + $0x600] sm:$0x1]   ;;  %v1341_v32 = vsel %vm1308_vm6, %v1339_v8, %v1337_v22  ;;  %4009 = vst.msk [vmem:[%s5698_s1 + $0x10] sm:$0xff] %vm1443_vm8, %v4790_v51   ;;  %3456 = vrot.lane.b32.xlu0 %v3455_v28, %s4082_s27 }
 0x16c   :  { %v3464_v20 = vld [vmem:[#allocation0 + $0x640] sm:$0x2]   ;;  %v1381_v33 = vld [vmem:[#allocation0 + $0x63f] sm:$0x2]   ;;  %4005 = vst.msk [vmem:[%s5698_s1 + $0x8] sm:$0xff] %vm1310_vm7, %v1341_v32  }
 0x16d   :  { %v3466_v31 = vsel %vm1284_vm0, %v3464_v20, %v3462_v19  ;;  %v1385_v34 = vld [vmem:[#allocation0 + $0x67e] sm:$0x4]   ;;  %v3480_v37 = vld [vmem:[#allocation0 + $0x73c] sm:$0x20]   ;;  %v1383_v38 = vsel %vm1284_vm0, %v1381_v33, %v1379_v23  ;;  %4008 = vst.msk [vmem:[%s5698_s1 + $0x8] sm:$0xff] %vm1443_vm8, %v4810_v3   ;;  %vm2555_vm0 = vcmask 130160  }
 0x16e   :  { %v1389_v36 = vld [vmem:[#allocation0 + $0x6bd] sm:$0x8]   ;;  %v3470_v51 = vsel %vm1288_vm1, %v3468_v10, %v3466_v31  ;;  %v3484_v46 = vld [vmem:[#allocation0 + $0x77b] sm:$0x40]   ;;  %v1387_v3 = vsel %vm1288_vm1, %v1385_v34, %v1383_v38  ;;  %4012 = vst.msk [vmem:[%s5698_s1 + $0x10] sm:$0xff] %vm1582_vm9, %v4859_v55   ;;  %4011 = vst.msk [vmem:[%s5698_s1 + $0x8] sm:$0xff] %vm1582_vm9, %v4866_v0  }
 0x16f   :  { %v1393_v43 = vld [vmem:[#allocation0 + $0x6fc] sm:$0x10]   ;;  %v3474_v45 = vsel %vm1292_vm2, %v3472_v11, %v3470_v51  ;;  %v3488_v52 = vld [vmem:[#allocation0 + $0x7ba] sm:$0x80]   ;;  %v1391_v58 = vsel %vm1292_vm2, %v1389_v36, %v1387_v3  ;;  %4015 = vst.msk [vmem:[%s5698_s1 + $0x10] sm:$0xff] %vm1721_vm10, %v4984_v39   ;;  %4014 = vst.msk [vmem:[%s5698_s1 + $0x8] sm:$0xff] %vm1721_vm10, %v4962_v30   ;;  %v2554_v30 = vpop.permute.xlu0 %2553  }
 0x170   :  { %v1397_v50 = vld [vmem:[#allocation0 + $0x73b] sm:$0x20]   ;;  %v3478_v55 = vsel %vm1296_vm3, %v3476_v13, %v3474_v45  ;;  %v1395_v39 = vsel %vm1296_vm3, %v1393_v43, %v1391_v58  ;;  %4018 = vst.msk [vmem:[%s5698_s1 + $0x10] sm:$0xff] %vm1860_vm11, %v5036_v47   ;;  %4017 = vst.msk [vmem:[%s5698_s1 + $0x8] sm:$0xff] %vm1860_vm11, %v5046_v2   ;;  %vm2694_vm1 = vcmask 113760   ;;  %vm2833_vm2 = vcmask 97360  }
 0x171   :  { %v1401_v60 = vld [vmem:[#allocation0 + $0x77a] sm:$0x40]   ;;  %v3482_v0 = vsel %vm1300_vm4, %v3480_v37, %v3478_v55  ;;  %v1399_v24 = vsel %vm1300_vm4, %v1397_v50, %v1395_v39  ;;  %4021 = vst.msk [vmem:[%s5698_s1 + $0x10] sm:$0xff] %vm1999_vm12, %v5160_v49   ;;  %4020 = vst.msk [vmem:[%s5698_s1 + $0x8] sm:$0xff] %vm1999_vm12, %v5145_v40   ;;  %v2588_v40 = vpop.permute.xlu1 %2587   ;;  %vm2972_vm3 = vcmask 80960   ;;  %vm3111_vm4 = vcmask 64560  }
 0x172   :  { %v1405_v56 = vld [vmem:[#allocation0 + $0x7b9] sm:$0x80]   ;;  %v3486_v47 = vsel %vm1304_vm5, %v3484_v46, %v3482_v0  ;;  %v1403_v49 = vsel %vm1304_vm5, %v1401_v60, %v1399_v24  ;;  %4024 = vst.msk [vmem:[%s5698_s1 + $0x10] sm:$0xff] %vm2138_vm13, %v5211_v6   ;;  %4023 = vst.msk [vmem:[%s5698_s1 + $0x8] sm:$0xff] %vm2138_vm13, %v5221_v27   ;;  %vm3250_vm5 = vcmask 48160  }
 0x173   :  { %v3490_v2 = vsel %vm1308_vm6, %v3488_v52, %v3486_v47  ;;  %v1407_v1 = vsel %vm1308_vm6, %v1405_v56, %v1403_v49  ;;  %4027 = vst.msk [vmem:[%s5698_s1 + $0x10] sm:$0xff] %vm2277_vm14, %v5330_v29   ;;  %4026 = vst.msk [vmem:[%s5698_s1 + $0x8] sm:$0xff] %vm2277_vm14, %v5315_v17   ;;  %vm3389_vm6 = vcmask 31760  }
 0x174   :  { %3491 = vrot.lane.b32.xlu1 %v3490_v2, %s4082_s27  ;;  %4007 = vst.msk [vmem:[%s5698_s1 + $0x18] sm:$0xff] %vm1310_vm7, %v1407_v1  }
 0x175   :  { %4030 = vst.msk [vmem:[%s5698_s1 + $0x10] sm:$0xff] %vm2416_vm15, %v5364_v48   ;;  %4029 = vst.msk [vmem:[%s5698_s1 + $0x8] sm:$0xff] %vm2416_vm15, %v5401_v12  }
 0x176   :  { %2556 = vst.msk [vmem:[%s5698_s1] sm:$0xff] %vm2555_vm0, %v2554_v30   ;;  %4032 = vst.msk [vmem:[%s5698_s1 + $0x8] sm:$0xff] %vm2555_vm0, %v2588_v40  }
 0x177   :  { %4010 = vst.msk [vmem:[%s5698_s1 + $0x18] sm:$0xff] %vm1443_vm8, %v4848_v42   ;;  %v2623_v42 = vpop.permute.xlu0 %2622  }
 0x178   :  { %4013 = vst.msk [vmem:[%s5698_s1 + $0x18] sm:$0xff] %vm1582_vm9, %v4877_v18  }
 0x179   :  { %4033 = vst.msk [vmem:[%s5698_s1 + $0x10] sm:$0xff] %vm2555_vm0, %v2623_v42  }
 0x17a   :  { %4016 = vst.msk [vmem:[%s5698_s1 + $0x18] sm:$0xff] %vm1721_vm10, %v5031_v41   ;;  %v2658_v41 = vpop.permute.xlu1 %2657  }
 0x17b   :  { %4019 = vst.msk [vmem:[%s5698_s1 + $0x18] sm:$0xff] %vm1860_vm11, %v5056_v25   ;;  %v2693_v18 = vpop.permute.xlu0 %2692  }
 0x17c   :  { %4022 = vst.msk [vmem:[%s5698_s1 + $0x18] sm:$0xff] %vm1999_vm12, %v5206_v59  }
 0x17d   :  { %4025 = vst.msk [vmem:[%s5698_s1 + $0x18] sm:$0xff] %vm2138_vm13, %v5231_v54  }
 0x17e   :  { %2695 = vst.msk [vmem:[%s5698_s1] sm:$0xff] %vm2694_vm1, %v2693_v18   ;;  %v2727_v59 = vpop.permute.xlu1 %2726  }
 0x17f   :  { %4028 = vst.msk [vmem:[%s5698_s1 + $0x18] sm:$0xff] %vm2277_vm14, %v5360_v44   ;;  %v2762_v25 = vpop.permute.xlu0 %2761  }
 0x180   :  { %4031 = vst.msk [vmem:[%s5698_s1 + $0x18] sm:$0xff] %vm2416_vm15, %v5410_v53  }
 0x181   :  { %4034 = vst.msk [vmem:[%s5698_s1 + $0x18] sm:$0xff] %vm2555_vm0, %v2658_v41  }
 0x182   :  { %4036 = vst.msk [vmem:[%s5698_s1 + $0x10] sm:$0xff] %vm2694_vm1, %v2762_v25   ;;  %4035 = vst.msk [vmem:[%s5698_s1 + $0x8] sm:$0xff] %vm2694_vm1, %v2727_v59   ;;  %v2797_v6 = vpop.permute.xlu1 %2796  }
 0x183   :  { %4037 = vst.msk [vmem:[%s5698_s1 + $0x18] sm:$0xff] %vm2694_vm1, %v2797_v6   ;;  %v2832_v27 = vpop.permute.xlu0 %2831  }
 0x184   :  { %2834 = vst.msk [vmem:[%s5698_s1] sm:$0xff] %vm2833_vm2, %v2832_v27  }
 0x186   :  { %v2866_v54 = vpop.permute.xlu1 %2865  }
 0x187   :  { %4038 = vst.msk [vmem:[%s5698_s1 + $0x8] sm:$0xff] %vm2833_vm2, %v2866_v54   ;;  %v2901_v7 = vpop.permute.xlu0 %2900  }
 0x188   :  { %4039 = vst.msk [vmem:[%s5698_s1 + $0x10] sm:$0xff] %vm2833_vm2, %v2901_v7  }
 0x18a   :  { %v2936_v29 = vpop.permute.xlu1 %2935  }
 0x18b   :  { %v2971_v17 = vpop.permute.xlu0 %2970   ;;  %4040 = vst.msk [vmem:[%s5698_s1 + $0x18] sm:$0xff] %vm2833_vm2, %v2936_v29  }
 0x18c   :  { %2973 = vst.msk [vmem:[%s5698_s1] sm:$0xff] %vm2972_vm3, %v2971_v17  }
 0x18e   :  { %v3005_v44 = vpop.permute.xlu1 %3004  }
 0x18f   :  { %v3040_v57 = vpop.permute.xlu0 %3039   ;;  %4041 = vst.msk [vmem:[%s5698_s1 + $0x8] sm:$0xff] %vm2972_vm3, %v3005_v44  }
 0x190   :  { %4042 = vst.msk [vmem:[%s5698_s1 + $0x10] sm:$0xff] %vm2972_vm3, %v3040_v57  }
 0x192   :  { %v3075_v48 = vpop.permute.xlu1 %3074  }
 0x193   :  { %4043 = vst.msk [vmem:[%s5698_s1 + $0x18] sm:$0xff] %vm2972_vm3, %v3075_v48  }
 0x198   :  { %v3110_v12 = vpop.permute.xlu0 %3109  }
 0x199   :  { %3112 = vst.msk [vmem:[%s5698_s1] sm:$0xff] %vm3111_vm4, %v3110_v12  }
 0x1a0   :  { %v3144_v53 = vpop.permute.xlu1 %3143  }
 0x1a1   :  { %4044 = vst.msk [vmem:[%s5698_s1 + $0x8] sm:$0xff] %vm3111_vm4, %v3144_v53  }
 0x1aa   :  { %v3179_v61 = vpop.permute.xlu0 %3178  }
 0x1ab   :  { %4045 = vst.msk [vmem:[%s5698_s1 + $0x10] sm:$0xff] %vm3111_vm4, %v3179_v61  }
 0x1ae   :  { %v3249_v62 = vpop.permute.xlu0 %3248  }
 0x1af   :  { %3251 = vst.msk [vmem:[%s5698_s1] sm:$0xff] %vm3250_vm5, %v3249_v62  }
 0x1b1   :  { %v3214_v63 = vpop.permute.xlu1 %3213  }
 0x1b2   :  { %4046 = vst.msk [vmem:[%s5698_s1 + $0x18] sm:$0xff] %vm3111_vm4, %v3214_v63  }
 0x1b3   :  { %v3318_v26 = vpop.permute.xlu0 %3317  }
 0x1b4   :  { %4048 = vst.msk [vmem:[%s5698_s1 + $0x10] sm:$0xff] %vm3250_vm5, %v3318_v26  }
 0x1b5   :  { %v3283_v4 = vpop.permute.xlu1 %3282  }
 0x1b6   :  { %4047 = vst.msk [vmem:[%s5698_s1 + $0x8] sm:$0xff] %vm3250_vm5, %v3283_v4  }
 0x1b9   :  { %v3353_v5 = vpop.permute.xlu1 %3352  }
 0x1ba   :  { %4049 = vst.msk [vmem:[%s5698_s1 + $0x18] sm:$0xff] %vm3250_vm5, %v3353_v5  }
 0x1c8   :  { %v3388_v35 = vpop.permute.xlu0 %3387  }
 0x1c9   :  { %3390 = vst.msk [vmem:[%s5698_s1] sm:$0xff] %vm3389_vm6, %v3388_v35  }
 0x1d0   :  { %v3422_v8 = vpop.permute.xlu1 %3421  }
 0x1d1   :  { %4050 = vst.msk [vmem:[%s5698_s1 + $0x8] sm:$0xff] %vm3389_vm6, %v3422_v8  }
 0x1dd   :  { %v3457_v21 = vpop.permute.xlu0 %3456  }
 0x1de   :  { %4051 = vst.msk [vmem:[%s5698_s1 + $0x10] sm:$0xff] %vm3389_vm6, %v3457_v21  }
 0x1e6   :  { %v3492_v9 = vpop.permute.xlu1 %3491  }
 0x1e7   :  { %4052 = vst.msk [vmem:[%s5698_s1 + $0x18] sm:$0xff] %vm3389_vm6, %v3492_v9  }

// kernel: quantum_circuit_forward.1
= control target key start
LH: loop header
LB: loop body
LE: loop exit
PB: predicated region body
PF: predicated region fallthrough
CT: control target
= control target key end

     0   :  { %v378_v0 = vmov 0.0   ;;  %vm379_vm0 = vmmov 0   ;;  %s380_s15 = smov 64   ;;  %vm20_vm1 = vcmask 523264   ;;  %v381_v20 = vmov 0   ;;  %s450_s1 = inlined_call_operand.vmem [shape: f32[64,128], index: 1, kind: input, shape index: {}]   ;;  %s451_s0 = inlined_call_operand.vmem [shape: f32[1,128], index: 0, kind: input, shape index: {}]   ;;  %s452_s2 = inlined_call_operand.vmem [shape: f32[32,128], index: 2, kind: output, shape index: {}]  }
   0x1   :  { %332 = vmatprep.subr.mxu0 %v378_v0  ;;  %v19_v1 = vld [vmem:[%s450_s1 + $0x38] sm:$0xff]  ;;  %v18_v2 = vld [vmem:[%s450_s1 + $0x30] sm:$0xff]  ;;  %348 = vmatprep.mubr.msk.f32.mxu0 %vm379_vm0, %v378_v0  ;;  %v17_v3 = vld [vmem:[%s450_s1 + $0x28] sm:$0xff]  ;;  %v264_v37 = vlaneseq  ;;  %vm232_vm2 = vcmask 261120  }
   0x2   :  { %333 = vmatpush3.msra.mxu0 %v19_v1  ;;  %116 = vrot.lane.b32.xlu0 %v19_v1, %s380_s15  ;;  %v16_v4 = vld [vmem:[%s450_s1 + $0x20] sm:$0xff]  ;;  %v15_v5 = vld [vmem:[%s450_s1 + $0x18] sm:$0xff]  ;;  %v14_v6 = vld [vmem:[%s450_s1 + $0x10] sm:$0xff] }
   0x3   :  { %334 = vmatprep.subr.mxu0 %v378_v0  ;;  %112 = vrot.lane.b32.xlu1 %v17_v3, %s380_s15  ;;  %v13_v7 = vld [vmem:[%s450_s1 + $0x8] sm:$0xff]  ;;  %v12_v8 = vld [vmem:[%s450_s1] sm:$0xff]  ;;  %s383_s1 = smov 32   ;;  %v265_v40 = vshrl.u32 %v264_v37, 7 }
   0x4   :  { %335 = vmatpush3.msra.mxu0 %v18_v2  ;;  %351 = vmatprep.subr.mxu1 %v378_v0  ;;  %v11_v9 = vld [vmem:[%s451_s0] sm:$0x1]  ;;  %s382_s0 = smov 96  }
   0x5   :  { %336 = vmatprep.subr.mxu0 %v378_v0  ;;  %367 = vmatprep.mubr.msk.f32.mxu1 %vm379_vm0, %v378_v0  ;;  %v266_v43 = vsub.s32 0, %v265_v40 }
   0x6   :  { %337 = vmatpush3.msra.mxu0 %v17_v3  ;;  %114 = vrot.lane.b32.xlu0 %v18_v2, %s380_s15 }
   0x7   :  { %338 = vmatprep.subr.mxu0 %v378_v0  ;;  %110 = vrot.lane.b32.xlu1 %v16_v4, %s380_s15 }
   0x8   :  { %339 = vmatpush3.msra.mxu0 %v16_v4  ;;  %376 = vset.pattern.permute.xlu1 %v381_v20 }
   0x9   :  { %340 = vmatprep.subr.mxu0 %v378_v0 }
   0xa   :  { %341 = vmatpush3.msra.mxu0 %v15_v5  ;;  %108 = vrot.lane.b32.xlu0 %v15_v5, %s380_s15 }
   0xb   :  { %342 = vmatprep.subr.mxu0 %v378_v0  ;;  %106 = vrot.lane.b32.xlu1 %v14_v6, %s380_s15 }
   0xc   :  { %343 = vmatpush3.msra.mxu0 %v14_v6 }
   0xd   :  { %344 = vmatprep.subr.mxu0 %v378_v0 }
   0xe   :  { %345 = vmatpush3.msra.mxu0 %v13_v7  ;;  %104 = vrot.lane.b32.xlu0 %v13_v7, %s380_s15 }
   0xf   :  { %346 = vmatprep.subr.mxu0 %v378_v0  ;;  %102 = vrot.lane.b32.xlu1 %v12_v8, %s380_s15 }
  0x10   :  { %347 = vmatpush3.msra.mxu0 %v12_v8 }
  0x11   :  { %349 = vmatmul.mubr.msk.f32.vlgmr.msra.gmra.mxu0 %vm20_vm1, %v11_v9 }
  0x74   :  { %v117_v10 = vpop.permute.xlu0 %116 }
  0x75   :  { %352 = vmatpush3.msra.mxu1 %v117_v10  ;;  %v113_v11 = vpop.permute.xlu1 %112 }
  0x76   :  { %353 = vmatprep.subr.mxu1 %v378_v0 }
  0x78   :  { %v115_v12 = vpop.permute.xlu0 %114 }
  0x79   :  { %354 = vmatpush3.msra.mxu1 %v115_v12  ;;  %v111_v13 = vpop.permute.xlu1 %110 }
  0x7a   :  { %355 = vmatprep.subr.mxu1 %v378_v0 }
  0x7b   :  { %356 = vmatpush3.msra.mxu1 %v113_v11 }
  0x7c   :  { %357 = vmatprep.subr.mxu1 %v378_v0  ;;  %v109_v14 = vpop.permute.xlu0 %108 }
  0x7d   :  { %358 = vmatpush3.msra.mxu1 %v111_v13  ;;  %v107_v15 = vpop.permute.xlu1 %106 }
  0x7e   :  { %359 = vmatprep.subr.mxu1 %v378_v0 }
  0x7f   :  { %360 = vmatpush3.msra.mxu1 %v109_v14 }
  0x80   :  { %361 = vmatprep.subr.mxu1 %v378_v0  ;;  %v105_v16 = vpop.permute.xlu0 %104 }
  0x81   :  { %362 = vmatpush3.msra.mxu1 %v107_v15  ;;  %v103_v17 = vpop.permute.xlu1 %102 }
  0x82   :  { %363 = vmatprep.subr.mxu1 %v378_v0 }
  0x83   :  { %364 = vmatpush3.msra.mxu1 %v105_v16 }
  0x84   :  { %365 = vmatprep.subr.mxu1 %v378_v0 }
  0x85   :  { %366 = vmatpush3.msra.mxu1 %v103_v17 }
  0xd1   :  { %v90_v18 = vpop.f32.mrf.mxu0 }
  0xd2   :  { %368 = vmatmul.mubr.msk.f32.vlgmr.msra.gmra.mxu1 %vm20_vm1, %v90_v18 }
  0xd3   :  { %v350_v19 = vpop.f32.mrf.mxu0 }
 0x192   :  { %v195_v21 = vpop.f32.mrf.mxu1 }
 0x193   :  { %236 = vrot.lane.b32.xlu1 %v195_v21, %s382_s0  ;;  %199 = vxpose.xlu0.b32.start.end [1/1] (short) (narrow) %v195_v21, 64  ;;  %v231_v38 = vsub.f32 0.0, %v195_v21 }
 0x194   :  { %v369_v22 = vpop.f32.mrf.mxu1 }
 0x195   :  { %v233_v41 = vsel %vm232_vm2, %v195_v21, %v231_v38 }
 0x196   :  { %v234_v44 = vsel %vm20_vm1, %v233_v41, 0.0 }
 0x197   :  { %v267_v47 = vrot.slane %v234_v44, %v266_v43 }
 0x1bc   :  { %377 = vset.pattern.permute.xlu0 %v381_v20 }
 0x205   :  { %v237_v31 = vpop.permute.xlu1 %236 }
 0x20f   :  { %v215_v23 = vpop.trf.xlu0 }
 0x210   :  { %246 = vperm.xlu1 %376, %v215_v23  }
 0x213   :  { %v216_v24 = vpop.trf.xlu0 }
 0x214   :  { %251 = vperm.xlu1 %376, %v216_v24  }
 0x217   :  { %v217_v25 = vpop.trf.xlu0 }
 0x218   :  { %256 = vperm.xlu1 %376, %v217_v25  }
 0x21b   :  { %v218_v26 = vpop.trf.xlu0 }
 0x21c   :  { %261 = vperm.xlu1 %376, %v218_v26  }
 0x21f   :  { %v219_v27 = vpop.trf.xlu0 }
 0x220   :  { %274 = vperm.xlu1 %376, %v219_v27  }
 0x223   :  { %v220_v28 = vpop.trf.xlu0 }
 0x224   :  { %279 = vperm.xlu1 %376, %v220_v28  }
 0x227   :  { %v221_v29 = vpop.trf.xlu0 }
 0x228   :  { %284 = vperm.xlu1 %376, %v221_v29  }
 0x22b   :  { %v222_v30 = vpop.trf.xlu0 }
 0x22c   :  { %239 = vrot.lane.b32.xlu1 %v195_v21, %s383_s1  ;;  %289 = vperm.xlu0 %377, %v222_v30  }
 0x28b   :  { %v247_v32 = vpop.permute.xlu1 %246 }
 0x28c   :  { %v268_v51 = vmul.f32 %v267_v47, %v247_v32 }
 0x28f   :  { %v252_v33 = vpop.permute.xlu1 %251 }
 0x290   :  { %v269_v52 = vmul.f32 %v267_v47, %v252_v33 }
 0x293   :  { %v257_v34 = vpop.permute.xlu1 %256 }
 0x294   :  { %v270_v53 = vmul.f32 %v267_v47, %v257_v34 }
 0x297   :  { %v262_v35 = vpop.permute.xlu1 %261 }
 0x298   :  { %v271_v54 = vmul.f32 %v267_v47, %v262_v35 }
 0x29b   :  { %v275_v36 = vpop.permute.xlu1 %274 }
 0x29f   :  { %v280_v39 = vpop.permute.xlu1 %279 }
 0x2a3   :  { %v285_v42 = vpop.permute.xlu1 %284 }
 0x2a7   :  { %v240_v45 = vpop.permute.xlu1 %239  ;;  %v290_v49 = vpop.permute.xlu0 %289 }
 0x2a8   :  { %v242_v46 = vsel %vm232_vm2, %v237_v31, %v240_v45 }
 0x2a9   :  { %v243_v48 = vsel %vm20_vm1, %v242_v46, 0.0 }
 0x2aa   :  { %v295_v50 = vrot.slane %v243_v48, %v266_v43 }
 0x2ac   :  { %v296_v55 = vmul.f32 %v295_v50, %v275_v36  ;;  %v297_v56 = vmul.f32 %v295_v50, %v280_v39  ;;  %v298_v57 = vmul.f32 %v295_v50, %v285_v42  ;;  %v299_v58 = vmul.f32 %v295_v50, %v290_v49 }
 0x2ae   :  { %v300_v59 = vadd.f32 %v296_v55, %v268_v51  ;;  %v301_v60 = vadd.f32 %v297_v56, %v269_v52  ;;  %v302_v61 = vadd.f32 %v298_v57, %v270_v53  ;;  %v303_v62 = vadd.f32 %v299_v58, %v271_v54 }
 0x2b0   :  { %304 = vst [vmem:[%s452_s2] sm:$0xff] %v300_v59  ;;  %305 = vst [vmem:[%s452_s2 + $0x8] sm:$0xff] %v301_v60 }
 0x2b1   :  { %306 = vst [vmem:[%s452_s2 + $0x10] sm:$0xff] %v302_v61  ;;  %307 = vst [vmem:[%s452_s2 + $0x18] sm:$0xff] %v303_v62 }

// kernel: custom-call
= control target key start
LH: loop header
LB: loop body
LE: loop exit
PB: predicated region body
PF: predicated region fallthrough
CT: control target
= control target key end

     0   :  { %s112_s0 = inlined_call_operand.vmem [shape: f32[32,32], index: 0, kind: input, shape index: {}]   ;;  %s113_s1 = inlined_call_operand.vmem [shape: f32[32,32], index: 1, kind: input, shape index: {}]   ;;  %s114_s2 = inlined_call_operand.vmem [shape: c64[32,32], index: 2, kind: output, shape index: {}]  }
   0x1   :  { %v5_v0 = vld [vmem:[%s112_s0] sm:$0xff]  ;;  %v36_v1 = vld [vmem:[%s112_s0 + $0x8] sm:$0xff]  ;;  %v38_v2 = vld [vmem:[%s112_s0 + $0x10] sm:$0xff] }
   0x2   :  { %6 = vst [vmem:[%s114_s2] sm:$0xff] %v5_v0  ;;  %37 = vst [vmem:[%s114_s2 + $0x8] sm:$0xff] %v36_v1  ;;  %v40_v3 = vld [vmem:[%s112_s0 + $0x18] sm:$0xff]  ;;  %v19_v4 = vld [vmem:[%s113_s1] sm:$0xff] }
   0x3   :  { %39 = vst [vmem:[%s114_s2 + $0x10] sm:$0xff] %v38_v2  ;;  %v43_v5 = vld [vmem:[%s113_s1 + $0x8] sm:$0xff]  ;;  %41 = vst [vmem:[%s114_s2 + $0x18] sm:$0xff] %v40_v3  ;;  %v45_v6 = vld [vmem:[%s113_s1 + $0x10] sm:$0xff] }
   0x4   :  { %42 = vst [vmem:[%s114_s2 + $0x20] sm:$0xff] %v19_v4  ;;  %44 = vst [vmem:[%s114_s2 + $0x28] sm:$0xff] %v43_v5  ;;  %v47_v7 = vld [vmem:[%s113_s1 + $0x18] sm:$0xff] }
   0x5   :  { %46 = vst [vmem:[%s114_s2 + $0x30] sm:$0xff] %v45_v6  ;;  %48 = vst [vmem:[%s114_s2 + $0x38] sm:$0xff] %v47_v7 }

</bundles_post_ra>
